<compile_context>
chip_gen: v7x
topology: tpu7x:2x2x1
jax: 0.10.0
libtpu: 0.0.40
codegen_flags: <defaults>
</compile_context>

<pallas_src>
import jax
import jax.numpy as jnp
from jax import lax
from jax.experimental import pallas as pl
from jax.experimental.pallas import tpu as pltpu


def _build_kernel(tq, tk, n_real, n_pad, use_bf16_exp):
    mask_keys = (n_pad != n_real)

    def kernel(xq_ref, xkt_ref, v_ref, wqk_ref, u_ref, gamma_ref,
               out_ref, m_sc, l_sc, acc_sc, q_sc):
        ki = pl.program_id(2)
        nk = pl.num_programs(2)

        @pl.when(ki == 0)
        def _():
            m_sc[...] = jnp.full_like(m_sc, -jnp.inf)
            l_sc[...] = jnp.zeros_like(l_sc)
            acc_sc[...] = jnp.zeros_like(acc_sc)
            # q_eff = x_q @ (Wq^T Wk) + Wk^T bq  -- hoisted out of the kv loop.
            q_eff = jnp.dot(xq_ref[0].astype(jnp.bfloat16), wqk_ref[...],
                            preferred_element_type=jnp.float32) + u_ref[...]
            q_sc[...] = q_eff.astype(jnp.bfloat16)

        # Energy tile: plain (tq, Cp) @ (Cp, tk) against the pre-transposed
        # bf16 key stream (no transposed RHS / vxpose), f32 accumulate.
        s = jnp.dot(q_sc[...], xkt_ref[0],
                    preferred_element_type=jnp.float32)              # (tq, tk)

        if mask_keys:
            col = ki * tk + lax.broadcasted_iota(jnp.int32, (tq, tk), 1)
            s = jnp.where(col < n_real, s, jnp.float32(-1e30))

        # Online softmax update (m, l stay f32).
        m_prev = m_sc[...]
        m_new = jnp.maximum(m_prev, jnp.max(s, axis=-1, keepdims=True))
        alpha = jnp.exp(m_prev - m_new)

        if use_bf16_exp:
            # bf16 EUP exp on v6e/v7x; result already bf16 for the P@V matmul.
            p = jnp.exp((s - m_new).astype(jnp.bfloat16))            # (tq, tk)
            p_sum = jnp.sum(p.astype(jnp.float32), axis=-1, keepdims=True)
        else:
            # v5e (no bf16 EUP/VPU): keep exp in f32.
            p_f32 = jnp.exp(s - m_new)
            p_sum = jnp.sum(p_f32, axis=-1, keepdims=True)
            p = p_f32.astype(jnp.bfloat16)

        l_sc[...] = alpha * l_sc[...] + p_sum
        acc_sc[...] = alpha * acc_sc[...] + jnp.dot(
            p, v_ref[0], preferred_element_type=jnp.float32)
        m_sc[...] = m_new

        @pl.when(ki == nk - 1)
        def _():
            # gamma folded into the (tq, 1) reciprocal instead of a (tq, Cp) mul.
            inv_l = gamma_ref[0, 0] * pl.reciprocal(l_sc[...], approx=True)
            out_ref[0] = acc_sc[...] * inv_l + xq_ref[0]

    return kernel


def _pick_tile(n):
    """Largest MXU-friendly tile dividing n; otherwise pad n to a multiple."""
    for t in (512, 256, 128):
        if n % t == 0:
            return t, n
    t = 256 if n >= 256 else 128
    return t, ((n + t - 1) // t) * t


def _device_has_bf16_vpu():
    """True for v6e/v7x (bf16 VPU/EUP); False for v5e and earlier / unknown."""
    try:
        kind = jax.devices()[0].device_kind.lower()
        return not any(v in kind for v in ("v2", "v3", "v4", "v5"))
    except Exception:
        return False


def pam_module(x, params):
    """x: (B, C, H, W) float32, NCHW — same semantics as PyTorch PAM_Module."""
    B, C, H, W = x.shape
    N = H * W
    Cp = ((C + 127) // 128) * 128          # lane-dense padded channel dim
    T, N_pad = _pick_tile(N)
    tq = tk = T
    use_bf16_exp = _device_has_bf16_vpu()

    f32 = jnp.float32
    wq = params["wq"].astype(f32)          # (C//8, C)
    wk = params["wk"].astype(f32)          # (C//8, C)
    wv = params["wv"].astype(f32)          # (C, C)
    bq = params["bq"].astype(f32)
    bv = params["bv"].astype(f32)
    gamma = params["gamma"].reshape(1, 1).astype(f32)
    # bk is softmax-invariant over the key axis (constant per query row): dropped.

    # Folded Q/K weights: energy row i vs key j = (x_i @ Wq^T Wk + Wk^T bq) . x_j
    wqk = wq.T @ wk                        # (C, C)
    u = wk.T @ bq                          # (C,)
    wqk_p = jnp.zeros((Cp, Cp), f32).at[:C, :C].set(wqk).astype(jnp.bfloat16)
    u_p = jnp.zeros((1, Cp), f32).at[0, :C].set(u)

    x_cn = x.reshape(B, C, N)
    x_nc = jnp.transpose(x_cn, (0, 2, 1)).astype(f32)                     # (B,N,C)

    # f32 query / residual stream.
    xq_p = jnp.pad(x_nc, ((0, 0), (0, N_pad - N), (0, Cp - C)))           # (B,Np,Cp)
    # Pre-transposed bf16 key stream (channels major): plain matmul in-kernel.
    xkt_p = jnp.pad(x_cn, ((0, 0), (0, Cp - C), (0, N_pad - N))).astype(jnp.bfloat16)
    # Value stream precomputed once in XLA: V = x @ Wv^T + bv, bf16.
    v = jnp.einsum("bnc,oc->bno", x_nc, wv) + bv[None, None, :]
    v_p = jnp.pad(v, ((0, 0), (0, N_pad - N), (0, Cp - C))).astype(jnp.bfloat16)

    kernel = _build_kernel(tq, tk, N, N_pad, use_bf16_exp)

    out_p = pl.pallas_call(
        kernel,
        out_shape=jax.ShapeDtypeStruct((B, N_pad, Cp), f32),
        grid=(B, N_pad // tq, N_pad // tk),
        in_specs=[
            pl.BlockSpec((1, tq, Cp), lambda b, qi, ki: (b, qi, 0)),   # x query rows (f32)
            pl.BlockSpec((1, Cp, tk), lambda b, qi, ki: (b, 0, ki)),   # x^T key cols (bf16)
            pl.BlockSpec((1, tk, Cp), lambda b, qi, ki: (b, ki, 0)),   # V rows (bf16)
            pl.BlockSpec((Cp, Cp), lambda b, qi, ki: (0, 0)),          # Wq^T Wk (bf16)
            pl.BlockSpec((1, Cp), lambda b, qi, ki: (0, 0)),           # Wk^T bq (f32)
            pl.BlockSpec(memory_space=pltpu.MemorySpace.SMEM),         # gamma scalar
        ],
        out_specs=pl.BlockSpec((1, tq, Cp), lambda b, qi, ki: (b, qi, 0)),
        scratch_shapes=[
            pltpu.VMEM((tq, 1), jnp.float32),       # running max m
            pltpu.VMEM((tq, 1), jnp.float32),       # running sum l
            pltpu.VMEM((tq, Cp), jnp.float32),      # output accumulator
            pltpu.VMEM((tq, Cp), jnp.bfloat16),     # hoisted q_eff (per query tile)
        ],
        compiler_params=pltpu.CompilerParams(
            dimension_semantics=("parallel", "parallel", "arbitrary")),
    )(xq_p, xkt_p, v_p, wqk_p, u_p, gamma)

    # Strip spatial/channel padding and return to NCHW.
    out = out_p[:, :N, :C]
    return jnp.transpose(out, (0, 2, 1)).reshape(B, C, H, W)


def pam_reference(x, params):
    """Pure-JAX f32 reference mirroring the PyTorch forward (for validation)."""
    B, C, H, W = x.shape
    N = H * W
    xf = x.reshape(B, C, N)
    q = jnp.einsum("oc,bcn->bon", params["wq"], xf) + params["bq"][None, :, None]
    k = jnp.einsum("oc,bcn->bon", params["wk"], xf) + params["bk"][None, :, None]
    v = jnp.einsum("oc,bcn->bon", params["wv"], xf) + params["bv"][None, :, None]
    energy = jnp.einsum("bci,bcj->bij", q, k)
    attn = jax.nn.softmax(energy, axis=-1)
    out = jnp.einsum("bcj,bij->bci", v, attn).reshape(B, C, H, W)
    return params["gamma"][0] * out + x


def init_params(key, in_dim):
    """Conv2d(in, out, 1) weights stored squeezed as (out, in)."""
    c8 = in_dim // 8
    ks = jax.random.split(key, 6)
    scale = 1.0 / jnp.sqrt(in_dim)
    return {
        "wq": scale * jax.random.normal(ks[0], (c8, in_dim), jnp.float32),
        "bq": scale * jax.random.normal(ks[1], (c8,), jnp.float32),
        "wk": scale * jax.random.normal(ks[2], (c8, in_dim), jnp.float32),
        "bk": scale * jax.random.normal(ks[3], (c8,), jnp.float32),
        "wv": scale * jax.random.normal(ks[4], (in_dim, in_dim), jnp.float32),
        "bv": scale * jax.random.normal(ks[5], (in_dim,), jnp.float32),
        # PyTorch inits gamma to zero; use a nonzero value so the attention
        # path is actually exercised/observable.
        "gamma": jnp.array([0.5], jnp.float32),
    }


if __name__ == "__main__":
    key = jax.random.PRNGKey(0)
    kx, kx2, kp = jax.random.split(key, 3)

    B, C = 2, 32                          # C divisible by 8 (C//8 projection dim)
    params = init_params(kp, C)

    # Round spatial size (no padding path): H = W = 16 -> N = 256.
    x = jax.random.normal(kx, (B, C, 16, 16), jnp.float32)
    out = jax.block_until_ready(pam_module(x, params))
    ref = pam_reference(x, params)
    assert out.shape == x.shape
    # bf16 MXU operands / bf16 exp + approx reciprocal -> loose tolerance.
    assert jnp.allclose(out, ref, atol=5e-2, rtol=5e-2), "mismatch (16x16)"

    # Non-round spatial size (exercises N padding + key masking): 15x15 -> 225.
    x2 = jax.random.normal(kx2, (B, C, 15, 15), jnp.float32)
    out2 = jax.block_until_ready(pam_module(x2, params))
    ref2 = pam_reference(x2, params)
    assert out2.shape == x2.shape
    assert jnp.allclose(out2, ref2, atol=5e-2, rtol=5e-2), "mismatch (15x15)"

    print("KERNEL_OK")
</pallas_src>

<mosaic_0001>
module attributes {stable_mosaic.version = 11 : i64} {
  func.func @kernel(%arg0: i32, %arg1: i32, %arg2: i32, %arg3: memref<1x256x128xf32, #tpu.memory_space<vmem>>, %arg4: memref<1x128x256xbf16, #tpu.memory_space<vmem>>, %arg5: memref<1x256x128xbf16, #tpu.memory_space<vmem>>, %arg6: memref<128x128xbf16, #tpu.memory_space<vmem>>, %arg7: memref<1x128xf32, #tpu.memory_space<vmem>>, %arg8: memref<1x1xf32, #tpu.memory_space<smem>>, %arg9: memref<1x256x128xf32, #tpu.memory_space<vmem>>, %arg10: memref<256x1xf32, #tpu.memory_space<vmem>>, %arg11: memref<256x1xf32, #tpu.memory_space<vmem>>, %arg12: memref<256x128xf32, #tpu.memory_space<vmem>>, %arg13: memref<256x128xbf16, #tpu.memory_space<vmem>>) attributes {dimension_semantics = [#tpu.dimension_semantics<parallel>, #tpu.dimension_semantics<parallel>, #tpu.dimension_semantics<arbitrary>], iteration_bounds = array<i64: 2, 1, 1>, scalar_prefetch = 0 : i64, scratch_operands = 4 : i64, tpu.core_type = #tpu.core_type<tc>, window_params = [{transform_indices = @transform_0, window_bounds = array<i64: 1, 256, 128>}, {transform_indices = @transform_1, window_bounds = array<i64: 1, 128, 256>}, {transform_indices = @transform_2, window_bounds = array<i64: 1, 256, 128>}, {pipeline_mode = #tpu.pipeline_mode<synchronous>, transform_indices = @transform_3, window_bounds = array<i64: 128, 128>}, {pipeline_mode = #tpu.pipeline_mode<synchronous>, transform_indices = @transform_4, window_bounds = array<i64: 1, 128>}, {transform_indices = @transform_5, window_bounds = array<i64: 1, 1>}, {transform_indices = @transform_6, window_bounds = array<i64: 1, 256, 128>}]} {
    %c0_i32 = arith.constant 0 : i32
    %0 = arith.cmpi eq, %arg2, %c0_i32 : i32
    %1 = arith.extui %0 : i1 to i32
    %c0_i32_0 = arith.constant 0 : i32
    %2 = arith.cmpi ne, %1, %c0_i32_0 : i32
    scf.if %2 {
      %cst_25 = arith.constant 0xFF800000 : f32
      %36 = vector.broadcast %cst_25 : f32 to vector<256x1xf32>
      %c0_26 = arith.constant 0 : index
      %c0_27 = arith.constant 0 : index
      %37 = vector.load %arg10[%c0_26, %c0_27] : memref<256x1xf32, #tpu.memory_space<vmem>>, vector<256x1xf32>
      tpu.vector_store %arg10[%c0_26, %c0_27], %36 {strides = array<i32>} : memref<256x1xf32, #tpu.memory_space<vmem>>, vector<256x1xf32>,
      %cst_28 = arith.constant 0.000000e+00 : f32
      %38 = vector.broadcast %cst_28 : f32 to vector<256x1xf32>
      %c0_29 = arith.constant 0 : index
      %c0_30 = arith.constant 0 : index
      %39 = vector.load %arg11[%c0_29, %c0_30] : memref<256x1xf32, #tpu.memory_space<vmem>>, vector<256x1xf32>
      tpu.vector_store %arg11[%c0_29, %c0_30], %38 {strides = array<i32>} : memref<256x1xf32, #tpu.memory_space<vmem>>, vector<256x1xf32>,
      %cst_31 = arith.constant 0.000000e+00 : f32
      %40 = vector.broadcast %cst_31 : f32 to vector<256x128xf32>
      %c0_32 = arith.constant 0 : index
      %c0_33 = arith.constant 0 : index
      %41 = vector.load %arg12[%c0_32, %c0_33] : memref<256x128xf32, #tpu.memory_space<vmem>>, vector<256x128xf32>
      tpu.vector_store %arg12[%c0_32, %c0_33], %40 {strides = array<i32>} : memref<256x128xf32, #tpu.memory_space<vmem>>, vector<256x128xf32>,
      %c0_34 = arith.constant 0 : index
      %c0_35 = arith.constant 0 : index
      %c0_36 = arith.constant 0 : index
      %42 = vector.load %arg3[%c0_34, %c0_35, %c0_36] : memref<1x256x128xf32, #tpu.memory_space<vmem>>, vector<1x256x128xf32>
      %43 = vector.shape_cast %42 : vector<1x256x128xf32> to vector<256x128xf32>
      %44 = arith.truncf %43 : vector<256x128xf32> to vector<256x128xbf16>
      %c0_37 = arith.constant 0 : index
      %c0_38 = arith.constant 0 : index
      %45 = vector.load %arg6[%c0_37, %c0_38] : memref<128x128xbf16, #tpu.memory_space<vmem>>, vector<128x128xbf16>
      %cst_39 = arith.constant dense<0.000000e+00> : vector<256x128xf32>
      %46 = tpu.matmul %44, %45, %cst_39 {dimension_numbers = #tpu.dot_dimension_numbers<[1], [0], [0], [1], [0, 0, 1, 1], [], []>} : vector<256x128xbf16>, vector<128x128xbf16>, vector<256x128xf32> -> vector<256x128xf32>
      %c0_40 = arith.constant 0 : index
      %c0_41 = arith.constant 0 : index
      %47 = vector.load %arg7[%c0_40, %c0_41] : memref<1x128xf32, #tpu.memory_space<vmem>>, vector<1x128xf32>
      %48 = vector.broadcast %47 : vector<1x128xf32> to vector<256x128xf32>
      %49 = arith.addf %46, %48 : vector<256x128xf32>
      %50 = arith.truncf %49 : vector<256x128xf32> to vector<256x128xbf16>
      %c0_42 = arith.constant 0 : index
      %c0_43 = arith.constant 0 : index
      %51 = vector.load %arg13[%c0_42, %c0_43] : memref<256x128xbf16, #tpu.memory_space<vmem>>, vector<256x128xbf16>
      tpu.vector_store %arg13[%c0_42, %c0_43], %50 {strides = array<i32>} : memref<256x128xbf16, #tpu.memory_space<vmem>>, vector<256x128xbf16>,
    } else {
    }
    %c0 = arith.constant 0 : index
    %c0_1 = arith.constant 0 : index
    %3 = vector.load %arg13[%c0, %c0_1] : memref<256x128xbf16, #tpu.memory_space<vmem>>, vector<256x128xbf16>
    %c0_2 = arith.constant 0 : index
    %c0_3 = arith.constant 0 : index
    %c0_4 = arith.constant 0 : index
    %4 = vector.load %arg4[%c0_2, %c0_3, %c0_4] : memref<1x128x256xbf16, #tpu.memory_space<vmem>>, vector<1x128x256xbf16>
    %5 = vector.shape_cast %4 : vector<1x128x256xbf16> to vector<128x256xbf16>
    %cst = arith.constant dense<0.000000e+00> : vector<256x256xf32>
    %6 = tpu.matmul %3, %5, %cst {dimension_numbers = #tpu.dot_dimension_numbers<[1], [0], [0], [1], [0, 0, 1, 1], [], []>} : vector<256x128xbf16>, vector<128x256xbf16>, vector<256x256xf32> -> vector<256x256xf32>
    %c0_5 = arith.constant 0 : index
    %c0_6 = arith.constant 0 : index
    %7 = vector.load %arg10[%c0_5, %c0_6] : memref<256x1xf32, #tpu.memory_space<vmem>>, vector<256x1xf32>
    %cst_7 = arith.constant dense<0xFF800000> : vector<256xf32>
    %8 = vector.multi_reduction <maximumf>, %6, %cst_7 [1] : vector<256x256xf32> to vector<256xf32>
    %9 = vector.shape_cast %8 : vector<256xf32> to vector<256x1xf32>
    %10 = arith.maximumf %7, %9 : vector<256x1xf32>
    %11 = arith.subf %7, %10 : vector<256x1xf32>
    %12 = math.exp %11 : vector<256x1xf32>
    %13 = vector.broadcast %10 : vector<256x1xf32> to vector<256x256xf32>
    %14 = arith.subf %6, %13 : vector<256x256xf32>
    %15 = arith.truncf %14 : vector<256x256xf32> to vector<256x256xbf16>
    %16 = math.exp %15 : vector<256x256xbf16>
    %17 = arith.extf %16 : vector<256x256xbf16> to vector<256x256xf32>
    %cst_8 = arith.constant dense<0.000000e+00> : vector<256xf32>
    %18 = vector.multi_reduction <add>, %17, %cst_8 [1] : vector<256x256xf32> to vector<256xf32>
    %19 = vector.shape_cast %18 : vector<256xf32> to vector<256x1xf32>
    %c0_9 = arith.constant 0 : index
    %c0_10 = arith.constant 0 : index
    %20 = vector.load %arg11[%c0_9, %c0_10] : memref<256x1xf32, #tpu.memory_space<vmem>>, vector<256x1xf32>
    %21 = arith.mulf %12, %20 : vector<256x1xf32>
    %22 = arith.addf %21, %19 : vector<256x1xf32>
    %c0_11 = arith.constant 0 : index
    %c0_12 = arith.constant 0 : index
    %23 = vector.load %arg11[%c0_11, %c0_12] : memref<256x1xf32, #tpu.memory_space<vmem>>, vector<256x1xf32>
    tpu.vector_store %arg11[%c0_11, %c0_12], %22 {strides = array<i32>} : memref<256x1xf32, #tpu.memory_space<vmem>>, vector<256x1xf32>,
    %c0_13 = arith.constant 0 : index
    %c0_14 = arith.constant 0 : index
    %24 = vector.load %arg12[%c0_13, %c0_14] : memref<256x128xf32, #tpu.memory_space<vmem>>, vector<256x128xf32>
    %25 = vector.broadcast %12 : vector<256x1xf32> to vector<256x128xf32>
    %26 = arith.mulf %25, %24 : vector<256x128xf32>
    %c0_15 = arith.constant 0 : index
    %c0_16 = arith.constant 0 : index
    %c0_17 = arith.constant 0 : index
    %27 = vector.load %arg5[%c0_15, %c0_16, %c0_17] : memref<1x256x128xbf16, #tpu.memory_space<vmem>>, vector<1x256x128xbf16>
    %28 = vector.shape_cast %27 : vector<1x256x128xbf16> to vector<256x128xbf16>
    %cst_18 = arith.constant dense<0.000000e+00> : vector<256x128xf32>
    %29 = tpu.matmul %16, %28, %cst_18 {dimension_numbers = #tpu.dot_dimension_numbers<[1], [0], [0], [1], [0, 0, 1, 1], [], []>} : vector<256x256xbf16>, vector<256x128xbf16>, vector<256x128xf32> -> vector<256x128xf32>
    %30 = arith.addf %26, %29 : vector<256x128xf32>
    %c0_19 = arith.constant 0 : index
    %c0_20 = arith.constant 0 : index
    %31 = vector.load %arg12[%c0_19, %c0_20] : memref<256x128xf32, #tpu.memory_space<vmem>>, vector<256x128xf32>
    tpu.vector_store %arg12[%c0_19, %c0_20], %30 {strides = array<i32>} : memref<256x128xf32, #tpu.memory_space<vmem>>, vector<256x128xf32>,
    %c0_21 = arith.constant 0 : index
    %c0_22 = arith.constant 0 : index
    %32 = vector.load %arg10[%c0_21, %c0_22] : memref<256x1xf32, #tpu.memory_space<vmem>>, vector<256x1xf32>
    tpu.vector_store %arg10[%c0_21, %c0_22], %10 {strides = array<i32>} : memref<256x1xf32, #tpu.memory_space<vmem>>, vector<256x1xf32>,
    %c0_i32_23 = arith.constant 0 : i32
    %33 = arith.cmpi eq, %arg2, %c0_i32_23 : i32
    %34 = arith.extui %33 : i1 to i32
    %c0_i32_24 = arith.constant 0 : i32
    %35 = arith.cmpi ne, %34, %c0_i32_24 : i32
    scf.if %35 {
      %c0_25 = arith.constant 0 : index
      %c0_26 = arith.constant 0 : index
      %36 = memref.load %arg8[%c0_25, %c0_26] : memref<1x1xf32, #tpu.memory_space<smem>>
      %c0_27 = arith.constant 0 : index
      %c0_28 = arith.constant 0 : index
      %37 = vector.load %arg11[%c0_27, %c0_28] : memref<256x1xf32, #tpu.memory_space<vmem>>, vector<256x1xf32>
      %38 = tpu.reciprocal %37 {approx = true} : vector<256x1xf32> -> vector<256x1xf32>
      %39 = vector.broadcast %36 : f32 to vector<256x1xf32>
      %40 = arith.mulf %39, %38 : vector<256x1xf32>
      %c0_29 = arith.constant 0 : index
      %c0_30 = arith.constant 0 : index
      %41 = vector.load %arg12[%c0_29, %c0_30] : memref<256x128xf32, #tpu.memory_space<vmem>>, vector<256x128xf32>
      %42 = vector.broadcast %40 : vector<256x1xf32> to vector<256x128xf32>
      %43 = arith.mulf %41, %42 : vector<256x128xf32>
      %c0_31 = arith.constant 0 : index
      %c0_32 = arith.constant 0 : index
      %c0_33 = arith.constant 0 : index
      %44 = vector.load %arg3[%c0_31, %c0_32, %c0_33] : memref<1x256x128xf32, #tpu.memory_space<vmem>>, vector<1x256x128xf32>
      %45 = vector.shape_cast %44 : vector<1x256x128xf32> to vector<256x128xf32>
      %46 = arith.addf %43, %45 : vector<256x128xf32>
      %c0_34 = arith.constant 0 : index
      %c0_35 = arith.constant 0 : index
      %c0_36 = arith.constant 0 : index
      %47 = vector.load %arg9[%c0_34, %c0_35, %c0_36] : memref<1x256x128xf32, #tpu.memory_space<vmem>>, vector<1x256x128xf32>
      %48 = vector.shape_cast %47 : vector<1x256x128xf32> to vector<256x128xf32>
      %49 = vector.shape_cast %46 : vector<256x128xf32> to vector<1x256x128xf32>
      tpu.vector_store %arg9[%c0_34, %c0_35, %c0_36], %49 {strides = array<i32>} : memref<1x256x128xf32, #tpu.memory_space<vmem>>, vector<1x256x128xf32>,
    } else {
    }
    return
  }
  func.func @transform_0(%arg0: i32, %arg1: i32, %arg2: i32) -> (i32, i32, i32) {
    %c0_i32 = arith.constant 0 : i32
    %c0_i32_0 = arith.constant 0 : i32
    return %arg0, %arg1, %c0_i32 : i32, i32, i32
  }
  func.func @transform_1(%arg0: i32, %arg1: i32, %arg2: i32) -> (i32, i32, i32) {
    %c0_i32 = arith.constant 0 : i32
    %c0_i32_0 = arith.constant 0 : i32
    return %arg0, %c0_i32, %arg2 : i32, i32, i32
  }
  func.func @transform_2(%arg0: i32, %arg1: i32, %arg2: i32) -> (i32, i32, i32) {
    %c0_i32 = arith.constant 0 : i32
    %c0_i32_0 = arith.constant 0 : i32
    return %arg0, %arg2, %c0_i32 : i32, i32, i32
  }
  func.func @transform_3(%arg0: i32, %arg1: i32, %arg2: i32) -> (i32, i32) {
    %c0_i32 = arith.constant 0 : i32
    %c0_i32_0 = arith.constant 0 : i32
    %c0_i32_1 = arith.constant 0 : i32
    return %c0_i32, %c0_i32_0 : i32, i32
  }
  func.func @transform_4(%arg0: i32, %arg1: i32, %arg2: i32) -> (i32, i32) {
    %c0_i32 = arith.constant 0 : i32
    %c0_i32_0 = arith.constant 0 : i32
    %c0_i32_1 = arith.constant 0 : i32
    return %c0_i32, %c0_i32_0 : i32, i32
  }
  func.func @transform_5(%arg0: i32, %arg1: i32, %arg2: i32) -> (i32, i32) {
    %c0_i32 = arith.constant 0 : i32
    %c0_i32_0 = arith.constant 0 : i32
    %c0_i32_1 = arith.constant 0 : i32
    return %c0_i32, %c0_i32_0 : i32, i32
  }
  func.func @transform_6(%arg0: i32, %arg1: i32, %arg2: i32) -> (i32, i32, i32) {
    %c0_i32 = arith.constant 0 : i32
    %c0_i32_0 = arith.constant 0 : i32
    return %arg0, %arg1, %c0_i32 : i32, i32, i32
  }
}

</mosaic_0001>

<bundles_post_ra>
// kernel: tpu_custom_call.1
= control target key start
LH: loop header
LB: loop body
LE: loop exit
PB: predicated region body
PF: predicated region fallthrough
CT: control target
= control target key end

     0   :  { %s5787_s0 = inlined_call_operand.hbm [shape: f32[2,256,128], index: 0, kind: input, shape index: {}]   ;;  %s5788_s1 = inlined_call_operand.hbm [shape: bf16[2,128,256], index: 1, kind: input, shape index: {}]   ;;  %s5789_s2 = inlined_call_operand.hbm [shape: bf16[2,256,128], index: 2, kind: input, shape index: {}]   ;;  %s5790_s3 = inlined_call_operand.hbm [shape: bf16[128,128], index: 3, kind: input, shape index: {}]   ;;  %s5791_s4 = inlined_call_operand.vmem [shape: f32[1,128], index: 4, kind: input, shape index: {}]   ;;  %s5792_s5 = inlined_call_operand.<no memory space> [shape: f32[1,1], index: 5, kind: input, shape index: {}]   ;;  %s5793_s6 = inlined_call_operand.hbm [shape: f32[2,256,128], index: 6, kind: output, shape index: {}]  }
   0x1   :  { %5885 = sst [smem:[#allocation93_spill]] %s5788_s1 }
   0x2   :  { %5886 = sst [smem:[#allocation94_spill]] %s5793_s6 }
   0x3   :  { %11 = sst [smem:[#allocation6]] %s5792_s5 }
   0x4   :  { %12 = vsyncpa [#allocation8], 0 }
   0x5   :  { %14 = vsyncpa [#allocation8 + $0x1], 0 }
   0x6   :  { %15 = vsyncpa [#allocation11], 0 }
   0x7   :  { %17 = vsyncpa [#allocation11 + $0x1], 0 }
   0x8   :  { %18 = vsyncpa [#allocation14], 0 }
   0x9   :  { %19 = vsyncpa [#allocation9], 0 }
   0xa   :  { %21 = vsyncpa [#allocation9 + $0x1], 0  ;;  %s4077_s23 = smov 0   ;;  %s4079_s24 = smov 0  }
   0xb   :  { %s4081_s25 = smov 0   ;;  %s4083_s26 = smov 0  }
   0xc   :  { %s4085_s27 = smov 0   ;;  %s4087_s28 = smov 0  }
   0xd LB: > { %5887 = sst [smem:[#allocation20_spill]] %s4003_s23  ;;  %s46_s5 = sadd.s32 1, %s4019_s27  ;;  %s4023_s28 = sphi %s4087_s28, %s27_s28   ;;  %s4019_s27 = sphi %s4085_s27, %s6106_s27   ;;  %s4015_s26 = sphi %s4083_s26, %s6105_s26   ;;  %s4011_s25 = sphi %s4081_s25, %s6104_s25   ;;  %s4007_s24 = sphi %s4079_s24, %s6108_s24   ;;  %s4003_s23 = sphi %s4077_s23, %s6107_s23  }
   0xe   : > { %5888 = sst [smem:[#allocation21_spill]] %s4011_s25  ;;  %s55_s29 = sadd.s32 1, %s4011_s25 }
   0xf   : > { %5889 = sst [smem:[#allocation22_spill]] %s4019_s27  ;;  %p48_p0 = scmp.ge.s32.totalorder %s46_s5, 2 }
  0x10   : > { %5890 = sst [smem:[#allocation23_spill]] %s4023_s28  ;;  %p5794_p1 = scmp.ne.s32.totalorder %s4011_s25, %s4007_s24 }
  0x11   : > { %p63_p2 = scmp.eq.s32.totalorder %s4023_s28, 0  ;;  %s6110_s5 = smov (%p48_p0, %s46_s5), 0 }
  0x12   : > { %5891 = sst [smem:[#allocation24_spill]] %s6110_s5  ;;  %p3512_p5 = scmp.lt.s32.totalorder %s4023_s28, 2 }
  0x13   : > { %p64_p4 = por %p63_p2, %p5794_p1  ;;  %s50_s30 = ssub.s32 %s4019_s27, %s6110_s5 }
  0x14   : > { %s4122_s7 = sand.u32 1, %s4011_s25   ;;  %p53_p6 = scmp.eq.s32.totalorder %s50_s30, 0 }
  0x15   : > { %p4124_p7 = pnand %p3512_p5, %p64_p4  ;;  %s281_s10 = sand.u32 1, %s4023_s28  }
  0x16   : > { %s4129_s9 = scalar_select %p53_p6, %s4011_s25, %s55_s29  }
  0x17   : > { %s5892_s8 = scalar_select %p4124_p7, 1, 0 }
  0x18   : > { %5893 = sst [smem:[#allocation25_spill]] %s4129_s9  ;;  %s3219_s11 = sshll.u32 %s4122_s7, 7 }
  0x19   : > { %s3278_s12 = sshll.u32 %s4019_s27, 11  ;;  %s5894_s1 = sld [smem:[#allocation93_spill]] }
  0x1a   : > { %s285_s16 = scalar_lea.vmem [#allocation10], %s3219_s11  ;;  %s4145_s18 = scalar_lea.sflag [#allocation11], %s281_s10 }
  0x1b   : > { %s294_s17 = sshll.u32 %s285_s16, 4  ;;  %p4151_p9 = pneg %p4124_p7  ;;  %s4143_s17 = int_to_ptr.vmem [resolvable:$true] %s294_s17 }
  0x1d   : > { %s5895_s20 = scalar_select %p4151_p9, 1, 0 }
  0x1f   : > { %s4139_s15 = scalar_lea.hbm %s5894_s1, %s3278_s12  ;;  %s3820_s29 = scalar_lea.hbm %s5894_s1, 4096 }
  0x20   : > { %s3815_s19 = scalar_lea.hbm %s4139_s15, 2048  ;;  %p3821_p12 = scmp.lt.u32.totalorder %s4139_s15, %s5894_s1 }
  0x21   : > { %p3816_p8 = scmp.ne.s32.totalorder %s4139_s15, %s3815_s19  ;;  %p3822_p13 = scmp.lt.u32.totalorder %s3820_s29, %s3815_s19 }
  0x22   : > { %p3824_p2 = scmp.lt.u32.totalorder %s3815_s19, %s4139_s15 }
  0x23   : > { %p3818_p10 = pnand %p4151_p9, %p3816_p8  ;;  %p3823_p0 = por %p3822_p13, %p3821_p12 }
  0x25   : > { %p3819_p11 = pneg %p3818_p10  ;;  %p3825_p4 = por %p3824_p2, %p3823_p0 }
  0x27   : > { %p3826_p5 = pnand %p3825_p4, %p3819_p11 }
  0x29   : > { %3829 = shalt.err (!%p3826_p5)
}
  0x2a   : > { %s3830_s10 = scalar_lea.vmem %s4143_s17, 2048  ;;  %s4025_s14 = smov [#allocation10]  }
  0x2b   : > { %p3831_p6 = scmp.ne.s32.totalorder %s4143_s17, %s3830_s10  ;;  %s3835_s16 = sshll.u32 %s4025_s14, 4  ;;  %s3836_s16 = int_to_ptr.vmem [resolvable:$false] %s3835_s16 }
  0x2c   : > { %s3837_s21 = scalar_lea.vmem %s3836_s16, 4096  ;;  %p3838_p3 = scmp.lt.s32.totalorder %s4143_s17, %s3836_s16 }
  0x2d   : > { %p3833_p8 = pnand %p3831_p6, %p4151_p9  ;;  %p3839_p1 = scmp.lt.s32.totalorder %s3837_s21, %s3830_s10 }
  0x2f   : > { %p3834_p10 = pneg %p3833_p8  ;;  %p3840_p12 = por %p3839_p1, %p3838_p3 }
  0x31   : > { %p3841_p13 = pnand %p3840_p12, %p3834_p10 }
  0x33   : > { %3844 = shalt.err (!%p3841_p13)
}
  0x34   : > { %s5795_s19 = smov 128   ;;  %s5796_s22 = smov 8  }
  0x35   : > { %3503 = dma.hbm_to_vmem [thread:$0]  (!%p4124_p7), %s4139_s15, 2048, %s4143_s17, %s4145_s18, %s5795_s19, %s5795_s19, %s5796_s22  }
  0x36   : > { %s4183_s13 = scalar_lea.hbm %s5789_s2, %s3278_s12  ;;  %s308_s10 = scalar_lea.vmem [#allocation12], %s3219_s11 }
  0x37   : > { %s317_s14 = sshll.u32 %s308_s10, 4  ;;  %s4190_s16 = sadd.s32 4294967295, %s4023_s28   ;;  %s4187_s14 = int_to_ptr.vmem [resolvable:$true] %s317_s14 }
  0x38   : > { %s3212_s21 = sadd.s32 4294967294, %s4023_s28   ;;  %p68_p1 = scmp.ne.s32.totalorder %s4007_s24, %s4003_s23 }
  0x39   : > { %p5805_p3 = scmp.eq.s32.totalorder %s4190_s16, 0  ;;  %p213_p11 = scmp.eq.s32.totalorder %s4190_s16, 1 }
  0x3a   : > { %p219_p0 = scmp.eq.s32.totalorder %s3212_s21, 1  ;;  %p3213_p2 = scmp.ge.s32.totalorder %s4023_s28, 1 }
  0x3b   : > { %p4200_p4 = por %p5805_p3, %p68_p1  ;;  %p5897_p5 = scmp.ne.s32.totalorder %s4011_s25, %s4007_s24 }
  0x3c   : > { %p4211_p8 = por %p219_p0, %p68_p1  ;;  %p226_p10 = scmp.lt.s32.totalorder %s4023_s28, 3 }
  0x3d   : > { %s5896_s11 = scalar_select %p4200_p4, 1, 0 }
  0x3e   : > { %p4207_p6 = por %p213_p11, %p5897_p5  ;;  %p4216_p12 = pnand %p3213_p2, %p226_p10 }
  0x3f   : > { %s5899_s15 = scalar_select %p4211_p8, 1, 0 }
  0x40   : > { %s5898_s12 = scalar_select %p4207_p6, 1, 0 }
  0x41   : > { %5900 = sst [smem:[#allocation26_spill]] %s5899_s15  ;;  %s4028_s29 = smov [#allocation13]  }
  0x42   : > { %s5901_s17 = scalar_select %p4216_p12, 1, 0 }
  0x43   : > { %s238_s30 = sshll.u32 %s4028_s29, 4  ;;  %p3493_p13 = pneg %p4216_p12  ;;  %s4220_s30 = int_to_ptr.vmem [resolvable:$true] %s238_s30 }
  0x44   : > { %s3216_s10 = sshll.u32 %s4122_s7, 8  ;;  %s3277_s19 = sshll.u32 %s4019_s27, 12 }
  0x45   : > { %p4227_p11 = pnand %p3493_p13, %p5805_p3  ;;  %s262_s22 = scalar_lea.vmem [#allocation7], %s3216_s10 }
  0x46   : > { %s271_s1 = sshll.u32 %s262_s22, 4  ;;  %s4235_s25 = scalar_lea.hbm %s5787_s0, %s3277_s19  ;;  %s4261_s1 = int_to_ptr.vmem [resolvable:$true] %s271_s1 }
  0x47   : > { %s3845_s15 = scalar_lea.hbm %s5790_s3, 1024  ;;  %p3847_p0 = pneg %p4227_p11 }
  0x48   : > { %p3846_p1 = scmp.ne.s32.totalorder %s5790_s3, %s3845_s15  ;;  %p3852_p10 = scmp.lt.u32.totalorder %s3845_s15, %s5790_s3 }
  0x4a   : > { %p3848_p2 = pnand %p3847_p0, %p3846_p1 }
  0x4c   : > { %p3849_p5 = pneg %p3848_p2 }
  0x4e   : > { %p3854_p13 = pnand %p3852_p10, %p3849_p5 }
  0x50   : > { %3857 = shalt.err (!%p3854_p13)
}
  0x51   : > { %s3858_s5 = scalar_lea.vmem %s4220_s30, 1024  ;;  %p3866_p4 = scmp.lt.s32.totalorder %s4220_s30, %s4220_s30 }
  0x52   : > { %p3859_p3 = scmp.ne.s32.totalorder %s4220_s30, %s3858_s5  ;;  %p3867_p12 = scmp.lt.s32.totalorder %s3858_s5, %s3858_s5 }
  0x54   : > { %p3861_p8 = pnand %p3859_p3, %p3847_p0  ;;  %p3868_p7 = por %p3867_p12, %p3866_p4 }
  0x56   : > { %p3862_p6 = pneg %p3861_p8 }
  0x58   : > { %p3869_p9 = pnand %p3868_p7, %p3862_p6 }
  0x5a   : > { %3872 = shalt.err (!%p3869_p9)
}
  0x5b   : > { %s4029_s6 = smov 64   ;;  %s4030_s23 = smov 4  }
  0x5c   : > { %3496 = dma.hbm_to_vmem [thread:$0]  (!%p4227_p11), %s5790_s3, 1024, %s4220_s30, [#allocation14], %s4029_s6, %s4029_s6, %s4030_s23  }
  0x5d   : > { %s259_s9 = scalar_lea.sflag [#allocation8], %s4122_s7  ;;  %s3873_s19 = scalar_lea.hbm %s4235_s25, 4096 }
  0x5e   : > { %p3874_p7 = scmp.ne.s32.totalorder %s4235_s25, %s3873_s19  ;;  %p5903_p9 = scmp.ne.s32.totalorder %s5895_s20, 0 }
  0x5f   : > { %s3878_s29 = scalar_lea.hbm %s5787_s0, 8192  ;;  %p3879_p6 = scmp.lt.u32.totalorder %s4235_s25, %s5787_s0 }
  0x60   : > { %p3876_p3 = pnand %p3874_p7, %p5903_p9  ;;  %p3880_p8 = scmp.lt.u32.totalorder %s3878_s29, %s3873_s19 }
  0x61   : > { %p3882_p1 = scmp.lt.u32.totalorder %s3873_s19, %s4235_s25 }
  0x62   : > { %p3877_p4 = pneg %p3876_p3  ;;  %p3881_p12 = por %p3880_p8, %p3879_p6 }
  0x64   : > { %p3883_p11 = por %p3882_p1, %p3881_p12 }
  0x66   : > { %p3884_p0 = pnand %p3883_p11, %p3877_p4 }
  0x68   : > { %3887 = shalt.err (!%p3884_p0)
}
  0x69   : > { %s3888_s30 = scalar_lea.vmem %s4261_s1, 4096  ;;  %s4031_s5 = smov [#allocation7]  }
  0x6a   : > { %p3889_p2 = scmp.ne.s32.totalorder %s4261_s1, %s3888_s30  ;;  %s3893_s27 = sshll.u32 %s4031_s5, 4  ;;  %s3894_s27 = int_to_ptr.vmem [resolvable:$false] %s3893_s27 }
  0x6b   : > { %s3895_s28 = scalar_lea.vmem %s3894_s27, 8192  ;;  %p3896_p13 = scmp.lt.s32.totalorder %s4261_s1, %s3894_s27 }
  0x6c   : > { %p3891_p5 = pnand %p3889_p2, %p5903_p9  ;;  %p3897_p7 = scmp.lt.s32.totalorder %s3895_s28, %s3888_s30 }
  0x6e   : > { %p3892_p10 = pneg %p3891_p5  ;;  %p3898_p3 = por %p3897_p7, %p3896_p13 }
  0x70   : > { %p3899_p6 = pnand %p3898_p3, %p3892_p10 }
  0x72   : > { %3902 = shalt.err (!%p3899_p6)
}
  0x73   : > { %p5904_p4 = scmp.ne.s32.totalorder %s5892_s8, 0  ;;  %s5905_s19 = smov 8  }
  0x74   : > { %s5906_s22 = smov 128   ;;  %s3903_s15 = scalar_lea.hbm %s4183_s13, 2048 }
  0x75   : > { %3500 = dma.hbm_to_vmem [thread:$0]  (!%p5904_p4), %s4235_s25, 4096, %s4261_s1, %s259_s9, %s5906_s22, %s5906_s22, %s5905_s19  }
  0x76   : > { %p3904_p8 = scmp.ne.s32.totalorder %s4183_s13, %s3903_s15  ;;  %s3908_s10 = scalar_lea.hbm %s5789_s2, 4096 }
  0x77   : > { %p3909_p11 = scmp.lt.u32.totalorder %s4183_s13, %s5789_s2  ;;  %p3910_p0 = scmp.lt.u32.totalorder %s3908_s10, %s3903_s15 }
  0x78   : > { %p3906_p12 = pnand %p3904_p8, %p5903_p9  ;;  %p3912_p5 = scmp.lt.u32.totalorder %s3903_s15, %s4183_s13 }
  0x79   : > { %p3911_p2 = por %p3910_p0, %p3909_p11 }
  0x7a   : > { %p3907_p1 = pneg %p3906_p12 }
  0x7b   : > { %p3913_p10 = por %p3912_p5, %p3911_p2 }
  0x7d   : > { %p3914_p13 = pnand %p3913_p10, %p3907_p1 }
  0x7f   : > { %3917 = shalt.err (!%p3914_p13)
}
  0x80   : > { %s3918_s1 = scalar_lea.vmem %s4187_s14, 2048  ;;  %s4032_s25 = smov [#allocation12]  }
  0x81   : > { %p3919_p7 = scmp.ne.s32.totalorder %s4187_s14, %s3918_s1  ;;  %s3923_s7 = sshll.u32 %s4032_s25, 4  ;;  %s3924_s7 = int_to_ptr.vmem [resolvable:$false] %s3923_s7 }
  0x82   : > { %s3925_s9 = scalar_lea.vmem %s3924_s7, 4096  ;;  %p3926_p8 = scmp.lt.s32.totalorder %s4187_s14, %s3924_s7 }
  0x83   : > { %p3921_p3 = pnand %p3919_p7, %p5903_p9  ;;  %p3927_p12 = scmp.lt.s32.totalorder %s3925_s9, %s3918_s1 }
  0x85   : > { %p3922_p6 = pneg %p3921_p3  ;;  %p3928_p11 = por %p3927_p12, %p3926_p8 }
  0x87   : > { %p3929_p0 = pnand %p3928_p11, %p3922_p6 }
  0x89   : > { %3932 = shalt.err (!%p3929_p0)
}
  0x8a   : > { %3506 = dma.hbm_to_vmem [thread:$0]  (!%p5904_p4), %s4183_s13, 2048, %s4187_s14, %s4145_s18, %s4029_s6, %s4029_s6, %s4030_s23  }
  0x8b   : > { %p5907_p9 = scmp.ne.s32.totalorder %s5901_s17, 0 }
  0x8d   : > { %329 = sbr.rel (%p5907_p9) target bundleno = 1361 (0x551), region = 44 }
  0x94   : > { %s4318_s20 = sand.u32 1, %s4007_s24   ;;  %p5908_p1 = scmp.ne.s32.totalorder %s5896_s11, 0 }
  0x95   : > { %s3226_s27 = sshll.u32 %s4318_s20, 8  ;;  %s332_s28 = scalar_lea.sflag [#allocation8], %s4318_s20 }
  0x96   : > { %s4324_s8 = scalar_lea.vmem [#allocation7], %s3226_s27 }
  0x97   : > { %3986 = dma.done.wait (%p5908_p1), %s332_s28, 4096  }
  0x98   : > { %3988 = vsyncadd (%p5908_p1), %s332_s28, 4294963200  ;;  %s340_s18 = sand.u32 1, %s4190_s16   ;;  %s3227_s13 = sshll.u32 %s4318_s20, 7 }
  0x99   : > { %s341_s14 = scalar_lea.sflag [#allocation11], %s340_s18  ;;  %s4332_s17 = scalar_lea.vmem [#allocation10], %s3227_s13 }
  0x9a   : > { %3990 = dma.done.wait (%p5908_p1), %s341_s14, 4096  }
  0x9b   : > { %3992 = vsyncadd (%p5908_p1), %s341_s14, 4294963200  ;;  %s4338_s6 = scalar_lea.vmem [#allocation12], %s3227_s13  ;;  %p5909_p4 = scmp.eq.s32.totalorder %s4190_s16, 0 }
  0x9d   : > { %3994 = dma.done.wait (%p5909_p4), [#allocation14], 1024   ;;  %p5910_p2 = pmov %p5909_p4 }
  0x9e   : > { %v3575_v0 = vld [vmem:[#allocation13] sm:$0xff]   ;;  %v3576_v1 = vld [vmem:[#allocation13 + $0x8] sm:$0xff]   ;;  %v3577_v2 = vld [vmem:[#allocation13 + $0x10] sm:$0xff]   ;;  %vm405_vm0 = vcmask 7168   ;;  %s5446_s23 = sld [smem:[#allocation6]]  ;;  %s5635_s19 = scalar_lea.vmem [#allocation15], %s3226_s27 }
  0x9f   : > { %3996 = vsyncadd (%p5910_p2), [#allocation14], 4294966272  ;;  %3417 = vmatprep.subr.bf16.mxu0 %v3575_v0  ;;  %3465 = vmatprep.subr.bf16.mxu1 %v3575_v0  ;;  %v3578_v3 = vld [vmem:[#allocation13 + $0x18] sm:$0xff]   ;;  %v502_v4 = vld [vmem:[%s4324_s8] sm:$0xff]  ;;  %s3280_s22 = sshll.u32 %s4015_s26, 12  ;;  %s3062_s15 = sshll.u32 %s5635_s19, 4  ;;  %s5736_s15 = int_to_ptr.vmem [resolvable:$true] %s3062_s15 }
  0xa0   : > { %3418 = vmatpush3.bf16.msra.mxu0 %v3575_v0  ;;  %3473 = vmatpush3.bf16.msra.mxu1 %v3575_v0  ;;  %v503_v5 = vld [vmem:[%s4324_s8 + $0x8] sm:$0xff]  ;;  %v3579_v7 = vld [vmem:[#allocation13 + $0x20] sm:$0xff]   ;;  %v3581_v12 = vld [vmem:[#allocation13 + $0x30] sm:$0xff]   ;;  %s6096_s10 = sld [smem:[#allocation94_spill]]  ;;  %s3047_s26 = scalar_lea.sflag [#allocation9], %s4318_s20 }
  0xa1   : > { %3419 = vmatprep.subr.bf16.mxu0 %v3576_v1  ;;  %3466 = vmatprep.subr.bf16.mxu1 %v3576_v1  ;;  %v534_v6 = vpack.c.bf16 %v503_v5, %v502_v4  ;;  %v518_v8 = vld [vmem:[%s4324_s8 + $0x80] sm:$0xff]  ;;  %v519_v9 = vld [vmem:[%s4324_s8 + $0x88] sm:$0xff]  ;;  %v3582_v13 = vld [vmem:[#allocation13 + $0x38] sm:$0xff]   ;;  %s3933_s5 = scalar_lea.vmem %s5736_s15, 4096  ;;  %p6097_p10 = scmp.ne.s32.totalorder %s5898_s12, 0 }
  0xa2   : > { %v542_v10 = vpack.c.bf16 %v519_v9, %v518_v8  ;;  %v3580_v11 = vld [vmem:[#allocation13 + $0x28] sm:$0xff]   ;;  %v504_v14 = vld [vmem:[%s4324_s8 + $0x10] sm:$0xff]  ;;  %v505_v15 = vld [vmem:[%s4324_s8 + $0x18] sm:$0xff]  ;;  %v4033_v8 = vmov 0   ;;  %p3934_p5 = scmp.ne.s32.totalorder %s5736_s15, %s3933_s5  ;;  %s4036_s1 = smov [#allocation15]  }
  0xa3   : > { %3433 = vmatprep.mubr.bf16.mxu0 %v534_v6  ;;  %v506_v16 = vld [vmem:[%s4324_s8 + $0x20] sm:$0xff]  ;;  %v507_v17 = vld [vmem:[%s4324_s8 + $0x28] sm:$0xff]  ;;  %v520_v18 = vld [vmem:[%s4324_s8 + $0x90] sm:$0xff]  ;;  %v535_v23 = vpack.c.bf16 %v505_v15, %v504_v14  ;;  %3573 = vset.pattern.permute.xlu0 %v4033_v8  ;;  %s3937_s25 = sshll.u32 %s4036_s1, 4  ;;  %s3938_s25 = int_to_ptr.vmem [resolvable:$false] %s3937_s25 }
  0xa4   : > { %3420 = vmatpush3.bf16.msra.mxu0 %v3576_v1  ;;  %3474 = vmatpush3.bf16.msra.mxu1 %v3576_v1  ;;  %v521_v19 = vld [vmem:[%s4324_s8 + $0x98] sm:$0xff]  ;;  %v522_v20 = vld [vmem:[%s4324_s8 + $0xa0] sm:$0xff]  ;;  %v523_v21 = vld [vmem:[%s4324_s8 + $0xa8] sm:$0xff]  ;;  %v536_v25 = vpack.c.bf16 %v507_v17, %v506_v16  ;;  %p3935_p13 = pnand %p3934_p5, %p6097_p10  ;;  %s3939_s7 = scalar_lea.vmem %s3938_s25, 8192 }
  0xa5   : > { %3421 = vmatprep.subr.bf16.mxu0 %v3577_v2  ;;  %3467 = vmatprep.subr.bf16.mxu1 %v3577_v2  ;;  %v3585_v22 = vld [vmem:[%s4332_s17 + $0x4] ss:$8 sps:$4 sm:$0xff]   ;;  %v3583_v24 = vld [vmem:[%s4332_s17] ss:$8 sps:$4 sm:$0xff]   ;;  %v543_v26 = vpack.c.bf16 %v521_v19, %v520_v18  ;;  %v3588_v27 = vld [vmem:[%s4332_s17 + $0x14] ss:$8 sps:$4 sm:$0xff]   ;;  %v544_v28 = vpack.c.bf16 %v523_v21, %v522_v20  ;;  %p3940_p3 = scmp.lt.s32.totalorder %s5736_s15, %s3938_s25  ;;  %p3941_p6 = scmp.lt.s32.totalorder %s3939_s7, %s3933_s5 }
  0xa6   : > { %3449 = vmatprep.mubr.bf16.mxu1 %v542_v10  ;;  %v508_v29 = vld [vmem:[%s4324_s8 + $0x30] sm:$0xff]  ;;  %v509_v30 = vld [vmem:[%s4324_s8 + $0x38] sm:$0xff]  ;;  %v510_v31 = vld [vmem:[%s4324_s8 + $0x40] sm:$0xff]  ;;  %3574 = vset.pattern.permute.xlu1 %v4033_v8  ;;  %s5734_s30 = scalar_lea.hbm %s6096_s10, %s3280_s22  ;;  %p3936_p7 = pneg %p3935_p13 }
  0xa7   : > { %v511_v32 = vld [vmem:[%s4324_s8 + $0x48] sm:$0xff]  ;;  %v524_v33 = vld [vmem:[%s4324_s8 + $0xb0] sm:$0xff]  ;;  %v525_v34 = vld [vmem:[%s4324_s8 + $0xb8] sm:$0xff]  ;;  %v537_v39 = vpack.c.bf16 %v509_v30, %v508_v29  ;;  %p3942_p8 = por %p3941_p6, %p3940_p3 }
  0xa8   : > { %3422 = vmatpush3.bf16.msra.mxu0 %v3577_v2  ;;  %3475 = vmatpush3.bf16.msra.mxu1 %v3577_v2  ;;  %v3586_v35 = vld [vmem:[%s4332_s17 + $0x10] ss:$8 sps:$4 sm:$0xff]   ;;  %v526_v36 = vld [vmem:[%s4324_s8 + $0xc0] sm:$0xff]  ;;  %v527_v37 = vld [vmem:[%s4324_s8 + $0xc8] sm:$0xff]  ;;  %v538_v40 = vpack.c.bf16 %v511_v32, %v510_v31  ;;  %v545_v41 = vpack.c.bf16 %v525_v34, %v524_v33 }
  0xa9   : > { %3423 = vmatprep.subr.bf16.mxu0 %v3578_v3  ;;  %3468 = vmatprep.subr.bf16.mxu1 %v3578_v3  ;;  %v3591_v38 = vld [vmem:[%s4332_s17 + $0x24] ss:$8 sps:$4 sm:$0xff]   ;;  %v546_v42 = vpack.c.bf16 %v527_v37, %v526_v36  ;;  %v3589_v43 = vld [vmem:[%s4332_s17 + $0x20] ss:$8 sps:$4 sm:$0xff]   ;;  %v3594_v44 = vld [vmem:[%s4332_s17 + $0x34] ss:$8 sps:$4 sm:$0xff]   ;;  %p3943_p12 = pnand %p3942_p8, %p3936_p7 }
  0xaa   : > { %v512_v45 = vld [vmem:[%s4324_s8 + $0x50] sm:$0xff]  ;;  %v513_v46 = vld [vmem:[%s4324_s8 + $0x58] sm:$0xff]  ;;  %v514_v47 = vld [vmem:[%s4324_s8 + $0x60] sm:$0xff] }
  0xab   : > { %v515_v48 = vld [vmem:[%s4324_s8 + $0x68] sm:$0xff]  ;;  %v528_v49 = vld [vmem:[%s4324_s8 + $0xd0] sm:$0xff]  ;;  %v529_v50 = vld [vmem:[%s4324_s8 + $0xd8] sm:$0xff]  ;;  %v539_v55 = vpack.c.bf16 %v513_v46, %v512_v45 }
  0xac   : > { %3424 = vmatpush3.bf16.msra.mxu0 %v3578_v3  ;;  %3476 = vmatpush3.bf16.msra.mxu1 %v3578_v3  ;;  %v3592_v51 = vld [vmem:[%s4332_s17 + $0x30] ss:$8 sps:$4 sm:$0xff]   ;;  %v530_v52 = vld [vmem:[%s4324_s8 + $0xe0] sm:$0xff]  ;;  %v531_v53 = vld [vmem:[%s4324_s8 + $0xe8] sm:$0xff]  ;;  %v540_v56 = vpack.c.bf16 %v515_v48, %v514_v47  ;;  %v547_v57 = vpack.c.bf16 %v529_v50, %v528_v49 }
  0xad   : > { %3425 = vmatprep.subr.bf16.mxu0 %v3579_v7  ;;  %3469 = vmatprep.subr.bf16.mxu1 %v3579_v7  ;;  %v3597_v54 = vld [vmem:[%s4332_s17 + $0x44] ss:$8 sps:$4 sm:$0xff]   ;;  %v548_v58 = vpack.c.bf16 %v531_v53, %v530_v52  ;;  %v3595_v59 = vld [vmem:[%s4332_s17 + $0x40] ss:$8 sps:$4 sm:$0xff]   ;;  %v3600_v60 = vld [vmem:[%s4332_s17 + $0x54] ss:$8 sps:$4 sm:$0xff]  }
  0xae   : > { %v516_v61 = vld [vmem:[%s4324_s8 + $0x70] sm:$0xff]  ;;  %v517_v62 = vld [vmem:[%s4324_s8 + $0x78] sm:$0xff]  ;;  %v3603_v2 = vld [vmem:[%s4332_s17 + $0x64] ss:$8 sps:$4 sm:$0xff]  }
  0xaf   : > { %v532_v63 = vld [vmem:[%s4324_s8 + $0xf0] sm:$0xff]  ;;  %v533_v0 = vld [vmem:[%s4324_s8 + $0xf8] sm:$0xff]  ;;  %v541_v3 = vpack.c.bf16 %v517_v62, %v516_v61  ;;  %v3601_v5 = vld [vmem:[%s4332_s17 + $0x60] ss:$8 sps:$4 sm:$0xff]  }
  0xb0   : > { %3426 = vmatpush3.bf16.msra.mxu0 %v3579_v7  ;;  %3477 = vmatpush3.bf16.msra.mxu1 %v3579_v7  ;;  %v3598_v1 = vld [vmem:[%s4332_s17 + $0x50] ss:$8 sps:$4 sm:$0xff]   ;;  %v549_v4 = vpack.c.bf16 %v533_v0, %v532_v63  ;;  %v3606_v6 = vld [vmem:[%s4332_s17 + $0x74] ss:$8 sps:$4 sm:$0xff]   ;;  %v4398_v10 = vld [vmem:[%s5791_s4] ss:$0 sm:$0xff] }
  0xb1   : > { %3427 = vmatprep.subr.bf16.mxu0 %v3580_v11  ;;  %3470 = vmatprep.subr.bf16.mxu1 %v3580_v11  ;;  %v3604_v7 = vld [vmem:[%s4332_s17 + $0x70] ss:$8 sps:$4 sm:$0xff]  }
  0xb4   : > { %3428 = vmatpush3.bf16.msra.mxu0 %v3580_v11  ;;  %3478 = vmatpush3.bf16.msra.mxu1 %v3580_v11 }
  0xb5   : > { %3429 = vmatprep.subr.bf16.mxu0 %v3581_v12  ;;  %3471 = vmatprep.subr.bf16.mxu1 %v3581_v12 }
  0xb8   : > { %3430 = vmatpush3.bf16.msra.mxu0 %v3581_v12  ;;  %3479 = vmatpush3.bf16.msra.mxu1 %v3581_v12 }
  0xb9   : > { %3431 = vmatprep.subr.bf16.mxu0 %v3582_v13  ;;  %3472 = vmatprep.subr.bf16.mxu1 %v3582_v13 }
  0xbc   : > { %3432 = vmatpush3.bf16.msra.mxu0 %v3582_v13  ;;  %3480 = vmatpush3.bf16.msra.mxu1 %v3582_v13 }
  0xbd   : > { %926 = vmatprep.subr.bf16.mxu1 %v3585_v22 }
  0xbf   : > { %3434 = vmatmul.mubr.bf16.vlgmr.msra.gmra.mrb[0].mxu0 %v535_v23  ;;  %3450 = vmatmul.mubr.bf16.vlgmr.msra.gmra.mrb[0].mxu1 %v543_v26 }
  0xc0   : > { %3437 = vmatprep.mubr.bf16.mxu0 %v536_v25  ;;  %3453 = vmatprep.mubr.bf16.mxu1 %v544_v28 }
  0xc1   : > { %927 = vmatpush1.bf16.msra.mxu1 %v3583_v24 }
  0xc2   : > { %928 = vmatprep.subr.bf16.mxu1 %v3588_v27 }
  0xc5   : > { %929 = vmatpush1.bf16.msra.mxu1 %v3586_v35 }
  0xc6   : > { %930 = vmatprep.subr.bf16.mxu1 %v3591_v38 }
  0xc7   : > { %3438 = vmatmul.mubr.bf16.gmra.mrb[4].mxu0 %v537_v39  ;;  %3454 = vmatmul.mubr.bf16.gmra.mrb[4].mxu1 %v545_v41 }
  0xc8   : > { %3441 = vmatprep.mubr.bf16.mxu0 %v538_v40  ;;  %3457 = vmatprep.mubr.bf16.mxu1 %v546_v42 }
  0xc9   : > { %931 = vmatpush1.bf16.msra.mxu1 %v3589_v43 }
  0xca   : > { %932 = vmatprep.subr.bf16.mxu1 %v3594_v44 }
  0xcd   : > { %933 = vmatpush1.bf16.msra.mxu1 %v3592_v51 }
  0xce   : > { %934 = vmatprep.subr.bf16.mxu1 %v3597_v54 }
  0xcf   : > { %3442 = vmatmul.mubr.bf16.gmra.mrb[8].mxu0 %v539_v55  ;;  %3458 = vmatmul.mubr.bf16.gmra.mrb[8].mxu1 %v547_v57 }
  0xd0   : > { %3445 = vmatprep.mubr.bf16.mxu0 %v540_v56  ;;  %3461 = vmatprep.mubr.bf16.mxu1 %v548_v58 }
  0xd1   : > { %935 = vmatpush1.bf16.msra.mxu1 %v3595_v59 }
  0xd2   : > { %936 = vmatprep.subr.bf16.mxu1 %v3600_v60 }
  0xd5   : > { %937 = vmatpush1.bf16.msra.mxu1 %v3598_v1 }
  0xd6   : > { %938 = vmatprep.subr.bf16.mxu1 %v3603_v2 }
  0xd7   : > { %3446 = vmatmul.mubr.bf16.gmra.mrb[12].mxu0 %v541_v3  ;;  %3462 = vmatmul.mubr.bf16.gmra.mrb[12].mxu1 %v549_v4 }
  0xd8   : > { %958 = vmatprep.mubr.bf16.mxu1 %v4033_v8 }
  0xd9   : > { %939 = vmatpush1.bf16.msra.mxu1 %v3601_v5 }
  0xda   : > { %940 = vmatprep.subr.bf16.mxu1 %v3606_v6 }
  0xdd   : > { %941 = vmatpush1.bf16.msra.mxu1 %v3604_v7 }
 0x192   : > { %v3435_v9 = vpop.f32.mrb[0].mxu0  ;;  %v3451_v12 = vpop.f32.mrb[0].mxu1 }
 0x193   : > { %v655_v11 = vpop.f32.mrb[1].mxu0  ;;  %v4401_v14 = vadd.f32 %v3451_v12, %v4398_v10  ;;  %v719_v15 = vpop.f32.mrb[1].mxu1  ;;  %v664_v16 = vadd.f32 %v3435_v9, %v4398_v10 }
 0x194   : > { %v3436_v13 = vpop.f32.mrb[2].mxu0  ;;  %v4406_v19 = vadd.f32 %v4398_v10, %v719_v15  ;;  %v3452_v20 = vpop.f32.mrb[2].mxu1  ;;  %v656_v21 = vadd.f32 %v4398_v10, %v655_v11 }
 0x195   : > { %v667_v17 = vadd.f32 %v3436_v13, %v4398_v10  ;;  %v658_v18 = vpop.f32.mrb[3].mxu0  ;;  %v4411_v23 = vadd.f32 %v3452_v20, %v4398_v10  ;;  %v722_v24 = vpop.f32.mrb[3].mxu1 }
 0x196   : > { %v659_v22 = vadd.f32 %v4398_v10, %v658_v18  ;;  %v4414_v26 = vadd.f32 %v4398_v10, %v722_v24 }
 0x197   : > { %v783_v25 = vpack.c.bf16 %v667_v17, %v664_v16  ;;  %v791_v28 = vpack.c.bf16 %v4411_v23, %v4401_v14 }
 0x198   : > { %v782_v27 = vpack.c.bf16 %v659_v22, %v656_v21  ;;  %v790_v29 = vpack.c.bf16 %v4414_v26, %v4406_v19 }
 0x19a   : > { %959 = vmatmul.mubr.bf16.vlgmr.msra.gmra.mrb[16].mxu1 %v782_v27  ;;  %v3439_v30 = vpop.f32.mrb[4].mxu0  ;;  %v3455_v33 = vpop.f32.mrb[4].mxu1 }
 0x19b   : > { %v4421_v31 = vadd.f32 %v3439_v30, %v4398_v10  ;;  %v671_v32 = vpop.f32.mrb[5].mxu0  ;;  %968 = vmatprep.mubr.bf16.mxu1 %v4033_v8  ;;  %v4426_v36 = vadd.f32 %v3455_v33, %v4398_v10  ;;  %v735_v37 = vpop.f32.mrb[5].mxu1 }
 0x19c   : > { %v672_v34 = vadd.f32 %v4398_v10, %v671_v32  ;;  %v3440_v35 = vpop.f32.mrb[6].mxu0  ;;  %v4430_v40 = vadd.f32 %v4398_v10, %v735_v37  ;;  %v3456_v41 = vpop.f32.mrb[6].mxu1 }
 0x19d   : > { %v683_v38 = vadd.f32 %v3440_v35, %v4398_v10  ;;  %v674_v39 = vpop.f32.mrb[7].mxu0  ;;  %v4434_v43 = vadd.f32 %v3456_v41, %v4398_v10  ;;  %v738_v44 = vpop.f32.mrb[7].mxu1 }
 0x19e   : > { %v675_v42 = vadd.f32 %v4398_v10, %v674_v39  ;;  %v739_v46 = vadd.f32 %v4398_v10, %v738_v44 }
 0x19f   : > { %v785_v45 = vpack.c.bf16 %v683_v38, %v4421_v31  ;;  %v793_v48 = vpack.c.bf16 %v4434_v43, %v4426_v36 }
 0x1a0   : > { %v784_v47 = vpack.c.bf16 %v675_v42, %v672_v34  ;;  %v792_v49 = vpack.c.bf16 %v739_v46, %v4430_v40 }
 0x1a2   : > { %969 = vmatmul.mubr.bf16.gmra.mrb[20].mxu1 %v783_v25  ;;  %v3443_v50 = vpop.f32.mrb[8].mxu0  ;;  %v3459_v53 = vpop.f32.mrb[8].mxu1 }
 0x1a3   : > { %978 = vmatprep.mubr.bf16.mxu1 %v4033_v8  ;;  %v696_v51 = vadd.f32 %v3443_v50, %v4398_v10  ;;  %v687_v52 = vpop.f32.mrb[9].mxu0  ;;  %v760_v56 = vadd.f32 %v3459_v53, %v4398_v10  ;;  %v751_v57 = vpop.f32.mrb[9].mxu1 }
 0x1a4   : > { %v688_v54 = vadd.f32 %v4398_v10, %v687_v52  ;;  %v3444_v55 = vpop.f32.mrb[10].mxu0  ;;  %v752_v60 = vadd.f32 %v4398_v10, %v751_v57  ;;  %v3460_v61 = vpop.f32.mrb[10].mxu1 }
 0x1a5   : > { %v699_v58 = vadd.f32 %v3444_v55, %v4398_v10  ;;  %v690_v59 = vpop.f32.mrb[11].mxu0  ;;  %v763_v63 = vadd.f32 %v3460_v61, %v4398_v10  ;;  %v754_v0 = vpop.f32.mrb[11].mxu1 }
 0x1a6   : > { %v691_v62 = vadd.f32 %v4398_v10, %v690_v59  ;;  %v755_v2 = vadd.f32 %v4398_v10, %v754_v0 }
 0x1a7   : > { %v787_v1 = vpack.c.bf16 %v699_v58, %v696_v51  ;;  %v795_v4 = vpack.c.bf16 %v763_v63, %v760_v56  ;;  %v4035_v51 = vmov 0.0  }
 0x1a8   : > { %v786_v3 = vpack.c.bf16 %v691_v62, %v688_v54  ;;  %v794_v5 = vpack.c.bf16 %v755_v2, %v752_v60  ;;  %439 = vst.msk [vmem:[#allocation3 + $0x8] sm:$0xff] %vm405_vm0, %v4035_v51  ;;  %438 = vst.msk [vmem:[#allocation3] sm:$0xff] %vm405_vm0, %v4035_v51 }
 0x1a9   : > { %440 = vst.msk [vmem:[#allocation3 + $0x10] sm:$0xff] %vm405_vm0, %v4035_v51  ;;  %441 = vst.msk [vmem:[#allocation3 + $0x18] sm:$0xff] %vm405_vm0, %v4035_v51 }
 0x1aa   : > { %979 = vmatmul.mubr.bf16.gmra.mrb[24].mxu1 %v784_v47  ;;  %v3447_v6 = vpop.f32.mrb[12].mxu0  ;;  %v3463_v11 = vpop.f32.mrb[12].mxu1  ;;  %442 = vst.msk [vmem:[#allocation3 + $0x20] sm:$0xff] %vm405_vm0, %v4035_v51  ;;  %443 = vst.msk [vmem:[#allocation3 + $0x28] sm:$0xff] %vm405_vm0, %v4035_v51 }
 0x1ab   : > { %988 = vmatprep.mubr.bf16.mxu1 %v4033_v8  ;;  %v712_v7 = vadd.f32 %v3447_v6, %v4398_v10  ;;  %v703_v9 = vpop.f32.mrb[13].mxu0  ;;  %v776_v15 = vadd.f32 %v3463_v11, %v4398_v10  ;;  %v767_v16 = vpop.f32.mrb[13].mxu1  ;;  %444 = vst.msk [vmem:[#allocation3 + $0x30] sm:$0xff] %vm405_vm0, %v4035_v51  ;;  %445 = vst.msk [vmem:[#allocation3 + $0x38] sm:$0xff] %vm405_vm0, %v4035_v51 }
 0x1ac   : > { %v704_v12 = vadd.f32 %v4398_v10, %v703_v9  ;;  %v3448_v13 = vpop.f32.mrb[14].mxu0  ;;  %v768_v20 = vadd.f32 %v4398_v10, %v767_v16  ;;  %v3464_v21 = vpop.f32.mrb[14].mxu1  ;;  %446 = vst.msk [vmem:[#allocation3 + $0x40] sm:$0xff] %vm405_vm0, %v4035_v51  ;;  %447 = vst.msk [vmem:[#allocation3 + $0x48] sm:$0xff] %vm405_vm0, %v4035_v51 }
 0x1ad   : > { %v715_v17 = vadd.f32 %v3448_v13, %v4398_v10  ;;  %v706_v18 = vpop.f32.mrb[15].mxu0  ;;  %v779_v24 = vadd.f32 %v3464_v21, %v4398_v10  ;;  %v770_v25 = vpop.f32.mrb[15].mxu1  ;;  %448 = vst.msk [vmem:[#allocation3 + $0x50] sm:$0xff] %vm405_vm0, %v4035_v51  ;;  %449 = vst.msk [vmem:[#allocation3 + $0x58] sm:$0xff] %vm405_vm0, %v4035_v51 }
 0x1ae   : > { %v707_v22 = vadd.f32 %v4398_v10, %v706_v18  ;;  %v771_v30 = vadd.f32 %v4398_v10, %v770_v25  ;;  %v4034_v10 = vmov -inf   ;;  %450 = vst.msk [vmem:[#allocation3 + $0x60] sm:$0xff] %vm405_vm0, %v4035_v51  ;;  %451 = vst.msk [vmem:[#allocation3 + $0x68] sm:$0xff] %vm405_vm0, %v4035_v51 }
 0x1af   : > { %v789_v27 = vpack.c.bf16 %v715_v17, %v712_v7  ;;  %v797_v32 = vpack.c.bf16 %v779_v24, %v776_v15  ;;  %406 = vst.msk [vmem:[#allocation2] sm:$0xff] %vm405_vm0, %v4034_v10  ;;  %407 = vst.msk [vmem:[#allocation2 + $0x8] sm:$0xff] %vm405_vm0, %v4034_v10 }
 0x1b0   : > { %v788_v31 = vpack.c.bf16 %v707_v22, %v704_v12  ;;  %v796_v33 = vpack.c.bf16 %v771_v30, %v768_v20  ;;  %408 = vst.msk [vmem:[#allocation2 + $0x10] sm:$0xff] %vm405_vm0, %v4034_v10  ;;  %409 = vst.msk [vmem:[#allocation2 + $0x18] sm:$0xff] %vm405_vm0, %v4034_v10 }
 0x1b1   : > { %410 = vst.msk [vmem:[#allocation2 + $0x20] sm:$0xff] %vm405_vm0, %v4034_v10  ;;  %411 = vst.msk [vmem:[#allocation2 + $0x28] sm:$0xff] %vm405_vm0, %v4034_v10 }
 0x1b2   : > { %989 = vmatmul.mubr.bf16.gmra.mrb[28].mxu1 %v785_v45  ;;  %412 = vst.msk [vmem:[#allocation2 + $0x30] sm:$0xff] %vm405_vm0, %v4034_v10  ;;  %413 = vst.msk [vmem:[#allocation2 + $0x38] sm:$0xff] %vm405_vm0, %v4034_v10 }
 0x1b3   : > { %998 = vmatprep.mubr.bf16.mxu1 %v4033_v8  ;;  %414 = vst.msk [vmem:[#allocation2 + $0x40] sm:$0xff] %vm405_vm0, %v4034_v10  ;;  %415 = vst.msk [vmem:[#allocation2 + $0x48] sm:$0xff] %vm405_vm0, %v4034_v10 }
 0x1b4   : > { %416 = vst.msk [vmem:[#allocation2 + $0x50] sm:$0xff] %vm405_vm0, %v4034_v10  ;;  %417 = vst.msk [vmem:[#allocation2 + $0x58] sm:$0xff] %vm405_vm0, %v4034_v10 }
 0x1b5   : > { %418 = vst.msk [vmem:[#allocation2 + $0x60] sm:$0xff] %vm405_vm0, %v4034_v10  ;;  %419 = vst.msk [vmem:[#allocation2 + $0x68] sm:$0xff] %vm405_vm0, %v4034_v10 }
 0x1b6   : > { %420 = vst.msk [vmem:[#allocation2 + $0x70] sm:$0xff] %vm405_vm0, %v4034_v10  ;;  %421 = vst.msk [vmem:[#allocation2 + $0x78] sm:$0xff] %vm405_vm0, %v4034_v10 }
 0x1b7   : > { %422 = vst.msk [vmem:[#allocation2 + $0x80] sm:$0xff] %vm405_vm0, %v4034_v10  ;;  %423 = vst.msk [vmem:[#allocation2 + $0x88] sm:$0xff] %vm405_vm0, %v4034_v10 }
 0x1b8   : > { %424 = vst.msk [vmem:[#allocation2 + $0x90] sm:$0xff] %vm405_vm0, %v4034_v10  ;;  %425 = vst.msk [vmem:[#allocation2 + $0x98] sm:$0xff] %vm405_vm0, %v4034_v10 }
 0x1b9   : > { %426 = vst.msk [vmem:[#allocation2 + $0xa0] sm:$0xff] %vm405_vm0, %v4034_v10  ;;  %427 = vst.msk [vmem:[#allocation2 + $0xa8] sm:$0xff] %vm405_vm0, %v4034_v10 }
 0x1ba   : > { %999 = vmatmul.mubr.bf16.gmra.mrb[32].mxu1 %v786_v3  ;;  %428 = vst.msk [vmem:[#allocation2 + $0xb0] sm:$0xff] %vm405_vm0, %v4034_v10  ;;  %429 = vst.msk [vmem:[#allocation2 + $0xb8] sm:$0xff] %vm405_vm0, %v4034_v10 }
 0x1bb   : > { %1008 = vmatprep.mubr.bf16.mxu1 %v4033_v8  ;;  %430 = vst.msk [vmem:[#allocation2 + $0xc0] sm:$0xff] %vm405_vm0, %v4034_v10  ;;  %431 = vst.msk [vmem:[#allocation2 + $0xc8] sm:$0xff] %vm405_vm0, %v4034_v10 }
 0x1bc   : > { %432 = vst.msk [vmem:[#allocation2 + $0xd0] sm:$0xff] %vm405_vm0, %v4034_v10  ;;  %433 = vst.msk [vmem:[#allocation2 + $0xd8] sm:$0xff] %vm405_vm0, %v4034_v10 }
 0x1bd   : > { %434 = vst.msk [vmem:[#allocation2 + $0xe0] sm:$0xff] %vm405_vm0, %v4034_v10  ;;  %435 = vst.msk [vmem:[#allocation2 + $0xe8] sm:$0xff] %vm405_vm0, %v4034_v10 }
 0x1be   : > { %436 = vst.msk [vmem:[#allocation2 + $0xf0] sm:$0xff] %vm405_vm0, %v4034_v10  ;;  %437 = vst.msk [vmem:[#allocation2 + $0xf8] sm:$0xff] %vm405_vm0, %v4034_v10 }
 0x1bf   : > { %452 = vst.msk [vmem:[#allocation3 + $0x70] sm:$0xff] %vm405_vm0, %v4035_v51  ;;  %453 = vst.msk [vmem:[#allocation3 + $0x78] sm:$0xff] %vm405_vm0, %v4035_v51 }
 0x1c0   : > { %454 = vst.msk [vmem:[#allocation3 + $0x80] sm:$0xff] %vm405_vm0, %v4035_v51  ;;  %455 = vst.msk [vmem:[#allocation3 + $0x88] sm:$0xff] %vm405_vm0, %v4035_v51 }
 0x1c1   : > { %456 = vst.msk [vmem:[#allocation3 + $0x90] sm:$0xff] %vm405_vm0, %v4035_v51  ;;  %457 = vst.msk [vmem:[#allocation3 + $0x98] sm:$0xff] %vm405_vm0, %v4035_v51 }
 0x1c2   : > { %1009 = vmatmul.mubr.bf16.gmra.mrb[36].mxu1 %v787_v1  ;;  %458 = vst.msk [vmem:[#allocation3 + $0xa0] sm:$0xff] %vm405_vm0, %v4035_v51  ;;  %459 = vst.msk [vmem:[#allocation3 + $0xa8] sm:$0xff] %vm405_vm0, %v4035_v51 }
 0x1c3   : > { %1018 = vmatprep.mubr.bf16.mxu1 %v4033_v8  ;;  %460 = vst.msk [vmem:[#allocation3 + $0xb0] sm:$0xff] %vm405_vm0, %v4035_v51  ;;  %461 = vst.msk [vmem:[#allocation3 + $0xb8] sm:$0xff] %vm405_vm0, %v4035_v51 }
 0x1c4   : > { %462 = vst.msk [vmem:[#allocation3 + $0xc0] sm:$0xff] %vm405_vm0, %v4035_v51  ;;  %463 = vst.msk [vmem:[#allocation3 + $0xc8] sm:$0xff] %vm405_vm0, %v4035_v51 }
 0x1c5   : > { %464 = vst.msk [vmem:[#allocation3 + $0xd0] sm:$0xff] %vm405_vm0, %v4035_v51  ;;  %465 = vst.msk [vmem:[#allocation3 + $0xd8] sm:$0xff] %vm405_vm0, %v4035_v51 }
 0x1c6   : > { %466 = vst.msk [vmem:[#allocation3 + $0xe0] sm:$0xff] %vm405_vm0, %v4035_v51  ;;  %467 = vst.msk [vmem:[#allocation3 + $0xe8] sm:$0xff] %vm405_vm0, %v4035_v51 }
 0x1c7   : > { %468 = vst.msk [vmem:[#allocation3 + $0xf0] sm:$0xff] %vm405_vm0, %v4035_v51  ;;  %469 = vst.msk [vmem:[#allocation3 + $0xf8] sm:$0xff] %vm405_vm0, %v4035_v51 }
 0x1ca   : > { %1019 = vmatmul.mubr.bf16.gmra.mrb[40].mxu1 %v788_v31 }
 0x1cb   : > { %1028 = vmatprep.mubr.bf16.mxu1 %v4033_v8 }
 0x1d2   : > { %1029 = vmatmul.mubr.bf16.gmra.mrb[44].mxu1 %v789_v27 }
 0x1d3   : > { %1038 = vmatprep.mubr.bf16.mxu1 %v4033_v8 }
 0x1da   : > { %1039 = vmatmul.mubr.bf16.gmra.mrb[48].mxu1 %v790_v29 }
 0x1db   : > { %1048 = vmatprep.mubr.bf16.mxu1 %v4033_v8 }
 0x1e2   : > { %1049 = vmatmul.mubr.bf16.gmra.mrb[52].mxu1 %v791_v28 }
 0x1e3   : > { %1058 = vmatprep.mubr.bf16.mxu1 %v4033_v8 }
 0x1ea   : > { %1059 = vmatmul.mubr.bf16.gmra.mrb[56].mxu1 %v792_v49 }
 0x1eb   : > { %1068 = vmatprep.mubr.bf16.mxu1 %v4033_v8 }
 0x1f2   : > { %1069 = vmatmul.mubr.bf16.gmra.mrb[60].mxu1 %v793_v48 }
 0x1f3   : > { %1078 = vmatprep.mubr.bf16.mxu1 %v4033_v8 }
 0x1fa   : > { %1079 = vmatmul.mubr.bf16.gmra.mrb[64].mxu1 %v794_v5 }
 0x1fb   : > { %1088 = vmatprep.mubr.bf16.mxu1 %v4033_v8 }
 0x202   : > { %1089 = vmatmul.mubr.bf16.gmra.mrb[68].mxu1 %v795_v4 }
 0x203   : > { %1098 = vmatprep.mubr.bf16.mxu1 %v4033_v8 }
 0x20a   : > { %1099 = vmatmul.mubr.bf16.gmra.mrb[72].mxu1 %v796_v33 }
 0x20b   : > { %1108 = vmatprep.mubr.bf16.mxu1 %v4033_v8 }
 0x212   : > { %1109 = vmatmul.mubr.bf16.gmra.mrb[76].mxu1 %v797_v32 }
 0x26d   : > { %v4509_v8 = vpop.f32.mrb[16].mxu1 }
 0x26e   : > { %v4511_v14 = vpop.f32.mrb[17].mxu1 }
 0x26f   : > { %v4513_v19 = vpop.f32.mrb[18].mxu1  ;;  %v1151_v23 = vmax.f32 %v4509_v8, %v4511_v14 }
 0x270   : > { %v4517_v26 = vpop.f32.mrb[19].mxu1 }
 0x271   : > { %1152 = vmax.xlane.f32.xlu0 %v1151_v23  ;;  %v1154_v28 = vmax.f32 %v4513_v19, %v4517_v26 }
 0x275   : > { %1155 = vmax.xlane.f32.xlu0 %v1154_v28  ;;  %v4521_v29 = vpop.f32.mrb[20].mxu1 }
 0x276   : > { %v4523_v34 = vpop.f32.mrb[21].mxu1 }
 0x277   : > { %v4525_v35 = vpop.f32.mrb[22].mxu1  ;;  %v1157_v36 = vmax.f32 %v4521_v29, %v4523_v34 }
 0x278   : > { %v4529_v37 = vpop.f32.mrb[23].mxu1 }
 0x279   : > { %1158 = vmax.xlane.f32.xlu1 %v1157_v36  ;;  %v1160_v38 = vmax.f32 %v4525_v35, %v4529_v37 }
 0x27d   : > { %1161 = vmax.xlane.f32.xlu1 %v1160_v38  ;;  %v4533_v39 = vpop.f32.mrb[24].mxu1 }
 0x27e   : > { %v4535_v40 = vpop.f32.mrb[25].mxu1 }
 0x27f   : > { %v4537_v41 = vpop.f32.mrb[26].mxu1  ;;  %v1163_v42 = vmax.f32 %v4533_v39, %v4535_v40 }
 0x280   : > { %5911 = vst [vmem:[#allocation27_spill] sm:$0xff] %v4537_v41  ;;  %v4541_v43 = vpop.f32.mrb[27].mxu1 }
 0x281   : > { %5912 = vst [vmem:[#allocation28_spill] sm:$0xff] %v4541_v43  ;;  %1164 = vmax.xlane.f32.xlu0 %v1163_v42  ;;  %v1166_v44 = vmax.f32 %v4537_v41, %v4541_v43 }
 0x283   : > { %1167 = vmax.xlane.f32.xlu1 %v1166_v44 }
 0x285   : > { %v4545_v45 = vpop.f32.mrb[28].mxu1 }
 0x286   : > { %5913 = vst [vmem:[#allocation29_spill] sm:$0xff] %v4545_v45  ;;  %v4547_v46 = vpop.f32.mrb[29].mxu1 }
 0x287   : > { %5914 = vst [vmem:[#allocation30_spill] sm:$0xff] %v4547_v46  ;;  %v4549_v47 = vpop.f32.mrb[30].mxu1  ;;  %v1169_v48 = vmax.f32 %v4545_v45, %v4547_v46  ;;  %v4991_v46 = vld [vmem:[#allocation2 + $0xc8] sm:$0xff]  ;;  %v5005_v45 = vld [vmem:[#allocation2 + $0xd0] sm:$0xff] }
 0x288   : > { %5915 = vst [vmem:[#allocation31_spill] sm:$0xff] %v4549_v47  ;;  %v4553_v49 = vpop.f32.mrb[31].mxu1  ;;  %5970 = vst [vmem:[#allocation86_spill] sm:$0xff] %v4991_v46 }
 0x289   : > { %5916 = vst [vmem:[#allocation32_spill] sm:$0xff] %v4553_v49  ;;  %1170 = vmax.xlane.f32.xlu0 %v1169_v48  ;;  %v1172_v50 = vmax.f32 %v4549_v47, %v4553_v49  ;;  %5973 = vst [vmem:[#allocation89_spill] sm:$0xff] %v5005_v45 }
 0x28b   : > { %1173 = vmax.xlane.f32.xlu1 %v1172_v50 }
 0x28d   : > { %v4589_v52 = vpop.f32.mrb[32].mxu1 }
 0x28e   : > { %5917 = vst [vmem:[#allocation33_spill] sm:$0xff] %v4589_v52  ;;  %v4591_v53 = vpop.f32.mrb[33].mxu1 }
 0x28f   : > { %5918 = vst [vmem:[#allocation34_spill] sm:$0xff] %v4591_v53  ;;  %v4593_v54 = vpop.f32.mrb[34].mxu1  ;;  %v1175_v55 = vmax.f32 %v4589_v52, %v4591_v53  ;;  %v4971_v53 = vld [vmem:[#allocation2 + $0xb8] sm:$0xff] }
 0x290   : > { %5919 = vst [vmem:[#allocation35_spill] sm:$0xff] %v4593_v54  ;;  %v4597_v56 = vpop.f32.mrb[35].mxu1  ;;  %5966 = vst [vmem:[#allocation82_spill] sm:$0xff] %v4971_v53 }
 0x291   : > { %5920 = vst [vmem:[#allocation36_spill] sm:$0xff] %v4597_v56  ;;  %1176 = vmax.xlane.f32.xlu0 %v1175_v55  ;;  %v1178_v57 = vmax.f32 %v4593_v54, %v4597_v56 }
 0x293   : > { %1179 = vmax.xlane.f32.xlu1 %v1178_v57 }
 0x295   : > { %v4601_v58 = vpop.f32.mrb[36].mxu1 }
 0x296   : > { %5921 = vst [vmem:[#allocation37_spill] sm:$0xff] %v4601_v58  ;;  %v4603_v59 = vpop.f32.mrb[37].mxu1 }
 0x297   : > { %5922 = vst [vmem:[#allocation38_spill] sm:$0xff] %v4603_v59  ;;  %v4605_v60 = vpop.f32.mrb[38].mxu1  ;;  %v1181_v61 = vmax.f32 %v4601_v58, %v4603_v59  ;;  %v4951_v59 = vld [vmem:[#allocation2 + $0xa8] sm:$0xff] }
 0x298   : > { %5923 = vst [vmem:[#allocation39_spill] sm:$0xff] %v4605_v60  ;;  %v4609_v62 = vpop.f32.mrb[39].mxu1 }
 0x299   : > { %5924 = vst [vmem:[#allocation40_spill] sm:$0xff] %v4609_v62  ;;  %1182 = vmax.xlane.f32.xlu0 %v1181_v61  ;;  %v1184_v63 = vmax.f32 %v4605_v60, %v4609_v62 }
 0x29b   : > { %1185 = vmax.xlane.f32.xlu1 %v1184_v63 }
 0x29d   : > { %v4613_v0 = vpop.f32.mrb[40].mxu1 }
 0x29e   : > { %5925 = vst [vmem:[#allocation41_spill] sm:$0xff] %v4613_v0  ;;  %v4615_v1 = vpop.f32.mrb[41].mxu1 }
 0x29f   : > { %5926 = vst [vmem:[#allocation42_spill] sm:$0xff] %v4615_v1  ;;  %v4617_v2 = vpop.f32.mrb[42].mxu1  ;;  %v1187_v3 = vmax.f32 %v4613_v0, %v4615_v1  ;;  %v4931_v1 = vld [vmem:[#allocation2 + $0x98] sm:$0xff] }
 0x2a0   : > { %5927 = vst [vmem:[#allocation43_spill] sm:$0xff] %v4617_v2  ;;  %v4621_v4 = vpop.f32.mrb[43].mxu1 }
 0x2a1   : > { %5928 = vst [vmem:[#allocation44_spill] sm:$0xff] %v4621_v4  ;;  %1188 = vmax.xlane.f32.xlu0 %v1187_v3  ;;  %v1190_v5 = vmax.f32 %v4617_v2, %v4621_v4 }
 0x2a3   : > { %1191 = vmax.xlane.f32.xlu1 %v1190_v5 }
 0x2a5   : > { %v4625_v6 = vpop.f32.mrb[44].mxu1 }
 0x2a6   : > { %5929 = vst [vmem:[#allocation45_spill] sm:$0xff] %v4625_v6  ;;  %v4627_v7 = vpop.f32.mrb[45].mxu1 }
 0x2a7   : > { %5930 = vst [vmem:[#allocation46_spill] sm:$0xff] %v4627_v7  ;;  %v4629_v9 = vpop.f32.mrb[46].mxu1  ;;  %v1193_v11 = vmax.f32 %v4625_v6, %v4627_v7  ;;  %v4911_v7 = vld [vmem:[#allocation2 + $0x88] sm:$0xff] }
 0x2a8   : > { %5931 = vst [vmem:[#allocation47_spill] sm:$0xff] %v4629_v9  ;;  %v4633_v12 = vpop.f32.mrb[47].mxu1 }
 0x2a9   : > { %5932 = vst [vmem:[#allocation48_spill] sm:$0xff] %v4633_v12  ;;  %1194 = vmax.xlane.f32.xlu0 %v1193_v11  ;;  %v1196_v13 = vmax.f32 %v4629_v9, %v4633_v12 }
 0x2ab   : > { %1197 = vmax.xlane.f32.xlu1 %v1196_v13 }
 0x2ad   : > { %v4637_v15 = vpop.f32.mrb[48].mxu1 }
 0x2ae   : > { %5933 = vst [vmem:[#allocation49_spill] sm:$0xff] %v4637_v15  ;;  %v4639_v16 = vpop.f32.mrb[49].mxu1 }
 0x2af   : > { %5934 = vst [vmem:[#allocation50_spill] sm:$0xff] %v4639_v16  ;;  %v4641_v17 = vpop.f32.mrb[50].mxu1  ;;  %v1199_v18 = vmax.f32 %v4637_v15, %v4639_v16  ;;  %v4891_v16 = vld [vmem:[#allocation2 + $0x78] sm:$0xff] }
 0x2b0   : > { %5935 = vst [vmem:[#allocation51_spill] sm:$0xff] %v4641_v17  ;;  %v4645_v20 = vpop.f32.mrb[51].mxu1 }
 0x2b1   : > { %5936 = vst [vmem:[#allocation52_spill] sm:$0xff] %v4645_v20  ;;  %1200 = vmax.xlane.f32.xlu0 %v1199_v18  ;;  %v1202_v21 = vmax.f32 %v4641_v17, %v4645_v20 }
 0x2b3   : > { %1203 = vmax.xlane.f32.xlu1 %v1202_v21 }
 0x2b5   : > { %v4649_v22 = vpop.f32.mrb[52].mxu1 }
 0x2b6   : > { %5937 = vst [vmem:[#allocation53_spill] sm:$0xff] %v4649_v22  ;;  %v4651_v24 = vpop.f32.mrb[53].mxu1 }
 0x2b7   : > { %5938 = vst [vmem:[#allocation54_spill] sm:$0xff] %v4651_v24  ;;  %v4653_v25 = vpop.f32.mrb[54].mxu1  ;;  %v1205_v27 = vmax.f32 %v4649_v22, %v4651_v24  ;;  %v4871_v24 = vld [vmem:[#allocation2 + $0x68] sm:$0xff] }
 0x2b8   : > { %5939 = vst [vmem:[#allocation55_spill] sm:$0xff] %v4653_v25  ;;  %v4657_v30 = vpop.f32.mrb[55].mxu1 }
 0x2b9   : > { %5940 = vst [vmem:[#allocation56_spill] sm:$0xff] %v4657_v30  ;;  %1206 = vmax.xlane.f32.xlu0 %v1205_v27  ;;  %v1208_v31 = vmax.f32 %v4653_v25, %v4657_v30 }
 0x2bb   : > { %1209 = vmax.xlane.f32.xlu1 %v1208_v31 }
 0x2bd   : > { %v4661_v32 = vpop.f32.mrb[56].mxu1 }
 0x2be   : > { %5941 = vst [vmem:[#allocation57_spill] sm:$0xff] %v4661_v32  ;;  %v4663_v33 = vpop.f32.mrb[57].mxu1 }
 0x2bf   : > { %5942 = vst [vmem:[#allocation58_spill] sm:$0xff] %v4663_v33  ;;  %v4665_v10 = vpop.f32.mrb[58].mxu1  ;;  %v1211_v23 = vmax.f32 %v4661_v32, %v4663_v33  ;;  %v4851_v33 = vld [vmem:[#allocation2 + $0x58] sm:$0xff] }
 0x2c0   : > { %5943 = vst [vmem:[#allocation59_spill] sm:$0xff] %v4665_v10  ;;  %v4669_v28 = vpop.f32.mrb[59].mxu1 }
 0x2c1   : > { %5944 = vst [vmem:[#allocation60_spill] sm:$0xff] %v4669_v28  ;;  %1212 = vmax.xlane.f32.xlu0 %v1211_v23  ;;  %v1214_v36 = vmax.f32 %v4665_v10, %v4669_v28 }
 0x2c3   : > { %1215 = vmax.xlane.f32.xlu1 %v1214_v36 }
 0x2c5   : > { %v4673_v38 = vpop.f32.mrb[60].mxu1 }
 0x2c6   : > { %5945 = vst [vmem:[#allocation61_spill] sm:$0xff] %v4673_v38  ;;  %v4675_v42 = vpop.f32.mrb[61].mxu1 }
 0x2c7   : > { %5946 = vst [vmem:[#allocation62_spill] sm:$0xff] %v4675_v42  ;;  %v4677_v44 = vpop.f32.mrb[62].mxu1  ;;  %v1217_v48 = vmax.f32 %v4673_v38, %v4675_v42  ;;  %v4807_v42 = vld [vmem:[#allocation2 + $0x30] sm:$0xff] }
 0x2c8   : > { %5947 = vst [vmem:[#allocation63_spill] sm:$0xff] %v4677_v44  ;;  %v4681_v50 = vpop.f32.mrb[63].mxu1 }
 0x2c9   : > { %5948 = vst [vmem:[#allocation64_spill] sm:$0xff] %v4681_v50  ;;  %1218 = vmax.xlane.f32.xlu0 %v1217_v48  ;;  %v1220_v51 = vmax.f32 %v4677_v44, %v4681_v50  ;;  %v3620_v44 = vld [vmem:[%s4338_s6 + $0x30] sm:$0xff]  }
 0x2cb   : > { %1221 = vmax.xlane.f32.xlu1 %v1220_v51 }
 0x2cd   : > { %v4685_v55 = vpop.f32.mrb[64].mxu1 }
 0x2ce   : > { %5949 = vst [vmem:[#allocation65_spill] sm:$0xff] %v4685_v55  ;;  %v4687_v57 = vpop.f32.mrb[65].mxu1 }
 0x2cf   : > { %5950 = vst [vmem:[#allocation66_spill] sm:$0xff] %v4687_v57  ;;  %v4689_v61 = vpop.f32.mrb[66].mxu1  ;;  %v1223_v63 = vmax.f32 %v4685_v55, %v4687_v57  ;;  %v3618_v57 = vld [vmem:[%s4338_s6 + $0x28] sm:$0xff]  }
 0x2d0   : > { %5951 = vst [vmem:[#allocation67_spill] sm:$0xff] %v4689_v61  ;;  %v4693_v3 = vpop.f32.mrb[67].mxu1  ;;  %v4787_v55 = vld [vmem:[#allocation2 + $0x28] sm:$0xff] }
 0x2d1   : > { %5952 = vst [vmem:[#allocation68_spill] sm:$0xff] %v4693_v3  ;;  %1224 = vmax.xlane.f32.xlu0 %v1223_v63  ;;  %v1226_v5 = vmax.f32 %v4689_v61, %v4693_v3  ;;  %v4779_v61 = vld [vmem:[#allocation2 + $0x20] sm:$0xff]  ;;  %v3622_v3 = vld [vmem:[%s4338_s6 + $0x38] sm:$0xff]  }
 0x2d3   : > { %1227 = vmax.xlane.f32.xlu1 %v1226_v5 }
 0x2d5   : > { %v4697_v11 = vpop.f32.mrb[68].mxu1 }
 0x2d6   : > { %5953 = vst [vmem:[#allocation69_spill] sm:$0xff] %v4697_v11  ;;  %v4699_v13 = vpop.f32.mrb[69].mxu1 }
 0x2d7   : > { %5954 = vst [vmem:[#allocation70_spill] sm:$0xff] %v4699_v13  ;;  %v4701_v18 = vpop.f32.mrb[70].mxu1  ;;  %v1229_v21 = vmax.f32 %v4697_v11, %v4699_v13  ;;  %v4737_v13 = vld [vmem:[#allocation2] sm:$0xff] }
 0x2d8   : > { %5955 = vst [vmem:[#allocation71_spill] sm:$0xff] %v4701_v18  ;;  %v4705_v27 = vpop.f32.mrb[71].mxu1 }
 0x2d9   : > { %5956 = vst [vmem:[#allocation72_spill] sm:$0xff] %v4705_v27  ;;  %1230 = vmax.xlane.f32.xlu0 %v1229_v21  ;;  %v1232_v31 = vmax.f32 %v4701_v18, %v4705_v27 }
 0x2db   : > { %1233 = vmax.xlane.f32.xlu1 %v1232_v31 }
 0x2dd   : > { %v4709_v23 = vpop.f32.mrb[72].mxu1 }
 0x2de   : > { %5957 = vst [vmem:[#allocation73_spill] sm:$0xff] %v4709_v23  ;;  %v4711_v36 = vpop.f32.mrb[73].mxu1 }
 0x2df   : > { %5958 = vst [vmem:[#allocation74_spill] sm:$0xff] %v4711_v36  ;;  %v4713_v48 = vpop.f32.mrb[74].mxu1  ;;  %v1235_v51 = vmax.f32 %v4709_v23, %v4711_v36  ;;  %v3610_v23 = vld [vmem:[%s4338_s6 + $0x8] sm:$0xff]  }
 0x2e0   : > { %5959 = vst [vmem:[#allocation75_spill] sm:$0xff] %v4713_v48  ;;  %v4717_v63 = vpop.f32.mrb[75].mxu1 }
 0x2e1   : > { %5960 = vst [vmem:[#allocation76_spill] sm:$0xff] %v4717_v63  ;;  %1236 = vmax.xlane.f32.xlu0 %v1235_v51  ;;  %v1238_v5 = vmax.f32 %v4713_v48, %v4717_v63  ;;  %v3607_v63 = vld [vmem:[%s4338_s6 + $0x40] sm:$0xff]   ;;  %v3609_v48 = vld [vmem:[%s4338_s6 + $0x48] sm:$0xff]  }
 0x2e2   : > { %3305 = vmatprep.subr.bf16.mxu0 %v3607_v63 }
 0x2e3   : > { %1239 = vmax.xlane.f32.xlu1 %v1238_v5  ;;  %v3608_v5 = vld [vmem:[%s4338_s6] sm:$0xff]  }
 0x2e4   : > { %3306 = vmatpush3.bf16.msra.mxu0 %v3608_v5 }
 0x2e5   : > { %v4721_v21 = vpop.f32.mrb[76].mxu1  ;;  %3307 = vmatprep.subr.bf16.mxu0 %v3609_v48  ;;  %v3613_v48 = vld [vmem:[%s4338_s6 + $0x58] sm:$0xff]  }
 0x2e6   : > { %5961 = vst [vmem:[#allocation77_spill] sm:$0xff] %v4721_v21  ;;  %v4723_v31 = vpop.f32.mrb[77].mxu1 }
 0x2e7   : > { %5962 = vst [vmem:[#allocation78_spill] sm:$0xff] %v4723_v31  ;;  %v4725_v27 = vpop.f32.mrb[78].mxu1  ;;  %v1241_v18 = vmax.f32 %v4721_v21, %v4723_v31  ;;  %v3611_v21 = vld [vmem:[%s4338_s6 + $0x50] sm:$0xff]  }
 0x2e8   : > { %5963 = vst [vmem:[#allocation79_spill] sm:$0xff] %v4725_v27  ;;  %v4729_v36 = vpop.f32.mrb[79].mxu1  ;;  %3308 = vmatpush3.bf16.msra.mxu0 %v3610_v23 }
 0x2e9   : > { %5964 = vst [vmem:[#allocation80_spill] sm:$0xff] %v4729_v36  ;;  %v1244_v51 = vmax.f32 %v4725_v27, %v4729_v36  ;;  %1242 = vmax.xlane.f32.xlu0 %v1241_v18  ;;  %v3612_v36 = vld [vmem:[%s4338_s6 + $0x10] sm:$0xff]   ;;  %v4744_v18 = vld [vmem:[#allocation2 + $0x8] sm:$0xff]  ;;  %3309 = vmatprep.subr.bf16.mxu0 %v3611_v21  ;;  %v3614_v21 = vld [vmem:[%s4338_s6 + $0x18] sm:$0xff]  }
 0x2ea   : > { %v4767_v27 = vld [vmem:[#allocation2 + $0x18] sm:$0xff] }
 0x2eb   : > { %1245 = vmax.xlane.f32.xlu1 %v1244_v51  ;;  %v4755_v51 = vld [vmem:[#allocation2 + $0x10] sm:$0xff] }
 0x2ec   : > { %3310 = vmatpush3.bf16.msra.mxu0 %v3612_v36 }
 0x2ed   : > { %3311 = vmatprep.subr.bf16.mxu0 %v3613_v48  ;;  %v3616_v48 = vld [vmem:[%s4338_s6 + $0x20] sm:$0xff]  }
 0x2f0   : > { %3312 = vmatpush3.bf16.msra.mxu0 %v3614_v21 }
 0x2fe   : > { %v1153_v31 = vpop.xlane.xlu0 %1152 }
 0x2ff   : > { %v4741_v11 = vmax.f32 %v4737_v13, %v1153_v31 }
 0x301   : > { %2593 = vst.msk [vmem:[#allocation2] sm:$0xff] %vm405_vm0, %v4741_v11  ;;  %1377 = vperm.xlu0 %3573, %v4741_v11  }
 0x302   : > { %v1156_v23 = vpop.xlane.xlu0 %1155 }
 0x303   : > { %v4753_v31 = vmax.f32 %v4744_v18, %v1156_v23  ;;  %v3615_v23 = vld [vmem:[%s4338_s6 + $0x60] sm:$0xff]  }
 0x304   : > { %3313 = vmatprep.subr.bf16.mxu0 %v3615_v23 }
 0x305   : > { %2594 = vst.msk [vmem:[#allocation2 + $0x8] sm:$0xff] %vm405_vm0, %v4753_v31  ;;  %1382 = vperm.xlu1 %3574, %v4753_v31   ;;  %3314 = vmatpush3.bf16.msra.mxu0 %v3616_v48  ;;  %v3619_v48 = vld [vmem:[%s4338_s6 + $0x70] sm:$0xff]  }
 0x306   : > { %v1159_v36 = vpop.xlane.xlu1 %1158 }
 0x307   : > { %v4764_v63 = vmax.f32 %v4755_v51, %v1159_v36  ;;  %v3617_v36 = vld [vmem:[%s4338_s6 + $0x68] sm:$0xff]  }
 0x308   : > { %3315 = vmatprep.subr.bf16.mxu0 %v3617_v36 }
 0x309   : > { %2595 = vst.msk [vmem:[#allocation2 + $0x10] sm:$0xff] %vm405_vm0, %v4764_v63  ;;  %1387 = vperm.xlu1 %3574, %v4764_v63   ;;  %3316 = vmatpush3.bf16.msra.mxu0 %v3618_v57  ;;  %v4831_v57 = vld [vmem:[#allocation2 + $0x48] sm:$0xff] }
 0x30a   : > { %v1162_v5 = vpop.xlane.xlu1 %1161  ;;  %3317 = vmatprep.subr.bf16.mxu0 %v3619_v48 }
 0x30b   : > { %v4776_v21 = vmax.f32 %v4767_v27, %v1162_v5 }
 0x30d   : > { %2596 = vst.msk [vmem:[#allocation2 + $0x18] sm:$0xff] %vm405_vm0, %v4776_v21  ;;  %1392 = vperm.xlu1 %3574, %v4776_v21   ;;  %3318 = vmatpush3.bf16.msra.mxu0 %v3620_v44 }
 0x30e   : > { %v1165_v23 = vpop.xlane.xlu0 %1164 }
 0x30f   : > { %v4790_v5 = vmax.f32 %v4779_v61, %v1165_v23  ;;  %v3621_v23 = vld [vmem:[%s4338_s6 + $0x78] sm:$0xff]  }
 0x310   : > { %v1168_v50 = vpop.xlane.xlu1 %1167  ;;  %3319 = vmatprep.subr.bf16.mxu0 %v3621_v23 }
 0x311   : > { %2597 = vst.msk [vmem:[#allocation2 + $0x20] sm:$0xff] %vm405_vm0, %v4790_v5  ;;  %v4799_v36 = vmax.f32 %v4787_v55, %v1168_v50  ;;  %1397 = vperm.xlu1 %3574, %v4790_v5   ;;  %v4811_v50 = vld [vmem:[#allocation2 + $0x38] sm:$0xff]  ;;  %3320 = vmatpush3.bf16.msra.mxu0 %v3622_v3 }
 0x313   : > { %2598 = vst.msk [vmem:[#allocation2 + $0x28] sm:$0xff] %vm405_vm0, %v4799_v36 }
 0x315   : > { %1402 = vperm.xlu1 %3574, %v4799_v36  }
 0x316   : > { %v1171_v38 = vpop.xlane.xlu0 %1170 }
 0x317   : > { %v4814_v48 = vmax.f32 %v4807_v42, %v1171_v38  ;;  %v4828_v38 = vld [vmem:[#allocation2 + $0x40] sm:$0xff] }
 0x318   : > { %v1174_v44 = vpop.xlane.xlu1 %1173 }
 0x319   : > { %2599 = vst.msk [vmem:[#allocation2 + $0x30] sm:$0xff] %vm405_vm0, %v4814_v48  ;;  %v4821_v28 = vmax.f32 %v4811_v50, %v1174_v44  ;;  %1407 = vperm.xlu1 %3574, %v4814_v48  }
 0x31b   : > { %2600 = vst.msk [vmem:[#allocation2 + $0x38] sm:$0xff] %vm405_vm0, %v4821_v28 }
 0x31d   : > { %1412 = vperm.xlu1 %3574, %v4821_v28  }
 0x31e   : > { %v1177_v3 = vpop.xlane.xlu0 %1176 }
 0x31f   : > { %v4834_v10 = vmax.f32 %v4828_v38, %v1177_v3  ;;  %v4849_v3 = vld [vmem:[#allocation2 + $0x50] sm:$0xff] }
 0x320   : > { %v1180_v44 = vpop.xlane.xlu1 %1179 }
 0x321   : > { %2601 = vst.msk [vmem:[#allocation2 + $0x40] sm:$0xff] %vm405_vm0, %v4834_v10  ;;  %v4841_v23 = vmax.f32 %v4831_v57, %v1180_v44  ;;  %1417 = vperm.xlu1 %3574, %v4834_v10  }
 0x323   : > { %2602 = vst.msk [vmem:[#allocation2 + $0x48] sm:$0xff] %vm405_vm0, %v4841_v23  ;;  %1422 = vperm.xlu0 %3573, %v4841_v23  }
 0x326   : > { %v1183_v30 = vpop.xlane.xlu0 %1182 }
 0x327   : > { %v4854_v25 = vmax.f32 %v4849_v3, %v1183_v30  ;;  %v4869_v30 = vld [vmem:[#allocation2 + $0x60] sm:$0xff] }
 0x328   : > { %v1186_v44 = vpop.xlane.xlu1 %1185 }
 0x329   : > { %2603 = vst.msk [vmem:[#allocation2 + $0x50] sm:$0xff] %vm405_vm0, %v4854_v25  ;;  %v4861_v32 = vmax.f32 %v4851_v33, %v1186_v44  ;;  %1427 = vperm.xlu1 %3574, %v4854_v25  }
 0x32b   : > { %2604 = vst.msk [vmem:[#allocation2 + $0x58] sm:$0xff] %vm405_vm0, %v4861_v32  ;;  %1432 = vperm.xlu0 %3573, %v4861_v32  }
 0x32e   : > { %v1189_v20 = vpop.xlane.xlu0 %1188 }
 0x32f   : > { %v4874_v17 = vmax.f32 %v4869_v30, %v1189_v20  ;;  %v4889_v20 = vld [vmem:[#allocation2 + $0x70] sm:$0xff] }
 0x330   : > { %v1192_v44 = vpop.xlane.xlu1 %1191 }
 0x331   : > { %2605 = vst.msk [vmem:[#allocation2 + $0x60] sm:$0xff] %vm405_vm0, %v4874_v17  ;;  %v4881_v22 = vmax.f32 %v4871_v24, %v1192_v44  ;;  %1437 = vperm.xlu1 %3574, %v4874_v17  }
 0x333   : > { %2606 = vst.msk [vmem:[#allocation2 + $0x68] sm:$0xff] %vm405_vm0, %v4881_v22  ;;  %1442 = vperm.xlu0 %3573, %v4881_v22  }
 0x336   : > { %v1195_v12 = vpop.xlane.xlu0 %1194 }
 0x337   : > { %v4894_v9 = vmax.f32 %v4889_v20, %v1195_v12  ;;  %v4909_v12 = vld [vmem:[#allocation2 + $0x80] sm:$0xff] }
 0x338   : > { %v1198_v44 = vpop.xlane.xlu1 %1197 }
 0x339   : > { %2607 = vst.msk [vmem:[#allocation2 + $0x70] sm:$0xff] %vm405_vm0, %v4894_v9  ;;  %v4901_v15 = vmax.f32 %v4891_v16, %v1198_v44  ;;  %1447 = vperm.xlu1 %3574, %v4894_v9  }
 0x33b   : > { %2608 = vst.msk [vmem:[#allocation2 + $0x78] sm:$0xff] %vm405_vm0, %v4901_v15  ;;  %1452 = vperm.xlu0 %3573, %v4901_v15  }
 0x33e   : > { %v1201_v4 = vpop.xlane.xlu0 %1200 }
 0x33f   : > { %v4914_v2 = vmax.f32 %v4909_v12, %v1201_v4  ;;  %v4929_v4 = vld [vmem:[#allocation2 + $0x90] sm:$0xff] }
 0x340   : > { %v1204_v44 = vpop.xlane.xlu1 %1203 }
 0x341   : > { %2609 = vst.msk [vmem:[#allocation2 + $0x80] sm:$0xff] %vm405_vm0, %v4914_v2  ;;  %v4921_v6 = vmax.f32 %v4911_v7, %v1204_v44  ;;  %1457 = vperm.xlu1 %3574, %v4914_v2  }
 0x343   : > { %2610 = vst.msk [vmem:[#allocation2 + $0x88] sm:$0xff] %vm405_vm0, %v4921_v6  ;;  %1462 = vperm.xlu0 %3573, %v4921_v6  }
 0x346   : > { %v1207_v62 = vpop.xlane.xlu0 %1206 }
 0x347   : > { %v4934_v60 = vmax.f32 %v4929_v4, %v1207_v62  ;;  %v4949_v62 = vld [vmem:[#allocation2 + $0xa0] sm:$0xff] }
 0x348   : > { %v1210_v44 = vpop.xlane.xlu1 %1209 }
 0x349   : > { %2611 = vst.msk [vmem:[#allocation2 + $0x90] sm:$0xff] %vm405_vm0, %v4934_v60  ;;  %v4941_v0 = vmax.f32 %v4931_v1, %v1210_v44  ;;  %1467 = vperm.xlu1 %3574, %v4934_v60  }
 0x34b   : > { %2612 = vst.msk [vmem:[#allocation2 + $0x98] sm:$0xff] %vm405_vm0, %v4941_v0  ;;  %1472 = vperm.xlu0 %3573, %v4941_v0  }
 0x34e   : > { %v1213_v56 = vpop.xlane.xlu0 %1212 }
 0x34f   : > { %v4954_v54 = vmax.f32 %v4949_v62, %v1213_v56  ;;  %v4969_v56 = vld [vmem:[#allocation2 + $0xb0] sm:$0xff] }
 0x350   : > { %v1216_v44 = vpop.xlane.xlu1 %1215  ;;  %5965 = vst [vmem:[#allocation81_spill] sm:$0xff] %v4969_v56 }
 0x351   : > { %2613 = vst.msk [vmem:[#allocation2 + $0xa0] sm:$0xff] %vm405_vm0, %v4954_v54  ;;  %v4961_v58 = vmax.f32 %v4951_v59, %v1216_v44  ;;  %1477 = vperm.xlu1 %3574, %v4954_v54  }
 0x353   : > { %2614 = vst.msk [vmem:[#allocation2 + $0xa8] sm:$0xff] %vm405_vm0, %v4961_v58  ;;  %1482 = vperm.xlu0 %3573, %v4961_v58  }
 0x356   : > { %v1219_v49 = vpop.xlane.xlu0 %1218 }
 0x357   : > { %v4974_v47 = vmax.f32 %v4969_v56, %v1219_v49  ;;  %v4989_v49 = vld [vmem:[#allocation2 + $0xc0] sm:$0xff] }
 0x358   : > { %v1222_v44 = vpop.xlane.xlu1 %1221  ;;  %5969 = vst [vmem:[#allocation85_spill] sm:$0xff] %v4989_v49 }
 0x359   : > { %5967 = vst [vmem:[#allocation83_spill] sm:$0xff] %v4974_v47  ;;  %2615 = vst.msk [vmem:[#allocation2 + $0xb0] sm:$0xff] %vm405_vm0, %v4974_v47  ;;  %v4981_v52 = vmax.f32 %v4971_v53, %v1222_v44  ;;  %1487 = vperm.xlu1 %3574, %v4974_v47   ;;  %v5007_v53 = vld [vmem:[#allocation2 + $0xd8] sm:$0xff] }
 0x35a   : > { %5974 = vst [vmem:[#allocation90_spill] sm:$0xff] %v5007_v53 }
 0x35b   : > { %5968 = vst [vmem:[#allocation84_spill] sm:$0xff] %v4981_v52  ;;  %2616 = vst.msk [vmem:[#allocation2 + $0xb8] sm:$0xff] %vm405_vm0, %v4981_v52  ;;  %1492 = vperm.xlu0 %3573, %v4981_v52  }
 0x35e   : > { %v1225_v43 = vpop.xlane.xlu0 %1224 }
 0x35f   : > { %v4994_v56 = vmax.f32 %v4989_v49, %v1225_v43 }
 0x360   : > { %v1228_v44 = vpop.xlane.xlu1 %1227 }
 0x361   : > { %5971 = vst [vmem:[#allocation87_spill] sm:$0xff] %v4994_v56  ;;  %2617 = vst.msk [vmem:[#allocation2 + $0xc0] sm:$0xff] %vm405_vm0, %v4994_v56  ;;  %v4999_v47 = vmax.f32 %v4991_v46, %v1228_v44  ;;  %1497 = vperm.xlu1 %3574, %v4994_v56   ;;  %v5021_v46 = vld [vmem:[#allocation2 + $0xe0] sm:$0xff]  ;;  %v5026_v56 = vld [vmem:[#allocation2 + $0xe8] sm:$0xff] }
 0x363   : > { %5972 = vst [vmem:[#allocation88_spill] sm:$0xff] %v4999_v47  ;;  %2618 = vst.msk [vmem:[#allocation2 + $0xc8] sm:$0xff] %vm405_vm0, %v4999_v47  ;;  %1502 = vperm.xlu0 %3573, %v4999_v47  }
 0x366   : > { %v1231_v52 = vpop.xlane.xlu0 %1230 }
 0x367   : > { %v5010_v43 = vmax.f32 %v5005_v45, %v1231_v52  ;;  %v5977_v52 = vsub.f32 %v4744_v18, %v4753_v31  ;;  %v5979_v18 = vsub.f32 %v4755_v51, %v4764_v63  ;;  %v5054_v63 = vld [vmem:[#allocation2 + $0xf8] sm:$0xff] }
 0x368   : > { %v1234_v49 = vpop.xlane.xlu1 %1233 }
 0x369   : > { %5975 = vst [vmem:[#allocation91_spill] sm:$0xff] %v5010_v43  ;;  %2619 = vst.msk [vmem:[#allocation2 + $0xd0] sm:$0xff] %vm405_vm0, %v5010_v43  ;;  %v5015_v44 = vmax.f32 %v5007_v53, %v1234_v49  ;;  %1507 = vperm.xlu1 %3574, %v5010_v43   ;;  %v1313_v45 = vmul.f32 1.442695, %v5977_v52  ;;  %v5978_v49 = vsub.f32 %v4737_v13, %v4741_v11  ;;  %v1315_v31 = vmul.f32 1.442695, %v5979_v18 }
 0x36a   : > { %v5049_v13 = vld [vmem:[#allocation2 + $0xf0] sm:$0xff] }
 0x36b   : > { %5976 = vst [vmem:[#allocation92_spill] sm:$0xff] %v5015_v44  ;;  %2620 = vst.msk [vmem:[#allocation2 + $0xd8] sm:$0xff] %vm405_vm0, %v5015_v44  ;;  %1512 = vperm.xlu0 %3573, %v5015_v44   ;;  %v1311_v53 = vmul.f32 1.442695, %v5978_v49  ;;  %3623 = vpow2.f32 %v1313_v45  ;;  %v5981_v45 = vsub.f32 %v4779_v61, %v4790_v5  ;;  %v5983_v61 = vsub.f32 %v4807_v42, %v4814_v48 }
 0x36c   : > { %v5985_v42 = vsub.f32 %v4828_v38, %v4834_v10  ;;  %v5988_v38 = vsub.f32 %v4851_v33, %v4861_v32 }
 0x36d   : > { %3625 = vpow2.f32 %v1311_v53  ;;  %v5982_v53 = vsub.f32 %v4787_v55, %v4799_v36  ;;  %v1323_v5 = vmul.f32 1.442695, %v5983_v61  ;;  %v5984_v36 = vsub.f32 %v4811_v50, %v4821_v28 }
 0x36e   : > { %v1237_v47 = vpop.xlane.xlu0 %1236  ;;  %3627 = vpow2.f32 %v1315_v31  ;;  %v1327_v48 = vmul.f32 1.442695, %v5985_v42  ;;  %v5987_v50 = vsub.f32 %v4849_v3, %v4854_v25  ;;  %v5993_v42 = vsub.f32 %v4909_v12, %v4914_v2 }
 0x36f   : > { %v5029_v41 = vmax.f32 %v5021_v46, %v1237_v47  ;;  %v5980_v47 = vsub.f32 %v4767_v27, %v4776_v21  ;;  %v1321_v49 = vmul.f32 1.442695, %v5982_v53  ;;  %v1325_v31 = vmul.f32 1.442695, %v5984_v36 }
 0x370   : > { %v1240_v43 = vpop.xlane.xlu1 %1239  ;;  %v1333_v53 = vmul.f32 1.442695, %v5988_v38 }
 0x371   : > { %2621 = vst.msk [vmem:[#allocation2 + $0xe0] sm:$0xff] %vm405_vm0, %v5029_v41  ;;  %v5037_v44 = vmax.f32 %v5026_v56, %v1240_v43  ;;  %1517 = vperm.xlu1 %3574, %v5029_v41   ;;  %v1317_v11 = vmul.f32 1.442695, %v5980_v47  ;;  %v1319_v43 = vmul.f32 1.442695, %v5981_v45  ;;  %v5986_v45 = vsub.f32 %v4831_v57, %v4841_v23 }
 0x372   : > { %v5989_v57 = vsub.f32 %v4869_v30, %v4874_v17  ;;  %v5991_v17 = vsub.f32 %v4889_v20, %v4894_v9  ;;  %v5992_v9 = vsub.f32 %v4891_v16, %v4901_v15 }
 0x373   : > { %2622 = vst.msk [vmem:[#allocation2 + $0xe8] sm:$0xff] %vm405_vm0, %v5037_v44  ;;  %1522 = vperm.xlu0 %3573, %v5037_v44   ;;  %3629 = vpow2.f32 %v1317_v11 }
 0x374   : > { %3631 = vpow2.f32 %v1319_v43  ;;  %v1329_v43 = vmul.f32 1.442695, %v5986_v45  ;;  %v1335_v23 = vmul.f32 1.442695, %v5989_v57  ;;  %v1339_v30 = vmul.f32 1.442695, %v5991_v17 }
 0x375   : > { %v5076_v55 = vpop.eup %3623  ;;  %3633 = vpow2.f32 %v1321_v49  ;;  %v1341_v20 = vmul.f32 1.442695, %v5992_v9  ;;  %v5999_v17 = vld [vmem:[#allocation27_spill] sm:$0xff] }
 0x376   : > { %v1243_v52 = vpop.xlane.xlu0 %1242  ;;  %3635 = vpow2.f32 %v1323_v5 }
 0x377   : > { %v5057_v51 = vmax.f32 %v5049_v13, %v1243_v52  ;;  %v5082_v47 = vpop.eup %3625  ;;  %3637 = vpow2.f32 %v1325_v31  ;;  %v1331_v52 = vmul.f32 1.442695, %v5987_v50 }
 0x378   : > { %v1246_v27 = vpop.xlane.xlu1 %1245  ;;  %v5088_v11 = vpop.eup %3627  ;;  %3639 = vpow2.f32 %v1327_v48  ;;  %v1343_v48 = vmul.f32 1.442695, %v5993_v42  ;;  %v6004_v42 = vld [vmem:[#allocation87_spill] sm:$0xff] }
 0x379   : > { %2623 = vst.msk [vmem:[#allocation2 + $0xf0] sm:$0xff] %vm405_vm0, %v5057_v51  ;;  %v5065_v21 = vmax.f32 %v5054_v63, %v1246_v27  ;;  %1527 = vperm.xlu1 %3574, %v5057_v51   ;;  %3641 = vpow2.f32 %v1329_v43  ;;  %v5990_v27 = vsub.f32 %v4871_v24, %v4881_v22  ;;  %v5994_v43 = vsub.f32 %v4911_v7, %v4921_v6 }
 0x37a   : > { %3643 = vpow2.f32 %v1331_v52  ;;  %v5995_v52 = vsub.f32 %v4929_v4, %v4934_v60  ;;  %v5996_v6 = vsub.f32 %v4931_v1, %v4941_v0  ;;  %v5997_v0 = vsub.f32 %v4949_v62, %v4954_v54  ;;  %v6000_v62 = vld [vmem:[#allocation28_spill] sm:$0xff] }
 0x37b   : > { %2624 = vst.msk [vmem:[#allocation2 + $0xf8] sm:$0xff] %vm405_vm0, %v5065_v21  ;;  %1532 = vperm.xlu0 %3573, %v5065_v21   ;;  %v1337_v61 = vmul.f32 1.442695, %v5990_v27  ;;  %3645 = vpow2.f32 %v1333_v53  ;;  %v1345_v50 = vmul.f32 1.442695, %v5994_v43 }
 0x37c   : > { %3647 = vpow2.f32 %v1335_v23  ;;  %v1349_v60 = vmul.f32 1.442695, %v5996_v6  ;;  %v1351_v1 = vmul.f32 1.442695, %v5997_v0 }
 0x37d   : > { %2055 = vperm.xlu1 %3574, %v5076_v55   ;;  %v5094_v28 = vpop.eup %3629  ;;  %3649 = vpow2.f32 %v1337_v61 }
 0x37e   : > { %v5103_v49 = vpop.eup %3631  ;;  %3651 = vpow2.f32 %v1339_v30 }
 0x37f   : > { %2050 = vperm.xlu0 %3573, %v5082_v47   ;;  %v5116_v36 = vpop.eup %3633 }
 0x380   : > { %v1378_v10 = vpop.permute.xlu0 %1377 }
 0x381   : > { %2060 = vperm.xlu1 %3574, %v5088_v11   ;;  %v1535_v3 = vsub.f32 %v4509_v8, %v1378_v10  ;;  %v1536_v5 = vsub.f32 %v4511_v14, %v1378_v10  ;;  %v5122_v8 = vpop.eup %3635  ;;  %v1347_v10 = vmul.f32 1.442695, %v5995_v52  ;;  %v6007_v52 = vld [vmem:[#allocation86_spill] sm:$0xff] }
 0x382   : > { %v5125_v31 = vpop.eup %3637 }
 0x383   : > { %2065 = vperm.xlu0 %3573, %v5094_v28   ;;  %v5134_v45 = vpop.eup %3639 }
 0x384   : > { %v1383_v25 = vpop.permute.xlu1 %1382  ;;  %v5147_v53 = vpop.eup %3641 }
 0x385   : > { %v1537_v32 = vsub.f32 %v4513_v19, %v1383_v25  ;;  %v1538_v33 = vsub.f32 %v4517_v26, %v1383_v25  ;;  %2070 = vperm.xlu1 %3574, %v5103_v49   ;;  %v5998_v25 = vsub.f32 %v4951_v59, %v4961_v58 }
 0x387   : > { %v1599_v22 = vpack.c.bf16 %v1537_v32, %v1535_v3  ;;  %v1600_v24 = vpack.c.bf16 %v1538_v33, %v1536_v5  ;;  %2075 = vperm.xlu0 %3573, %v5116_v36   ;;  %v1353_v3 = vmul.f32 1.442695, %v5998_v25 }
 0x388   : > { %v1388_v14 = vpop.permute.xlu1 %1387 }
 0x389   : > { %v1632_v19 = vmul.bf16 1069105081, %v1599_v22  ;;  %v1635_v26 = vmul.bf16 1069105081, %v1600_v24  ;;  %2080 = vperm.xlu1 %3574, %v5122_v8   ;;  %v1539_v16 = vsub.f32 %v4521_v29, %v1388_v14  ;;  %v1540_v2 = vsub.f32 %v4523_v34, %v1388_v14  ;;  %v5153_v29 = vpop.eup %3643  ;;  %v6001_v24 = vld [vmem:[#allocation81_spill] sm:$0xff]  ;;  %v6002_v14 = vld [vmem:[#allocation83_spill] sm:$0xff] }
 0x38b   : > { %3653 = vpow.bf16 %v1632_v19  ;;  %2085 = vperm.xlu0 %3573, %v5125_v31   ;;  %v6003_v19 = vsub.f32 %v6001_v24, %v6002_v14  ;;  %v6015_v14 = vld [vmem:[#allocation31_spill] sm:$0xff] }
 0x38c   : > { %3655 = vpow.bf16 %v1635_v26  ;;  %v1393_v15 = vpop.permute.xlu1 %1392 }
 0x38d   : > { %v1541_v12 = vsub.f32 %v4525_v35, %v1393_v15  ;;  %v1542_v38 = vsub.f32 %v4529_v37, %v1393_v15  ;;  %2090 = vperm.xlu1 %3574, %v5134_v45   ;;  %3657 = vpow2.f32 %v1341_v20  ;;  %v5155_v35 = vpop.eup %3645  ;;  %v1355_v26 = vmul.f32 1.442695, %v6003_v19 }
 0x38e   : > { %3659 = vpow2.f32 %v1343_v48  ;;  %v5158_v23 = vpop.eup %3647  ;;  %v6005_v48 = vld [vmem:[#allocation85_spill] sm:$0xff] }
 0x38f   : > { %v1601_v7 = vpack.c.bf16 %v1541_v12, %v1539_v16  ;;  %v1602_v4 = vpack.c.bf16 %v1542_v38, %v1540_v2  ;;  %2095 = vperm.xlu0 %3573, %v5147_v53   ;;  %3661 = vpow2.f32 %v1345_v50  ;;  %v5163_v27 = vpop.eup %3649  ;;  %v1303_v43 = vsub.f32 %v6005_v48, %v6004_v42  ;;  %v6006_v50 = vld [vmem:[#allocation88_spill] sm:$0xff] }
 0x390   : > { %v1398_v34 = vpop.permute.xlu1 %1397  ;;  %3663 = vpow2.f32 %v1347_v10  ;;  %v5166_v61 = vpop.eup %3651  ;;  %v1304_v10 = vsub.f32 %v6007_v52, %v6006_v50 }
 0x391   : > { %v1638_v37 = vmul.bf16 1069105081, %v1601_v7  ;;  %v1641_v57 = vmul.bf16 1069105081, %v1602_v4  ;;  %2100 = vperm.xlu1 %3574, %v5153_v29   ;;  %3665 = vpow2.f32 %v1349_v60  ;;  %v1543_v32 = vsub.f32 %v4533_v39, %v1398_v34  ;;  %v6008_v7 = vld [vmem:[#allocation82_spill] sm:$0xff]  ;;  %v6009_v4 = vld [vmem:[#allocation84_spill] sm:$0xff] }
 0x392   : > { %v1544_v33 = vsub.f32 %v4535_v40, %v1398_v34  ;;  %v6010_v34 = vsub.f32 %v6008_v7, %v6009_v4 }
 0x393   : > { %3667 = vpow.bf16 %v1638_v37  ;;  %2105 = vperm.xlu0 %3573, %v5155_v35  }
 0x394   : > { %3669 = vpow.bf16 %v1641_v57  ;;  %v1403_v5 = vpop.permute.xlu1 %1402  ;;  %v1357_v37 = vmul.f32 1.442695, %v6010_v34 }
 0x395   : > { %v1545_v54 = vsub.f32 %v5999_v17, %v1403_v5  ;;  %v1546_v30 = vsub.f32 %v6000_v62, %v1403_v5  ;;  %2110 = vperm.xlu1 %3574, %v5158_v23   ;;  %3671 = vpow2.f32 %v1351_v1  ;;  %v1361_v5 = vmul.f32 1.442695, %v1304_v10  ;;  %v6013_v62 = vld [vmem:[#allocation29_spill] sm:$0xff] }
 0x396   : > { %v3654_v22 = vpop.eup %3653  ;;  %3673 = vpow2.f32 %v1353_v3  ;;  %v1359_v3 = vmul.f32 1.442695, %v1303_v43 }
 0x397   : > { %v3656_v58 = vpop.eup %3655  ;;  %v1603_v59 = vpack.c.bf16 %v1545_v54, %v1543_v32  ;;  %v1604_v9 = vpack.c.bf16 %v1546_v30, %v1544_v33  ;;  %2115 = vperm.xlu0 %3573, %v5163_v27   ;;  %v1729_v39 = vunpack.c.h.bf16 %v3654_v22  ;;  %v1727_v20 = vunpack.c.l.bf16 %v3654_v22  ;;  %v6011_v32 = vld [vmem:[#allocation91_spill] sm:$0xff]  ;;  %v6012_v33 = vld [vmem:[#allocation89_spill] sm:$0xff] }
 0x398   : > { %v5180_v40 = vpop.eup %3657  ;;  %2400 = vmatprep.mubr.bf16.mxu0 %v3656_v58  ;;  %v1408_v15 = vpop.permute.xlu1 %1407  ;;  %v1730_v16 = vunpack.c.h.bf16 %v3656_v58  ;;  %v1728_v2 = vunpack.c.l.bf16 %v3656_v58  ;;  %3675 = vpow2.f32 %v1355_v26  ;;  %v1305_v17 = vsub.f32 %v6012_v33, %v6011_v32  ;;  %v6016_v26 = vld [vmem:[#allocation32_spill] sm:$0xff] }
 0x399   : > { %v5186_v12 = vpop.eup %3659  ;;  %v1644_v38 = vmul.bf16 1069105081, %v1603_v59  ;;  %v1647_v6 = vmul.bf16 1069105081, %v1604_v9  ;;  %2401 = vmatmul.mubr.bf16.vlgmr.msra.gmra.mrb[16].mxu0 %v3654_v22  ;;  %2120 = vperm.xlu1 %3574, %v5166_v61   ;;  %v1547_v30 = vsub.f32 %v6013_v62, %v1408_v15  ;;  %v6014_v22 = vld [vmem:[#allocation30_spill] sm:$0xff]  ;;  %v6017_v9 = vld [vmem:[#allocation92_spill] sm:$0xff] }
 0x39a   : > { %v5189_v60 = vpop.eup %3661  ;;  %v5194_v57 = vadd.f32 %v1730_v16, %v1729_v39  ;;  %v5196_v0 = vadd.f32 %v1728_v2, %v1727_v20  ;;  %v1548_v24 = vsub.f32 %v6014_v22, %v1408_v15  ;;  %v6018_v39 = vld [vmem:[#allocation90_spill] sm:$0xff]  ;;  %v1307_v15 = vsub.f32 %v5021_v46, %v5029_v41 }
 0x39b   : > { %v5198_v1 = vpop.eup %3663  ;;  %3677 = vpow.bf16 %v1644_v38  ;;  %2125 = vperm.xlu0 %3573, %v5180_v40   ;;  %v1306_v20 = vsub.f32 %v6018_v39, %v6017_v9  ;;  %v6020_v46 = vld [vmem:[#allocation34_spill] sm:$0xff]  ;;  %v1309_v9 = vsub.f32 %v5049_v13, %v5057_v51 }
 0x39c   : > { %v5201_v25 = vpop.eup %3665  ;;  %3679 = vpow.bf16 %v1647_v6  ;;  %v1413_v54 = vpop.permute.xlu1 %1412  ;;  %v1363_v6 = vmul.f32 1.442695, %v1305_v17 }
 0x39d   : > { %v1549_v19 = vsub.f32 %v6015_v14, %v1413_v54  ;;  %v1550_v58 = vsub.f32 %v6016_v26, %v1413_v54  ;;  %2130 = vperm.xlu1 %3574, %v5186_v12   ;;  %3681 = vpow2.f32 %v1357_v37  ;;  %v1365_v34 = vmul.f32 1.442695, %v1306_v20  ;;  %v6019_v37 = vld [vmem:[#allocation33_spill] sm:$0xff] }
 0x39e   : > { %v3668_v59 = vpop.eup %3667  ;;  %3683 = vpow2.f32 %v1359_v3  ;;  %v1367_v14 = vmul.f32 1.442695, %v1307_v15  ;;  %v1371_v51 = vmul.f32 1.442695, %v1309_v9 }
 0x39f   : > { %v3670_v42 = vpop.eup %3669  ;;  %v1605_v48 = vpack.c.bf16 %v1549_v19, %v1547_v30  ;;  %v1606_v43 = vpack.c.bf16 %v1550_v58, %v1548_v24  ;;  %2135 = vperm.xlu0 %3573, %v5189_v60   ;;  %v1731_v50 = vunpack.c.l.bf16 %v3668_v59  ;;  %v1733_v52 = vunpack.c.h.bf16 %v3668_v59  ;;  %v6022_v30 = vld [vmem:[#allocation36_spill] sm:$0xff] }
 0x3a0   : > { %v5213_v10 = vpop.eup %3671  ;;  %2408 = vmatprep.mubr.bf16.mxu0 %v3670_v42  ;;  %v1418_v16 = vpop.permute.xlu1 %1417  ;;  %v1732_v2 = vunpack.c.l.bf16 %v3670_v42  ;;  %v1734_v38 = vunpack.c.h.bf16 %v3670_v42  ;;  %3685 = vpow2.f32 %v1361_v5  ;;  %v6021_v5 = vld [vmem:[#allocation35_spill] sm:$0xff]  ;;  %v1308_v19 = vsub.f32 %v5026_v56, %v5037_v44 }
 0x3a1   : > { %v1650_v7 = vmul.bf16 1069105081, %v1605_v48  ;;  %v1653_v4 = vmul.bf16 1069105081, %v1606_v43  ;;  %2409 = vmatmul.mubr.bf16.gmra.mrb[20].mxu0 %v3668_v59  ;;  %2140 = vperm.xlu1 %3574, %v5198_v1   ;;  %v1551_v32 = vsub.f32 %v6019_v37, %v1418_v16  ;;  %v5223_v41 = vpop.eup %3673  ;;  %v1552_v62 = vsub.f32 %v6020_v46, %v1418_v16  ;;  %v6027_v46 = vld [vmem:[#allocation40_spill] sm:$0xff] }
 0x3a2   : > { %v1423_v33 = vpop.permute.xlu0 %1422  ;;  %v5219_v54 = vadd.f32 %v1732_v2, %v1731_v50  ;;  %v5221_v3 = vadd.f32 %v1734_v38, %v1733_v52  ;;  %v5229_v24 = vpop.eup %3675  ;;  %v1369_v56 = vmul.f32 1.442695, %v1308_v19 }
 0x3a3   : > { %3687 = vpow.bf16 %v1650_v7  ;;  %v1553_v17 = vsub.f32 %v6021_v5, %v1423_v33  ;;  %v1554_v22 = vsub.f32 %v6022_v30, %v1423_v33  ;;  %2145 = vperm.xlu0 %3573, %v5201_v25   ;;  %v6024_v7 = vld [vmem:[#allocation37_spill] sm:$0xff] }
 0x3a4   : > { %3689 = vpow.bf16 %v1653_v4 }
 0x3a5   : > { %3691 = vpow2.f32 %v1363_v6  ;;  %v1607_v26 = vpack.c.bf16 %v1553_v17, %v1551_v32  ;;  %v1608_v58 = vpack.c.bf16 %v1554_v22, %v1552_v62  ;;  %2150 = vperm.xlu1 %3574, %v5213_v10   ;;  %v6026_v32 = vld [vmem:[#allocation39_spill] sm:$0xff] }
 0x3a6   : > { %v3678_v59 = vpop.eup %3677  ;;  %3693 = vpow2.f32 %v1365_v34  ;;  %v6025_v34 = vld [vmem:[#allocation38_spill] sm:$0xff] }
 0x3a7   : > { %v3680_v39 = vpop.eup %3679  ;;  %v1656_v20 = vmul.bf16 1069105081, %v1607_v26  ;;  %v1659_v42 = vmul.bf16 1069105081, %v1608_v58  ;;  %2155 = vperm.xlu0 %3573, %v5223_v41   ;;  %v1735_v48 = vunpack.c.l.bf16 %v3678_v59  ;;  %v1737_v43 = vunpack.c.h.bf16 %v3678_v59 }
 0x3a8   : > { %v5237_v50 = vpop.eup %3681  ;;  %3695 = vpow2.f32 %v1367_v14  ;;  %2416 = vmatprep.mubr.bf16.mxu0 %v3680_v39  ;;  %v1428_v44 = vpop.permute.xlu1 %1427  ;;  %v1736_v52 = vunpack.c.l.bf16 %v3680_v39  ;;  %v1738_v15 = vunpack.c.h.bf16 %v3680_v39 }
 0x3a9   : > { %3697 = vpow.bf16 %v1656_v20  ;;  %2417 = vmatmul.mubr.bf16.gmra.mrb[24].mxu0 %v3678_v59  ;;  %2160 = vperm.xlu1 %3574, %v5229_v24   ;;  %v5240_v13 = vpop.eup %3683  ;;  %v1555_v4 = vsub.f32 %v6024_v7, %v1428_v44  ;;  %v1556_v37 = vsub.f32 %v6025_v34, %v1428_v44  ;;  %v6033_v7 = vld [vmem:[#allocation43_spill] sm:$0xff]  ;;  %v6034_v34 = vld [vmem:[#allocation44_spill] sm:$0xff] }
 0x3aa   : > { %3699 = vpow.bf16 %v1659_v42  ;;  %v1433_v16 = vpop.permute.xlu0 %1432  ;;  %v5242_v2 = vadd.f32 %v1736_v52, %v1735_v48  ;;  %v5244_v38 = vadd.f32 %v1738_v15, %v1737_v43  ;;  %v5246_v6 = vpop.eup %3685  ;;  %v6031_v52 = vld [vmem:[#allocation41_spill] sm:$0xff] }
 0x3ab   : > { %6023 = vst [vmem:[#allocation27_spill] sm:$0xff] %v5246_v6  ;;  %v1557_v33 = vsub.f32 %v6026_v32, %v1433_v16  ;;  %v1558_v62 = vsub.f32 %v6027_v46, %v1433_v16  ;;  %2165 = vperm.xlu0 %3573, %v5237_v50   ;;  %3701 = vpow2.f32 %v1369_v56 }
 0x3ac   : > { %3703 = vpow2.f32 %v1371_v51  ;;  %v6032_v51 = vld [vmem:[#allocation42_spill] sm:$0xff] }
 0x3ad   : > { %v1609_v5 = vpack.c.bf16 %v1557_v33, %v1555_v4  ;;  %v1610_v17 = vpack.c.bf16 %v1558_v62, %v1556_v37  ;;  %2170 = vperm.xlu1 %3574, %v5240_v13  }
 0x3ae   : > { %v3688_v30 = vpop.eup %3687 }
 0x3af   : > { %v3690_v22 = vpop.eup %3689  ;;  %v1662_v19 = vmul.bf16 1069105081, %v1609_v5  ;;  %v1665_v26 = vmul.bf16 1069105081, %v1610_v17  ;;  %2175 = vperm.xlu0 %3573, %v5246_v6   ;;  %v1739_v58 = vunpack.c.l.bf16 %v3688_v30  ;;  %v1741_v59 = vunpack.c.h.bf16 %v3688_v30 }
 0x3b0   : > { %v5254_v14 = vpop.eup %3691  ;;  %2424 = vmatprep.mubr.bf16.mxu0 %v3690_v22  ;;  %v1438_v39 = vpop.permute.xlu1 %1437  ;;  %v1740_v20 = vunpack.c.l.bf16 %v3690_v22  ;;  %v1742_v42 = vunpack.c.h.bf16 %v3690_v22 }
 0x3b1   : > { %6028 = vst [vmem:[#allocation28_spill] sm:$0xff] %v5254_v14  ;;  %v5257_v9 = vpop.eup %3693  ;;  %3705 = vpow.bf16 %v1662_v19  ;;  %2425 = vmatmul.mubr.bf16.gmra.mrb[28].mxu0 %v3688_v30  ;;  %2180 = vperm.xlu1 %3574, %v5254_v14   ;;  %v1559_v15 = vsub.f32 %v6031_v52, %v1438_v39  ;;  %v1560_v16 = vsub.f32 %v6032_v51, %v1438_v39  ;;  %v6037_v52 = vld [vmem:[#allocation45_spill] sm:$0xff]  ;;  %v6038_v51 = vld [vmem:[#allocation46_spill] sm:$0xff] }
 0x3b2   : > { %6029 = vst [vmem:[#allocation81_spill] sm:$0xff] %v5257_v9  ;;  %v5260_v48 = vpop.eup %3695  ;;  %3707 = vpow.bf16 %v1665_v26  ;;  %v1443_v43 = vpop.permute.xlu0 %1442  ;;  %v5262_v56 = vadd.f32 %v1740_v20, %v1739_v58  ;;  %v5264_v44 = vadd.f32 %v1742_v42, %v1741_v59 }
 0x3b3   : > { %6030 = vst [vmem:[#allocation83_spill] sm:$0xff] %v5260_v48  ;;  %v1561_v4 = vsub.f32 %v6033_v7, %v1443_v43  ;;  %v1562_v37 = vsub.f32 %v6034_v34, %v1443_v43  ;;  %2185 = vperm.xlu0 %3573, %v5257_v9   ;;  %v6039_v7 = vld [vmem:[#allocation47_spill] sm:$0xff]  ;;  %v6040_v34 = vld [vmem:[#allocation48_spill] sm:$0xff] }
 0x3b4   : > { %v3698_v32 = vpop.eup %3697 }
 0x3b5   : > { %v3700_v33 = vpop.eup %3699  ;;  %v1611_v46 = vpack.c.bf16 %v1561_v4, %v1559_v15  ;;  %v1612_v62 = vpack.c.bf16 %v1562_v37, %v1560_v16  ;;  %2190 = vperm.xlu1 %3574, %v5260_v48   ;;  %v1743_v5 = vunpack.c.l.bf16 %v3698_v32  ;;  %v1745_v17 = vunpack.c.h.bf16 %v3698_v32 }
 0x3b6   : > { %v5272_v30 = vpop.eup %3701  ;;  %2432 = vmatprep.mubr.bf16.mxu0 %v3700_v33  ;;  %v1744_v22 = vunpack.c.l.bf16 %v3700_v33  ;;  %v1746_v19 = vunpack.c.h.bf16 %v3700_v33 }
 0x3b7   : > { %6035 = vst [vmem:[#allocation87_spill] sm:$0xff] %v5272_v30  ;;  %v1668_v26 = vmul.bf16 1069105081, %v1611_v46  ;;  %v1671_v58 = vmul.bf16 1069105081, %v1612_v62  ;;  %2195 = vperm.xlu0 %3573, %v5272_v30   ;;  %v5275_v59 = vpop.eup %3703 }
 0x3b8   : > { %6036 = vst [vmem:[#allocation85_spill] sm:$0xff] %v5275_v59  ;;  %v1448_v39 = vpop.permute.xlu1 %1447  ;;  %v5277_v20 = vadd.f32 %v1744_v22, %v1743_v5  ;;  %v5279_v42 = vadd.f32 %v1746_v19, %v1745_v17 }
 0x3b9   : > { %3709 = vpow.bf16 %v1668_v26  ;;  %2433 = vmatmul.mubr.bf16.gmra.mrb[32].mxu0 %v3698_v32  ;;  %2200 = vperm.xlu1 %3574, %v5275_v59   ;;  %v1563_v15 = vsub.f32 %v6037_v52, %v1448_v39  ;;  %v1564_v16 = vsub.f32 %v6038_v51, %v1448_v39 }
 0x3ba   : > { %3711 = vpow.bf16 %v1671_v58  ;;  %v1453_v43 = vpop.permute.xlu0 %1452 }
 0x3bb   : > { %v1565_v4 = vsub.f32 %v6039_v7, %v1453_v43  ;;  %v1566_v37 = vsub.f32 %v6040_v34, %v1453_v43  ;;  %v6041_v43 = vld [vmem:[#allocation49_spill] sm:$0xff]  ;;  %v6043_v7 = vld [vmem:[#allocation51_spill] sm:$0xff]  ;;  %v6044_v34 = vld [vmem:[#allocation52_spill] sm:$0xff] }
 0x3bc   : > { %v3706_v33 = vpop.eup %3705 }
 0x3bd   : > { %v3708_v46 = vpop.eup %3707  ;;  %v1613_v62 = vpack.c.bf16 %v1565_v4, %v1563_v15  ;;  %v1614_v5 = vpack.c.bf16 %v1566_v37, %v1564_v16  ;;  %v1747_v17 = vunpack.c.l.bf16 %v3706_v33  ;;  %v1749_v22 = vunpack.c.h.bf16 %v3706_v33  ;;  %v6042_v15 = vld [vmem:[#allocation50_spill] sm:$0xff] }
 0x3be   : > { %2440 = vmatprep.mubr.bf16.mxu0 %v3708_v46  ;;  %v1748_v32 = vunpack.c.l.bf16 %v3708_v46  ;;  %v1750_v19 = vunpack.c.h.bf16 %v3708_v46 }
 0x3bf   : > { %v1674_v26 = vmul.bf16 1069105081, %v1613_v62  ;;  %v1677_v58 = vmul.bf16 1069105081, %v1614_v5 }
 0x3c0   : > { %v1458_v18 = vpop.permute.xlu1 %1457  ;;  %v5286_v30 = vadd.f32 %v1748_v32, %v1747_v17  ;;  %v5288_v52 = vadd.f32 %v1750_v19, %v1749_v22 }
 0x3c1   : > { %3713 = vpow.bf16 %v1674_v26  ;;  %2441 = vmatmul.mubr.bf16.gmra.mrb[36].mxu0 %v3706_v33  ;;  %v1567_v51 = vsub.f32 %v6041_v43, %v1458_v18  ;;  %v1568_v16 = vsub.f32 %v6042_v15, %v1458_v18 }
 0x3c2   : > { %3715 = vpow.bf16 %v1677_v58  ;;  %v1463_v39 = vpop.permute.xlu0 %1462 }
 0x3c3   : > { %v1569_v4 = vsub.f32 %v6043_v7, %v1463_v39  ;;  %v1570_v37 = vsub.f32 %v6044_v34, %v1463_v39  ;;  %v6045_v39 = vld [vmem:[#allocation53_spill] sm:$0xff]  ;;  %v6047_v7 = vld [vmem:[#allocation55_spill] sm:$0xff]  ;;  %v6048_v34 = vld [vmem:[#allocation56_spill] sm:$0xff] }
 0x3c4   : > { %v3710_v46 = vpop.eup %3709 }
 0x3c5   : > { %v3712_v62 = vpop.eup %3711  ;;  %v1615_v5 = vpack.c.bf16 %v1569_v4, %v1567_v51  ;;  %v1616_v59 = vpack.c.bf16 %v1570_v37, %v1568_v16  ;;  %v1751_v17 = vunpack.c.l.bf16 %v3710_v46  ;;  %v1753_v32 = vunpack.c.h.bf16 %v3710_v46  ;;  %v6046_v51 = vld [vmem:[#allocation54_spill] sm:$0xff] }
 0x3c6   : > { %2448 = vmatprep.mubr.bf16.mxu0 %v3712_v62  ;;  %v1752_v22 = vunpack.c.l.bf16 %v3712_v62  ;;  %v1754_v19 = vunpack.c.h.bf16 %v3712_v62 }
 0x3c7   : > { %v1680_v33 = vmul.bf16 1069105081, %v1615_v5  ;;  %v1683_v26 = vmul.bf16 1069105081, %v1616_v59 }
 0x3c8   : > { %v1468_v58 = vpop.permute.xlu1 %1467  ;;  %v5294_v9 = vadd.f32 %v1752_v22, %v1751_v17  ;;  %v5296_v43 = vadd.f32 %v1754_v19, %v1753_v32 }
 0x3c9   : > { %3717 = vpow.bf16 %v1680_v33  ;;  %2449 = vmatmul.mubr.bf16.gmra.mrb[40].mxu0 %v3710_v46  ;;  %v1571_v15 = vsub.f32 %v6045_v39, %v1468_v58  ;;  %v1572_v16 = vsub.f32 %v6046_v51, %v1468_v58 }
 0x3ca   : > { %3719 = vpow.bf16 %v1683_v26  ;;  %v1473_v18 = vpop.permute.xlu0 %1472 }
 0x3cb   : > { %v1573_v4 = vsub.f32 %v6047_v7, %v1473_v18  ;;  %v1574_v37 = vsub.f32 %v6048_v34, %v1473_v18  ;;  %v6049_v18 = vld [vmem:[#allocation57_spill] sm:$0xff]  ;;  %v6051_v7 = vld [vmem:[#allocation59_spill] sm:$0xff]  ;;  %v6052_v34 = vld [vmem:[#allocation60_spill] sm:$0xff] }
 0x3cc   : > { %v3714_v62 = vpop.eup %3713 }
 0x3cd   : > { %v3716_v5 = vpop.eup %3715  ;;  %v1617_v59 = vpack.c.bf16 %v1573_v4, %v1571_v15  ;;  %v1618_v48 = vpack.c.bf16 %v1574_v37, %v1572_v16  ;;  %v1755_v17 = vunpack.c.l.bf16 %v3714_v62  ;;  %v1757_v22 = vunpack.c.h.bf16 %v3714_v62  ;;  %v6050_v15 = vld [vmem:[#allocation58_spill] sm:$0xff] }
 0x3ce   : > { %2456 = vmatprep.mubr.bf16.mxu0 %v3716_v5  ;;  %v1756_v32 = vunpack.c.l.bf16 %v3716_v5  ;;  %v1758_v19 = vunpack.c.h.bf16 %v3716_v5 }
 0x3cf   : > { %v1686_v46 = vmul.bf16 1069105081, %v1617_v59  ;;  %v1689_v33 = vmul.bf16 1069105081, %v1618_v48 }
 0x3d0   : > { %v1478_v26 = vpop.permute.xlu1 %1477  ;;  %v5302_v6 = vadd.f32 %v1756_v32, %v1755_v17  ;;  %v5304_v39 = vadd.f32 %v1758_v19, %v1757_v22 }
 0x3d1   : > { %3721 = vpow.bf16 %v1686_v46  ;;  %2457 = vmatmul.mubr.bf16.gmra.mrb[44].mxu0 %v3714_v62  ;;  %v1575_v51 = vsub.f32 %v6049_v18, %v1478_v26  ;;  %v1576_v16 = vsub.f32 %v6050_v15, %v1478_v26 }
 0x3d2   : > { %3723 = vpow.bf16 %v1689_v33  ;;  %v1483_v58 = vpop.permute.xlu0 %1482 }
 0x3d3   : > { %v1577_v4 = vsub.f32 %v6051_v7, %v1483_v58  ;;  %v1578_v37 = vsub.f32 %v6052_v34, %v1483_v58  ;;  %v6056_v34 = vld [vmem:[#allocation64_spill] sm:$0xff] }
 0x3d4   : > { %v3718_v5 = vpop.eup %3717 }
 0x3d5   : > { %v3720_v59 = vpop.eup %3719  ;;  %v1619_v48 = vpack.c.bf16 %v1577_v4, %v1575_v51  ;;  %v1620_v14 = vpack.c.bf16 %v1578_v37, %v1576_v16  ;;  %v1759_v17 = vunpack.c.l.bf16 %v3718_v5  ;;  %v1761_v32 = vunpack.c.h.bf16 %v3718_v5  ;;  %v6053_v51 = vld [vmem:[#allocation61_spill] sm:$0xff]  ;;  %v6054_v16 = vld [vmem:[#allocation62_spill] sm:$0xff] }
 0x3d6   : > { %2464 = vmatprep.mubr.bf16.mxu0 %v3720_v59  ;;  %1795 = vadd.xlane.f32.xlu0 %v5194_v57  ;;  %v1760_v62 = vunpack.c.l.bf16 %v3720_v59  ;;  %v1762_v22 = vunpack.c.h.bf16 %v3720_v59  ;;  %v6055_v57 = vld [vmem:[#allocation63_spill] sm:$0xff] }
 0x3d7   : > { %v1692_v19 = vmul.bf16 1069105081, %v1619_v48  ;;  %v1695_v46 = vmul.bf16 1069105081, %v1620_v14 }
 0x3d8   : > { %v1488_v33 = vpop.permute.xlu1 %1487  ;;  %v5311_v18 = vadd.f32 %v1760_v62, %v1759_v17  ;;  %v5313_v26 = vadd.f32 %v1762_v22, %v1761_v32 }
 0x3d9   : > { %3725 = vpow.bf16 %v1692_v19  ;;  %2465 = vmatmul.mubr.bf16.gmra.mrb[48].mxu0 %v3718_v5  ;;  %v1579_v15 = vsub.f32 %v6053_v51, %v1488_v33  ;;  %v1580_v7 = vsub.f32 %v6054_v16, %v1488_v33 }
 0x3da   : > { %3727 = vpow.bf16 %v1695_v46  ;;  %v1493_v58 = vpop.permute.xlu0 %1492  ;;  %1798 = vadd.xlane.f32.xlu0 %v5219_v54 }
 0x3db   : > { %v1581_v4 = vsub.f32 %v6055_v57, %v1493_v58  ;;  %v1582_v37 = vsub.f32 %v6056_v34, %v1493_v58  ;;  %v6057_v58 = vld [vmem:[#allocation65_spill] sm:$0xff] }
 0x3dc   : > { %v3722_v14 = vpop.eup %3721 }
 0x3dd   : > { %v3724_v59 = vpop.eup %3723  ;;  %v1621_v48 = vpack.c.bf16 %v1581_v4, %v1579_v15  ;;  %v1622_v17 = vpack.c.bf16 %v1582_v37, %v1580_v7  ;;  %1792 = vadd.xlane.f32.xlu1 %v5196_v0  ;;  %v1763_v32 = vunpack.c.l.bf16 %v3722_v14  ;;  %v1765_v5 = vunpack.c.h.bf16 %v3722_v14  ;;  %v6059_v7 = vld [vmem:[#allocation67_spill] sm:$0xff]  ;;  %v6060_v4 = vld [vmem:[#allocation68_spill] sm:$0xff] }
 0x3de   : > { %2472 = vmatprep.mubr.bf16.mxu0 %v3724_v59  ;;  %1804 = vadd.xlane.f32.xlu0 %v5242_v2  ;;  %v1764_v54 = vunpack.c.l.bf16 %v3724_v59  ;;  %v1766_v62 = vunpack.c.h.bf16 %v3724_v59  ;;  %v6058_v2 = vld [vmem:[#allocation66_spill] sm:$0xff] }
 0x3df   : > { %v1698_v22 = vmul.bf16 1069105081, %v1621_v48  ;;  %v1701_v19 = vmul.bf16 1069105081, %v1622_v17 }
 0x3e0   : > { %v1498_v46 = vpop.permute.xlu1 %1497  ;;  %v5322_v33 = vadd.f32 %v1764_v54, %v1763_v32  ;;  %v5324_v51 = vadd.f32 %v1766_v62, %v1765_v5 }
 0x3e1   : > { %3729 = vpow.bf16 %v1698_v22  ;;  %2473 = vmatmul.mubr.bf16.gmra.mrb[52].mxu0 %v3722_v14  ;;  %1801 = vadd.xlane.f32.xlu1 %v5221_v3  ;;  %v1583_v15 = vsub.f32 %v6057_v58, %v1498_v46  ;;  %v1584_v16 = vsub.f32 %v6058_v2, %v1498_v46  ;;  %v6061_v46 = vld [vmem:[#allocation69_spill] sm:$0xff] }
 0x3e2   : > { %3731 = vpow.bf16 %v1701_v19  ;;  %v1503_v0 = vpop.permute.xlu0 %1502  ;;  %1810 = vadd.xlane.f32.xlu0 %v5262_v56 }
 0x3e3   : > { %v1585_v57 = vsub.f32 %v6059_v7, %v1503_v0  ;;  %v1586_v34 = vsub.f32 %v6060_v4, %v1503_v0 }
 0x3e4   : > { %v3726_v37 = vpop.eup %3725 }
 0x3e5   : > { %v3728_v59 = vpop.eup %3727  ;;  %v1623_v48 = vpack.c.bf16 %v1585_v57, %v1583_v15  ;;  %v1624_v17 = vpack.c.bf16 %v1586_v34, %v1584_v16  ;;  %1807 = vadd.xlane.f32.xlu1 %v5244_v38  ;;  %v1767_v14 = vunpack.c.l.bf16 %v3726_v37  ;;  %v1769_v3 = vunpack.c.h.bf16 %v3726_v37  ;;  %v6063_v15 = vld [vmem:[#allocation71_spill] sm:$0xff]  ;;  %v6064_v16 = vld [vmem:[#allocation72_spill] sm:$0xff] }
 0x3e6   : > { %2480 = vmatprep.mubr.bf16.mxu0 %v3728_v59  ;;  %1816 = vadd.xlane.f32.xlu0 %v5277_v20  ;;  %v1768_v56 = vunpack.c.l.bf16 %v3728_v59  ;;  %v1770_v32 = vunpack.c.h.bf16 %v3728_v59  ;;  %v6062_v20 = vld [vmem:[#allocation70_spill] sm:$0xff] }
 0x3e7   : > { %v1704_v5 = vmul.bf16 1069105081, %v1623_v48  ;;  %v1707_v54 = vmul.bf16 1069105081, %v1624_v17 }
 0x3e8   : > { %v1508_v62 = vpop.permute.xlu1 %1507  ;;  %v5334_v22 = vadd.f32 %v1768_v56, %v1767_v14  ;;  %v5336_v19 = vadd.f32 %v1770_v32, %v1769_v3 }
 0x3e9   : > { %3733 = vpow.bf16 %v1704_v5  ;;  %2481 = vmatmul.mubr.bf16.gmra.mrb[56].mxu0 %v3726_v37  ;;  %1813 = vadd.xlane.f32.xlu1 %v5264_v44  ;;  %v1587_v0 = vsub.f32 %v6061_v46, %v1508_v62  ;;  %v1588_v58 = vsub.f32 %v6062_v20, %v1508_v62  ;;  %v6066_v62 = vld [vmem:[#allocation74_spill] sm:$0xff] }
 0x3ea   : > { %3735 = vpow.bf16 %v1707_v54  ;;  %v1513_v38 = vpop.permute.xlu0 %1512  ;;  %1822 = vadd.xlane.f32.xlu0 %v5286_v30 }
 0x3eb   : > { %v1589_v2 = vsub.f32 %v6063_v15, %v1513_v38  ;;  %v1590_v7 = vsub.f32 %v6064_v16, %v1513_v38  ;;  %v6067_v38 = vld [vmem:[#allocation75_spill] sm:$0xff] }
 0x3ec   : > { %v3730_v57 = vpop.eup %3729 }
 0x3ed   : > { %v3732_v4 = vpop.eup %3731  ;;  %v1625_v34 = vpack.c.bf16 %v1589_v2, %v1587_v0  ;;  %v1626_v59 = vpack.c.bf16 %v1590_v7, %v1588_v58  ;;  %1819 = vadd.xlane.f32.xlu1 %v5279_v42  ;;  %v1771_v37 = vunpack.c.l.bf16 %v3730_v57  ;;  %v1773_v44 = vunpack.c.h.bf16 %v3730_v57  ;;  %v6065_v42 = vld [vmem:[#allocation73_spill] sm:$0xff]  ;;  %v6068_v0 = vld [vmem:[#allocation76_spill] sm:$0xff] }
 0x3ee   : > { %2488 = vmatprep.mubr.bf16.mxu0 %v3732_v4  ;;  %1828 = vadd.xlane.f32.xlu0 %v5294_v9  ;;  %v1772_v30 = vunpack.c.l.bf16 %v3732_v4  ;;  %v1774_v48 = vunpack.c.h.bf16 %v3732_v4 }
 0x3ef   : > { %v1710_v17 = vmul.bf16 1069105081, %v1625_v34  ;;  %v1713_v14 = vmul.bf16 1069105081, %v1626_v59 }
 0x3f0   : > { %v1518_v3 = vpop.permute.xlu1 %1517  ;;  %v1857_v56 = vadd.f32 %v1772_v30, %v1771_v37  ;;  %v5346_v32 = vadd.f32 %v1774_v48, %v1773_v44 }
 0x3f1   : > { %3737 = vpow.bf16 %v1710_v17  ;;  %2489 = vmatmul.mubr.bf16.gmra.mrb[60].mxu0 %v3730_v57  ;;  %1825 = vadd.xlane.f32.xlu1 %v5288_v52  ;;  %v1591_v54 = vsub.f32 %v6065_v42, %v1518_v3  ;;  %v1592_v9 = vsub.f32 %v6066_v62, %v1518_v3  ;;  %v6070_v17 = vld [vmem:[#allocation78_spill] sm:$0xff] }
 0x3f2   : > { %3739 = vpow.bf16 %v1713_v14  ;;  %v1523_v5 = vpop.permute.xlu0 %1522  ;;  %1834 = vadd.xlane.f32.xlu0 %v5302_v6 }
 0x3f3   : > { %v1593_v46 = vsub.f32 %v6067_v38, %v1523_v5  ;;  %v1594_v20 = vsub.f32 %v6068_v0, %v1523_v5  ;;  %v6072_v5 = vld [vmem:[#allocation80_spill] sm:$0xff] }
 0x3f4   : > { %v3734_v58 = vpop.eup %3733 }
 0x3f5   : > { %v3736_v15 = vpop.eup %3735  ;;  %v1627_v2 = vpack.c.bf16 %v1593_v46, %v1591_v54  ;;  %v1628_v16 = vpack.c.bf16 %v1594_v20, %v1592_v9  ;;  %1831 = vadd.xlane.f32.xlu1 %v5296_v43  ;;  %v1775_v7 = vunpack.c.l.bf16 %v3734_v58  ;;  %v1777_v52 = vunpack.c.h.bf16 %v3734_v58  ;;  %v6069_v43 = vld [vmem:[#allocation77_spill] sm:$0xff] }
 0x3f6   : > { %2496 = vmatprep.mubr.bf16.mxu0 %v3736_v15  ;;  %1840 = vadd.xlane.f32.xlu0 %v5311_v18  ;;  %v1776_v6 = vunpack.c.l.bf16 %v3736_v15  ;;  %v1778_v57 = vunpack.c.h.bf16 %v3736_v15  ;;  %v6071_v18 = vld [vmem:[#allocation79_spill] sm:$0xff] }
 0x3f7   : > { %v1716_v4 = vmul.bf16 1069105081, %v1627_v2  ;;  %v1719_v34 = vmul.bf16 1069105081, %v1628_v16 }
 0x3f8   : > { %v1528_v59 = vpop.permute.xlu1 %1527  ;;  %v1863_v37 = vadd.f32 %v1776_v6, %v1775_v7  ;;  %v1866_v44 = vadd.f32 %v1778_v57, %v1777_v52 }
 0x3f9   : > { %3741 = vpow.bf16 %v1716_v4  ;;  %2497 = vmatmul.mubr.bf16.gmra.mrb[64].mxu0 %v3734_v58  ;;  %1837 = vadd.xlane.f32.xlu1 %v5304_v39  ;;  %v1595_v48 = vsub.f32 %v6069_v43, %v1528_v59  ;;  %v1596_v14 = vsub.f32 %v6070_v17, %v1528_v59 }
 0x3fa   : > { %3743 = vpow.bf16 %v1719_v34  ;;  %v1533_v30 = vpop.permute.xlu0 %1532  ;;  %1846 = vadd.xlane.f32.xlu0 %v5322_v33 }
 0x3fb   : > { %v1597_v3 = vsub.f32 %v6071_v18, %v1533_v30  ;;  %v1598_v42 = vsub.f32 %v6072_v5, %v1533_v30 }
 0x3fc   : > { %v3738_v54 = vpop.eup %3737 }
 0x3fd   : > { %v3740_v62 = vpop.eup %3739  ;;  %v1629_v9 = vpack.c.bf16 %v1597_v3, %v1595_v48  ;;  %v1630_v38 = vpack.c.bf16 %v1598_v42, %v1596_v14  ;;  %1843 = vadd.xlane.f32.xlu1 %v5313_v26  ;;  %v1779_v46 = vunpack.c.l.bf16 %v3738_v54  ;;  %v1781_v33 = vunpack.c.h.bf16 %v3738_v54 }
 0x3fe   : > { %2504 = vmatprep.mubr.bf16.mxu0 %v3740_v62  ;;  %1852 = vadd.xlane.f32.xlu0 %v5334_v22  ;;  %v1780_v39 = vunpack.c.l.bf16 %v3740_v62  ;;  %v1782_v0 = vunpack.c.h.bf16 %v3740_v62  ;;  %v5367_v34 = vpop.permute.xlu0 %2050 }
 0x3ff   : > { %v1722_v20 = vmul.bf16 1069105081, %v1629_v9  ;;  %v1725_v58 = vmul.bf16 1069105081, %v1630_v38 }
 0x400   : > { %v1869_v15 = vadd.f32 %v1780_v39, %v1779_v46  ;;  %v1872_v2 = vadd.f32 %v1782_v0, %v1781_v33 }
 0x401   : > { %3745 = vpow.bf16 %v1722_v20  ;;  %2505 = vmatmul.mubr.bf16.gmra.mrb[68].mxu0 %v3738_v54  ;;  %1849 = vadd.xlane.f32.xlu1 %v5324_v51 }
 0x402   : > { %3747 = vpow.bf16 %v1725_v58  ;;  %1858 = vadd.xlane.f32.xlu0 %v1857_v56  ;;  %v5369_v56 = vpop.permute.xlu1 %2055  ;;  %v5371_v14 = vpop.permute.xlu0 %2065 }
 0x404   : > { %v3742_v16 = vpop.eup %3741 }
 0x405   : > { %v3744_v7 = vpop.eup %3743  ;;  %1855 = vadd.xlane.f32.xlu1 %v5336_v19  ;;  %v1783_v26 = vunpack.c.l.bf16 %v3742_v16  ;;  %v1785_v52 = vunpack.c.h.bf16 %v3742_v16 }
 0x406   : > { %2512 = vmatprep.mubr.bf16.mxu0 %v3744_v7  ;;  %1864 = vadd.xlane.f32.xlu0 %v1863_v37  ;;  %v1784_v22 = vunpack.c.l.bf16 %v3744_v7  ;;  %v1786_v6 = vunpack.c.h.bf16 %v3744_v7  ;;  %v5375_v18 = vpop.permute.xlu0 %2075 }
 0x408   : > { %v1875_v57 = vadd.f32 %v1784_v22, %v1783_v26  ;;  %v1878_v4 = vadd.f32 %v1786_v6, %v1785_v52 }
 0x409   : > { %2513 = vmatmul.mubr.bf16.gmra.mrb[72].mxu0 %v3742_v16  ;;  %1861 = vadd.xlane.f32.xlu1 %v5346_v32  ;;  %v5373_v32 = vpop.permute.xlu1 %2060 }
 0x40a   : > { %1870 = vadd.xlane.f32.xlu0 %v1869_v15  ;;  %v5382_v42 = vpop.permute.xlu0 %2085 }
 0x40c   : > { %v3746_v51 = vpop.eup %3745 }
 0x40d   : > { %v3748_v59 = vpop.eup %3747  ;;  %1867 = vadd.xlane.f32.xlu1 %v1866_v44  ;;  %v1787_v19 = vunpack.c.l.bf16 %v3746_v51  ;;  %v1789_v30 = vunpack.c.h.bf16 %v3746_v51  ;;  %v5377_v3 = vpop.permute.xlu1 %2070  ;;  %v6073_v44 = vsub.f32 %v5054_v63, %v5065_v21 }
 0x40e   : > { %2520 = vmatprep.mubr.bf16.mxu0 %v3748_v59  ;;  %1876 = vadd.xlane.f32.xlu0 %v1875_v57  ;;  %v1788_v37 = vunpack.c.l.bf16 %v3748_v59  ;;  %v1790_v43 = vunpack.c.h.bf16 %v3748_v59  ;;  %v5386_v62 = vpop.permute.xlu0 %2095  ;;  %v1888_v59 = vld [vmem:[#allocation3 + $0x8] sm:$0xff] }
 0x40f   : > { %v1373_v5 = vmul.f32 1.442695, %v6073_v44 }
 0x410   : > { %v1881_v48 = vadd.f32 %v1788_v37, %v1787_v19  ;;  %v1884_v17 = vadd.f32 %v1790_v43, %v1789_v30  ;;  %v1920_v30 = vmul.f32 %v5076_v55, %v1888_v59  ;;  %v1889_v43 = vld [vmem:[#allocation3 + $0x10] sm:$0xff]  ;;  %v1890_v59 = vld [vmem:[#allocation3 + $0x18] sm:$0xff] }
 0x411   : > { %2521 = vmatmul.mubr.bf16.gmra.mrb[76].mxu0 %v3746_v51  ;;  %1873 = vadd.xlane.f32.xlu1 %v1872_v2  ;;  %3749 = vpow2.f32 %v1373_v5  ;;  %v5384_v54 = vpop.permute.xlu1 %2080  ;;  %v1921_v44 = vmul.f32 %v5088_v11, %v1889_v43  ;;  %v1887_v5 = vld [vmem:[#allocation3] sm:$0xff]  ;;  %v1922_v43 = vmul.f32 %v5094_v28, %v1890_v59  ;;  %v2209_v28 = vmul.f32 0.0, %v5369_v56 }
 0x412   : > { %1882 = vadd.xlane.f32.xlu0 %v1881_v48  ;;  %v5393_v46 = vpop.permute.xlu0 %2105 }
 0x415   : > { %1879 = vadd.xlane.f32.xlu1 %v1878_v4  ;;  %v5388_v9 = vpop.permute.xlu1 %2090 }
 0x416   : > { %v5397_v63 = vpop.permute.xlu0 %2115 }
 0x419   : > { %1885 = vadd.xlane.f32.xlu1 %v1884_v17  ;;  %v5395_v39 = vpop.permute.xlu1 %2100 }
 0x41a   : > { %v5401_v33 = vpop.permute.xlu0 %2125 }
 0x41b   : > { %v5390_v38 = vpop.eup %3749 }
 0x41d   : > { %v5399_v21 = vpop.permute.xlu1 %2110 }
 0x41e   : > { %v5405_v20 = vpop.permute.xlu0 %2135 }
 0x421   : > { %v5403_v0 = vpop.permute.xlu1 %2120 }
 0x422   : > { %v5409_v15 = vpop.permute.xlu0 %2145 }
 0x425   : > { %v5407_v58 = vpop.permute.xlu1 %2130 }
 0x426   : > { %v5413_v16 = vpop.permute.xlu0 %2155 }
 0x428   : > { %2205 = vperm.xlu0 %3573, %v5390_v38  }
 0x429   : > { %v5411_v2 = vpop.permute.xlu1 %2140 }
 0x42a   : > { %v5417_v26 = vpop.permute.xlu0 %2165 }
 0x42b   : > { %6074 = vst [vmem:[#allocation88_spill] sm:$0xff] %v5417_v26 }
 0x42d   : > { %v5415_v7 = vpop.permute.xlu1 %2150 }
 0x42e   : > { %v5421_v22 = vpop.permute.xlu0 %2175 }
 0x42f   : > { %6075 = vst [vmem:[#allocation86_spill] sm:$0xff] %v5421_v22  ;;  %v1891_v22 = vld [vmem:[#allocation3 + $0x20] sm:$0xff] }
 0x430   : > { %v1923_v55 = vmul.f32 %v5103_v49, %v1891_v22  ;;  %v1892_v22 = vld [vmem:[#allocation3 + $0x28] sm:$0xff] }
 0x431   : > { %v5419_v52 = vpop.permute.xlu1 %2160 }
 0x432   : > { %v5425_v57 = vpop.permute.xlu0 %2185 }
 0x433   : > { %6077 = vst [vmem:[#allocation84_spill] sm:$0xff] %v5425_v57 }
 0x435   : > { %v5423_v6 = vpop.permute.xlu1 %2170 }
 0x436   : > { %6076 = vst [vmem:[#allocation82_spill] sm:$0xff] %v5423_v6  ;;  %v5429_v51 = vpop.permute.xlu0 %2195 }
 0x437   : > { %6079 = vst [vmem:[#allocation89_spill] sm:$0xff] %v5429_v51  ;;  %v1919_v51 = vmul.f32 %v5082_v47, %v1887_v5  ;;  %v1895_v5 = vld [vmem:[#allocation3 + $0x40] sm:$0xff] }
 0x439   : > { %v5427_v4 = vpop.permute.xlu1 %2180 }
 0x43a   : > { %6078 = vst [vmem:[#allocation91_spill] sm:$0xff] %v5427_v4 }
 0x43d   : > { %v5431_v19 = vpop.permute.xlu1 %2190 }
 0x43e   : > { %6080 = vst [vmem:[#allocation29_spill] sm:$0xff] %v5431_v19 }
 0x441   : > { %v5434_v17 = vpop.permute.xlu1 %2200 }
 0x442   : > { %6081 = vst [vmem:[#allocation30_spill] sm:$0xff] %v5434_v17 }
 0x463   : > { %v1796_v37 = vpop.xlane.xlu0 %1795 }
 0x464   : > { %v1952_v48 = vadd.f32 %v1920_v30, %v1796_v37  ;;  %v1893_v37 = vld [vmem:[#allocation3 + $0x30] sm:$0xff] }
 0x465   : > { %v1925_v49 = vmul.f32 %v5122_v8, %v1893_v37 }
 0x466   : > { %1985 = vst.msk [vmem:[#allocation3 + $0x8] sm:$0xff] %vm405_vm0, %v1952_v48 }
 0x467   : > { %v1799_v57 = vpop.xlane.xlu0 %1798 }
 0x468   : > { %v1953_v4 = vadd.f32 %v1921_v44, %v1799_v57  ;;  %v2208_v57 = vmul.f32 0.0, %v5367_v34 }
 0x46a   : > { %1986 = vst.msk [vmem:[#allocation3 + $0x10] sm:$0xff] %vm405_vm0, %v1953_v4  ;;  %v1793_v19 = vpop.xlane.xlu1 %1792 }
 0x46b   : > { %v1951_v6 = vadd.f32 %v1919_v51, %v1793_v19  ;;  %v1805_v30 = vpop.xlane.xlu0 %1804 }
 0x46c   : > { %v3321_v17 = vpop.f32.mrb[16].mxu0  ;;  %v1955_v26 = vadd.f32 %v1923_v55, %v1805_v30  ;;  %v1894_v30 = vld [vmem:[#allocation3 + $0x38] sm:$0xff] }
 0x46d   : > { %1984 = vst.msk [vmem:[#allocation3] sm:$0xff] %vm405_vm0, %v1951_v6  ;;  %v3322_v11 = vpop.f32.mrb[17].mxu0  ;;  %v2630_v48 = vld [vmem:[#allocation3 + $0x8] sm:$0xff] }
 0x46e   : > { %1988 = vst.msk [vmem:[#allocation3 + $0x20] sm:$0xff] %vm405_vm0, %v1955_v26  ;;  %v3323_v47 = vadd.f32 %v3322_v11, %v3321_v17  ;;  %v3324_v4 = vpop.f32.mrb[18].mxu0  ;;  %v1802_v44 = vpop.xlane.xlu1 %1801  ;;  %3751 = vrcp.f32 %v2630_v48  ;;  %v1924_v26 = vmul.f32 %v5116_v36, %v1892_v22  ;;  %v1927_v17 = vmul.f32 %v5134_v45, %v1895_v5  ;;  %v1897_v48 = vld [vmem:[#allocation3 + $0x50] sm:$0xff] }
 0x46f   : > { %v3325_v51 = vpop.f32.mrb[19].mxu0  ;;  %v1954_v19 = vadd.f32 %v1922_v43, %v1802_v44  ;;  %v1811_v6 = vpop.xlane.xlu0 %1810  ;;  %v1926_v36 = vmul.f32 %v5125_v31, %v1894_v30  ;;  %v5463_v5 = vstv %s5446_s23 }
 0x470   : > { %v3326_v55 = vadd.f32 %v3325_v51, %v3324_v4  ;;  %v1957_v59 = vadd.f32 %v1925_v49, %v1811_v6  ;;  %v5449_v34 = vadd.f32 %v3323_v47, %v2208_v57  ;;  %v2210_v49 = vmul.f32 0.0, %v5373_v32  ;;  %v1896_v6 = vld [vmem:[#allocation3 + $0x48] sm:$0xff] }
 0x471   : > { %1987 = vst.msk [vmem:[#allocation3 + $0x18] sm:$0xff] %vm405_vm0, %v1954_v19  ;;  %v2631_v47 = vld [vmem:[#allocation3 + $0x10] sm:$0xff]  ;;  %v1929_v19 = vmul.f32 %v5153_v29, %v1897_v48  ;;  %v1928_v29 = vmul.f32 %v5147_v53, %v1896_v6 }
 0x472   : > { %1990 = vst.msk [vmem:[#allocation3 + $0x30] sm:$0xff] %vm405_vm0, %v1957_v59  ;;  %v1808_v8 = vpop.xlane.xlu1 %1807  ;;  %v5455_v37 = vadd.f32 %v3326_v55, %v2209_v28 }
 0x473   : > { %v1956_v11 = vadd.f32 %v1924_v26, %v1808_v8  ;;  %v1817_v43 = vpop.xlane.xlu0 %1816  ;;  %v1899_v26 = vld [vmem:[#allocation3 + $0x60] sm:$0xff] }
 0x474   : > { %v3327_v56 = vpop.f32.mrb[20].mxu0  ;;  %v1959_v4 = vadd.f32 %v1927_v17, %v1817_v43  ;;  %v2629_v57 = vld [vmem:[#allocation3] sm:$0xff]  ;;  %v2211_v17 = vmul.f32 0.0, %v5371_v14 }
 0x475   : > { %1989 = vst.msk [vmem:[#allocation3 + $0x28] sm:$0xff] %vm405_vm0, %v1956_v11  ;;  %v3328_v44 = vpop.f32.mrb[21].mxu0  ;;  %3753 = vrcp.f32 %v2629_v57  ;;  %v2633_v8 = vld [vmem:[#allocation3 + $0x20] sm:$0xff]  ;;  %v1898_v57 = vld [vmem:[#allocation3 + $0x58] sm:$0xff] }
 0x476   : > { %1992 = vst.msk [vmem:[#allocation3 + $0x40] sm:$0xff] %vm405_vm0, %v1959_v4  ;;  %v3329_v45 = vadd.f32 %v3328_v44, %v3327_v56  ;;  %v3330_v22 = vpop.f32.mrb[22].mxu0  ;;  %v1814_v51 = vpop.xlane.xlu1 %1813  ;;  %3755 = vrcp.f32 %v2631_v47  ;;  %v1931_v4 = vmul.f32 %v5158_v23, %v1899_v26  ;;  %v2212_v23 = vmul.f32 0.0, %v5377_v3  ;;  %v1900_v26 = vld [vmem:[#allocation3 + $0x68] sm:$0xff] }
 0x477   : > { %v3331_v28 = vpop.f32.mrb[23].mxu0  ;;  %v1958_v55 = vadd.f32 %v1926_v36, %v1814_v51  ;;  %v1823_v59 = vpop.xlane.xlu0 %1822  ;;  %v1901_v36 = vld [vmem:[#allocation3 + $0x70] sm:$0xff] }
 0x478   : > { %v3752_v31 = vpop.eup %3751  ;;  %v3332_v32 = vadd.f32 %v3331_v28, %v3330_v22  ;;  %v1961_v30 = vadd.f32 %v1929_v19, %v1823_v59  ;;  %v2632_v11 = vld [vmem:[#allocation3 + $0x18] sm:$0xff]  ;;  %v5466_v43 = vadd.f32 %v3329_v45, %v2210_v49  ;;  %v1930_v19 = vmul.f32 %v5155_v35, %v1898_v57 }
 0x479   : > { %1991 = vst.msk [vmem:[#allocation3 + $0x38] sm:$0xff] %vm405_vm0, %v1958_v55  ;;  %v2695_v48 = vmul.f32 %v3752_v31, %v5463_v5  ;;  %3757 = vrcp.f32 %v2632_v11  ;;  %v2635_v53 = vld [vmem:[#allocation3 + $0x30] sm:$0xff]  ;;  %v1933_v59 = vmul.f32 %v5166_v61, %v1901_v36  ;;  %v2213_v31 = vmul.f32 0.0, %v5375_v18  ;;  %v1903_v11 = vld [vmem:[#allocation3 + $0x80] sm:$0xff] }
 0x47a   : > { %1994 = vst.msk [vmem:[#allocation3 + $0x50] sm:$0xff] %vm405_vm0, %v1961_v30  ;;  %v1820_v56 = vpop.xlane.xlu1 %1819  ;;  %3759 = vrcp.f32 %v2633_v8  ;;  %v5473_v14 = vadd.f32 %v3332_v32, %v2211_v17  ;;  %v1932_v61 = vmul.f32 %v5163_v27, %v1900_v26  ;;  %v2214_v26 = vmul.f32 0.0, %v5384_v54 }
 0x47b   : > { %v1960_v47 = vadd.f32 %v1928_v29, %v1820_v56  ;;  %2765 = vperm.xlu0 %3573, %v2695_v48   ;;  %v1829_v44 = vpop.xlane.xlu0 %1828 }
 0x47c   : > { %v3333_v49 = vpop.f32.mrb[24].mxu0  ;;  %v1963_v45 = vadd.f32 %v1931_v4, %v1829_v44  ;;  %v2634_v22 = vld [vmem:[#allocation3 + $0x28] sm:$0xff]  ;;  %v1902_v44 = vld [vmem:[#allocation3 + $0x78] sm:$0xff] }
 0x47d   : > { %1993 = vst.msk [vmem:[#allocation3 + $0x48] sm:$0xff] %vm405_vm0, %v1960_v47  ;;  %v3334_v51 = vpop.f32.mrb[25].mxu0  ;;  %3761 = vrcp.f32 %v2634_v22  ;;  %v2637_v35 = vld [vmem:[#allocation3 + $0x40] sm:$0xff]  ;;  %v1935_v47 = vmul.f32 %v5186_v12, %v1903_v11 }
 0x47e   : > { %1996 = vst.msk [vmem:[#allocation3 + $0x60] sm:$0xff] %vm405_vm0, %v1963_v45  ;;  %v3335_v6 = vadd.f32 %v3334_v51, %v3333_v49  ;;  %v3336_v28 = vpop.f32.mrb[26].mxu0  ;;  %v1826_v55 = vpop.xlane.xlu1 %1825  ;;  %3763 = vrcp.f32 %v2635_v53  ;;  %v1905_v53 = vld [vmem:[#allocation3 + $0x90] sm:$0xff] }
 0x47f   : > { %v3754_v8 = vpop.eup %3753  ;;  %v3337_v17 = vpop.f32.mrb[27].mxu0  ;;  %v1962_v32 = vadd.f32 %v1930_v19, %v1826_v55 }
 0x480   : > { %v1835_v30 = vpop.xlane.xlu0 %1834  ;;  %v3338_v29 = vadd.f32 %v3337_v17, %v3336_v28  ;;  %v2694_v3 = vmul.f32 %v3754_v8, %v5463_v5  ;;  %v2636_v56 = vld [vmem:[#allocation3 + $0x38] sm:$0xff]  ;;  %v5482_v4 = vadd.f32 %v3335_v6, %v2212_v23  ;;  %v3756_v57 = vpop.eup %3755 }
 0x481   : > { %v1965_v48 = vadd.f32 %v1933_v59, %v1835_v30  ;;  %1995 = vst.msk [vmem:[#allocation3 + $0x58] sm:$0xff] %vm405_vm0, %v1962_v32  ;;  %3765 = vrcp.f32 %v2636_v56  ;;  %v2696_v6 = vmul.f32 %v3756_v57, %v5463_v5  ;;  %v2639_v55 = vld [vmem:[#allocation3 + $0x50] sm:$0xff]  ;;  %v1934_v59 = vmul.f32 %v5180_v40, %v1902_v44  ;;  %v1904_v30 = vld [vmem:[#allocation3 + $0x88] sm:$0xff]  ;;  %v1907_v56 = vld [vmem:[#allocation3 + $0xa0] sm:$0xff] }
 0x482   : > { %v1832_v18 = vpop.xlane.xlu1 %1831  ;;  %2760 = vperm.xlu1 %3574, %v2694_v3   ;;  %3767 = vrcp.f32 %v2637_v35  ;;  %v5488_v36 = vadd.f32 %v3338_v29, %v2213_v31  ;;  %v1937_v32 = vmul.f32 %v5198_v1, %v1905_v53  ;;  %v2215_v35 = vmul.f32 0.0, %v5382_v42 }
 0x483   : > { %1998 = vst.msk [vmem:[#allocation3 + $0x70] sm:$0xff] %vm405_vm0, %v1965_v48  ;;  %v3758_v49 = vpop.eup %3757  ;;  %v1964_v45 = vadd.f32 %v1932_v61, %v1832_v18  ;;  %v1936_v42 = vmul.f32 %v5189_v60, %v1904_v30 }
 0x484   : > { %v1841_v22 = vpop.xlane.xlu0 %1840  ;;  %v3760_v51 = vpop.eup %3759  ;;  %v2697_v27 = vmul.f32 %v3758_v49, %v5463_v5  ;;  %v2638_v28 = vld [vmem:[#allocation3 + $0x48] sm:$0xff] }
 0x485   : > { %v3339_v19 = vpop.f32.mrb[28].mxu0  ;;  %v1967_v23 = vadd.f32 %v1935_v47, %v1841_v22  ;;  %1997 = vst.msk [vmem:[#allocation3 + $0x68] sm:$0xff] %vm405_vm0, %v1964_v45  ;;  %3769 = vrcp.f32 %v2638_v28  ;;  %v2698_v40 = vmul.f32 %v3760_v51, %v5463_v5  ;;  %v2641_v54 = vld [vmem:[#allocation3 + $0x60] sm:$0xff]  ;;  %v1939_v45 = vmul.f32 %v5213_v10, %v1907_v56  ;;  %v1906_v22 = vld [vmem:[#allocation3 + $0x98] sm:$0xff] }
 0x486   : > { %v3340_v12 = vpop.f32.mrb[29].mxu0  ;;  %v1838_v17 = vpop.xlane.xlu1 %1837  ;;  %2775 = vperm.xlu0 %3573, %v2697_v27   ;;  %2770 = vperm.xlu1 %3574, %v2696_v6   ;;  %3771 = vrcp.f32 %v2639_v55  ;;  %v1909_v27 = vld [vmem:[#allocation3 + $0xb0] sm:$0xff] }
 0x487   : > { %2000 = vst.msk [vmem:[#allocation3 + $0x80] sm:$0xff] %vm405_vm0, %v1967_v23  ;;  %v3341_v8 = vadd.f32 %v3340_v12, %v3339_v19  ;;  %v3342_v31 = vpop.f32.mrb[30].mxu0  ;;  %v3762_v11 = vpop.eup %3761  ;;  %v1966_v48 = vadd.f32 %v1934_v59, %v1838_v17 }
 0x488   : > { %v3343_v29 = vpop.f32.mrb[31].mxu0  ;;  %v1847_v3 = vpop.xlane.xlu0 %1846  ;;  %v2699_v18 = vmul.f32 %v3762_v11, %v5463_v5  ;;  %v2640_v47 = vld [vmem:[#allocation3 + $0x58] sm:$0xff]  ;;  %v1941_v11 = vmul.f32 %v5229_v24, %v1909_v27  ;;  %v1913_v27 = vld [vmem:[#allocation3 + $0xd0] sm:$0xff] }
 0x489   : > { %v3344_v57 = vadd.f32 %v3343_v29, %v3342_v31  ;;  %v1969_v61 = vadd.f32 %v1937_v32, %v1847_v3  ;;  %v5500_v44 = vadd.f32 %v3341_v8, %v2214_v26  ;;  %v3764_v1 = vpop.eup %3763  ;;  %1999 = vst.msk [vmem:[#allocation3 + $0x78] sm:$0xff] %vm405_vm0, %v1966_v48  ;;  %3773 = vrcp.f32 %v2640_v47 }
 0x48a   : > { %v1844_v49 = vpop.xlane.xlu1 %1843  ;;  %2785 = vperm.xlu0 %3573, %v2699_v18   ;;  %2780 = vperm.xlu1 %3574, %v2698_v40   ;;  %3775 = vrcp.f32 %v2641_v54  ;;  %v2700_v12 = vmul.f32 %v3764_v1, %v5463_v5  ;;  %v2643_v26 = vld [vmem:[#allocation3 + $0x70] sm:$0xff]  ;;  %v1938_v8 = vmul.f32 %v5201_v25, %v1906_v22  ;;  %v2216_v31 = vmul.f32 0.0, %v5388_v9  ;;  %v1911_v54 = vld [vmem:[#allocation3 + $0xc0] sm:$0xff] }
 0x48b   : > { %2002 = vst.msk [vmem:[#allocation3 + $0x90] sm:$0xff] %vm405_vm0, %v1969_v61  ;;  %v5506_v53 = vadd.f32 %v3344_v57, %v2215_v35  ;;  %v3766_v51 = vpop.eup %3765  ;;  %v1968_v19 = vadd.f32 %v1936_v42, %v1844_v49  ;;  %v1908_v35 = vld [vmem:[#allocation3 + $0xa8] sm:$0xff]  ;;  %v2217_v48 = vmul.f32 0.0, %v5386_v62  ;;  %v1943_v49 = vmul.f32 %v5240_v13, %v1911_v54 }
 0x48c   : > { %v1853_v23 = vpop.xlane.xlu0 %1852  ;;  %v3768_v6 = vpop.eup %3767  ;;  %v2701_v60 = vmul.f32 %v3766_v51, %v5463_v5  ;;  %v2642_v59 = vld [vmem:[#allocation3 + $0x68] sm:$0xff]  ;;  %v1940_v62 = vmul.f32 %v5223_v41, %v1908_v35 }
 0x48d   : > { %v3345_v28 = vpop.f32.mrb[32].mxu0  ;;  %v1971_v55 = vadd.f32 %v1939_v45, %v1853_v23  ;;  %2001 = vst.msk [vmem:[#allocation3 + $0x88] sm:$0xff] %vm405_vm0, %v1968_v19  ;;  %3777 = vrcp.f32 %v2642_v59  ;;  %v2702_v25 = vmul.f32 %v3768_v6, %v5463_v5  ;;  %v1910_v45 = vld [vmem:[#allocation3 + $0xb8] sm:$0xff] }
 0x48e   : > { %v3346_v10 = vpop.f32.mrb[33].mxu0  ;;  %v1850_v30 = vpop.xlane.xlu1 %1849  ;;  %2795 = vperm.xlu0 %3573, %v2701_v60   ;;  %2790 = vperm.xlu1 %3574, %v2700_v12   ;;  %3779 = vrcp.f32 %v2643_v26  ;;  %v2645_v9 = vld [vmem:[#allocation3 + $0x80] sm:$0xff]  ;;  %v1942_v26 = vmul.f32 %v5237_v50, %v1910_v45 }
 0x48f   : > { %2004 = vst.msk [vmem:[#allocation3 + $0xa0] sm:$0xff] %vm405_vm0, %v1971_v55  ;;  %v3347_v17 = vadd.f32 %v3346_v10, %v3345_v28  ;;  %v3348_v32 = vpop.f32.mrb[34].mxu0  ;;  %v3770_v29 = vpop.eup %3769  ;;  %v1970_v40 = vadd.f32 %v1938_v8, %v1850_v30  ;;  %v2218_v10 = vmul.f32 0.0, %v5395_v39 }
 0x490   : > { %v3349_v3 = vpop.f32.mrb[35].mxu0  ;;  %v1859_v56 = vpop.xlane.xlu0 %1858  ;;  %v2703_v18 = vmul.f32 %v3770_v29, %v5463_v5  ;;  %v2644_v47 = vld [vmem:[#allocation3 + $0x78] sm:$0xff]  ;;  %v2219_v29 = vmul.f32 0.0, %v5393_v46 }
 0x491   : > { %v3350_v57 = vadd.f32 %v3349_v3, %v3348_v32  ;;  %v1973_v61 = vadd.f32 %v1941_v11, %v1859_v56  ;;  %v5518_v1 = vadd.f32 %v3347_v17, %v2216_v31  ;;  %v3772_v24 = vpop.eup %3771  ;;  %2003 = vst.msk [vmem:[#allocation3 + $0x98] sm:$0xff] %vm405_vm0, %v1970_v40  ;;  %3781 = vrcp.f32 %v2644_v47  ;;  %v6082_v32 = vld [vmem:[#allocation28_spill] sm:$0xff]  ;;  %v1915_v56 = vld [vmem:[#allocation3 + $0xe0] sm:$0xff] }
 0x492   : > { %v1856_v42 = vpop.xlane.xlu1 %1855  ;;  %2805 = vperm.xlu0 %3573, %v2703_v18   ;;  %2800 = vperm.xlu1 %3574, %v2702_v25   ;;  %3783 = vrcp.f32 %v2645_v9  ;;  %v2704_v60 = vmul.f32 %v3772_v24, %v5463_v5  ;;  %v2647_v59 = vld [vmem:[#allocation3 + $0x90] sm:$0xff]  ;;  %v1945_v30 = vmul.f32 %v6082_v32, %v1913_v27  ;;  %v1912_v11 = vld [vmem:[#allocation3 + $0xc8] sm:$0xff]  ;;  %v6083_v47 = vld [vmem:[#allocation27_spill] sm:$0xff] }
 0x493   : > { %2006 = vst.msk [vmem:[#allocation3 + $0xb0] sm:$0xff] %vm405_vm0, %v1973_v61  ;;  %v5524_v22 = vadd.f32 %v3350_v57, %v2217_v48  ;;  %v3774_v51 = vpop.eup %3773  ;;  %v1972_v19 = vadd.f32 %v1940_v62, %v1856_v42  ;;  %v1944_v46 = vmul.f32 %v6083_v47, %v1912_v11  ;;  %v6084_v62 = vld [vmem:[#allocation83_spill] sm:$0xff]  ;;  %v1917_v27 = vld [vmem:[#allocation3 + $0xf0] sm:$0xff] }
 0x494   : > { %v1865_v23 = vpop.xlane.xlu0 %1864  ;;  %v3776_v6 = vpop.eup %3775  ;;  %v2705_v41 = vmul.f32 %v3774_v51, %v5463_v5  ;;  %v2646_v12 = vld [vmem:[#allocation3 + $0x88] sm:$0xff]  ;;  %v1947_v42 = vmul.f32 %v6084_v62, %v1915_v56  ;;  %v6087_v47 = vld [vmem:[#allocation87_spill] sm:$0xff] }
 0x495   : > { %v3351_v28 = vpop.f32.mrb[36].mxu0  ;;  %v1975_v55 = vadd.f32 %v1943_v49, %v1865_v23  ;;  %2005 = vst.msk [vmem:[#allocation3 + $0xa8] sm:$0xff] %vm405_vm0, %v1972_v19  ;;  %3785 = vrcp.f32 %v2646_v12  ;;  %v2706_v50 = vmul.f32 %v3776_v6, %v5463_v5  ;;  %v1914_v49 = vld [vmem:[#allocation3 + $0xd8] sm:$0xff] }
 0x496   : > { %v3352_v13 = vpop.f32.mrb[37].mxu0  ;;  %v1862_v17 = vpop.xlane.xlu1 %1861  ;;  %2815 = vperm.xlu0 %3573, %v2705_v41   ;;  %2810 = vperm.xlu1 %3574, %v2704_v60   ;;  %3787 = vrcp.f32 %v2647_v59  ;;  %v2649_v57 = vld [vmem:[#allocation3 + $0xa0] sm:$0xff] }
 0x497   : > { %2008 = vst.msk [vmem:[#allocation3 + $0xc0] sm:$0xff] %vm405_vm0, %v1975_v55  ;;  %v3353_v8 = vadd.f32 %v3352_v13, %v3351_v28  ;;  %v3354_v31 = vpop.f32.mrb[38].mxu0  ;;  %v3778_v35 = vpop.eup %3777  ;;  %v1974_v3 = vadd.f32 %v1942_v26, %v1862_v17  ;;  %v6085_v26 = vld [vmem:[#allocation81_spill] sm:$0xff] }
 0x498   : > { %v3355_v48 = vpop.f32.mrb[39].mxu0  ;;  %v1871_v40 = vpop.xlane.xlu0 %1870  ;;  %v2707_v54 = vmul.f32 %v3778_v35, %v5463_v5  ;;  %v2648_v9 = vld [vmem:[#allocation3 + $0x98] sm:$0xff]  ;;  %v1916_v35 = vld [vmem:[#allocation3 + $0xe8] sm:$0xff] }
 0x499   : > { %v3356_v39 = vadd.f32 %v3355_v48, %v3354_v31  ;;  %v1977_v25 = vadd.f32 %v1945_v30, %v1871_v40  ;;  %v5536_v61 = vadd.f32 %v3353_v8, %v2218_v10  ;;  %v3780_v18 = vpop.eup %3779  ;;  %2007 = vst.msk [vmem:[#allocation3 + $0xb8] sm:$0xff] %vm405_vm0, %v1974_v3  ;;  %3789 = vrcp.f32 %v2648_v9  ;;  %v6086_v30 = vld [vmem:[#allocation85_spill] sm:$0xff] }
 0x49a   : > { %v1868_v24 = vpop.xlane.xlu1 %1867  ;;  %2825 = vperm.xlu0 %3573, %v2707_v54   ;;  %2820 = vperm.xlu1 %3574, %v2706_v50   ;;  %3791 = vrcp.f32 %v2649_v57  ;;  %v2708_v60 = vmul.f32 %v3780_v18, %v5463_v5  ;;  %v2651_v59 = vld [vmem:[#allocation3 + $0xb0] sm:$0xff]  ;;  %v1946_v10 = vmul.f32 %v6085_v26, %v1914_v49  ;;  %v2220_v8 = vmul.f32 0.0, %v5399_v21 }
 0x49b   : > { %2010 = vst.msk [vmem:[#allocation3 + $0xd0] sm:$0xff] %vm405_vm0, %v1977_v25  ;;  %v5542_v45 = vadd.f32 %v3356_v39, %v2219_v29  ;;  %v3782_v51 = vpop.eup %3781  ;;  %v1976_v19 = vadd.f32 %v1944_v46, %v1868_v24  ;;  %v1949_v11 = vmul.f32 %v6086_v30, %v1917_v27  ;;  %v2221_v48 = vmul.f32 0.0, %v5397_v63  ;;  %v1918_v24 = vld [vmem:[#allocation3 + $0xf8] sm:$0xff] }
 0x49c   : > { %v1877_v23 = vpop.xlane.xlu0 %1876  ;;  %v3784_v6 = vpop.eup %3783  ;;  %v2709_v41 = vmul.f32 %v3782_v51, %v5463_v5  ;;  %v2650_v12 = vld [vmem:[#allocation3 + $0xa8] sm:$0xff]  ;;  %v1948_v46 = vmul.f32 %v6087_v47, %v1916_v35  ;;  %v2225_v47 = vmul.f32 0.0, %v5405_v20 }
 0x49d   : > { %v3357_v28 = vpop.f32.mrb[40].mxu0  ;;  %v1979_v55 = vadd.f32 %v1947_v42, %v1877_v23  ;;  %2009 = vst.msk [vmem:[#allocation3 + $0xc8] sm:$0xff] %vm405_vm0, %v1976_v19  ;;  %3793 = vrcp.f32 %v2650_v12  ;;  %v2710_v56 = vmul.f32 %v3784_v6, %v5463_v5 }
 0x49e   : > { %v3358_v13 = vpop.f32.mrb[41].mxu0  ;;  %v1874_v32 = vpop.xlane.xlu1 %1873  ;;  %2835 = vperm.xlu0 %3573, %v2709_v41   ;;  %2830 = vperm.xlu1 %3574, %v2708_v60   ;;  %3795 = vrcp.f32 %v2651_v59  ;;  %v2653_v9 = vld [vmem:[#allocation3 + $0xc0] sm:$0xff]  ;;  %v1950_v41 = vmul.f32 %v5390_v38, %v1918_v24  ;;  %v2222_v60 = vmul.f32 0.0, %v5403_v0 }
 0x49f   : > { %2012 = vst.msk [vmem:[#allocation3 + $0xe0] sm:$0xff] %vm405_vm0, %v1979_v55  ;;  %v3359_v31 = vadd.f32 %v3358_v13, %v3357_v28  ;;  %v3360_v17 = vpop.f32.mrb[42].mxu0  ;;  %v3786_v29 = vpop.eup %3785  ;;  %v1978_v40 = vadd.f32 %v1946_v10, %v1874_v32  ;;  %v2223_v10 = vmul.f32 0.0, %v5401_v33 }
 0x4a0   : > { %v3361_v3 = vpop.f32.mrb[43].mxu0  ;;  %v1883_v50 = vpop.xlane.xlu0 %1882  ;;  %v2711_v25 = vmul.f32 %v3786_v29, %v5463_v5  ;;  %v2652_v54 = vld [vmem:[#allocation3 + $0xb8] sm:$0xff] }
 0x4a1   : > { %v3362_v21 = vadd.f32 %v3361_v3, %v3360_v17  ;;  %v1981_v39 = vadd.f32 %v1949_v11, %v1883_v50  ;;  %v5554_v57 = vadd.f32 %v3359_v31, %v2220_v8  ;;  %v3788_v18 = vpop.eup %3787  ;;  %2011 = vst.msk [vmem:[#allocation3 + $0xd8] sm:$0xff] %vm405_vm0, %v1978_v40  ;;  %3797 = vrcp.f32 %v2652_v54 }
 0x4a2   : > { %v1880_v63 = vpop.xlane.xlu1 %1879  ;;  %2845 = vperm.xlu0 %3573, %v2711_v25   ;;  %2840 = vperm.xlu1 %3574, %v2710_v56   ;;  %3799 = vrcp.f32 %v2653_v9  ;;  %v2712_v23 = vmul.f32 %v3788_v18, %v5463_v5  ;;  %v2655_v6 = vld [vmem:[#allocation3 + $0xd0] sm:$0xff]  ;;  %v2224_v25 = vmul.f32 0.0, %v5407_v58 }
 0x4a3   : > { %2014 = vst.msk [vmem:[#allocation3 + $0xf0] sm:$0xff] %vm405_vm0, %v1981_v39  ;;  %v5559_v62 = vadd.f32 %v3362_v21, %v2221_v48  ;;  %v3790_v42 = vpop.eup %3789  ;;  %v1980_v49 = vadd.f32 %v1948_v46, %v1880_v63 }
 0x4a4   : > { %v3363_v51 = vpop.f32.mrb[44].mxu0  ;;  %v2713_v19 = vmul.f32 %v3790_v42, %v5463_v5  ;;  %v2654_v27 = vld [vmem:[#allocation3 + $0xc8] sm:$0xff]  ;;  %v3792_v28 = vpop.eup %3791 }
 0x4a5   : > { %2013 = vst.msk [vmem:[#allocation3 + $0xe8] sm:$0xff] %vm405_vm0, %v1980_v49  ;;  %v3364_v55 = vpop.f32.mrb[45].mxu0  ;;  %3801 = vrcp.f32 %v2654_v27  ;;  %v2714_v30 = vmul.f32 %v3792_v28, %v5463_v5 }
 0x4a6   : > { %v3365_v12 = vadd.f32 %v3364_v55, %v3363_v51  ;;  %v3366_v59 = vpop.f32.mrb[46].mxu0  ;;  %v1886_v13 = vpop.xlane.xlu1 %1885  ;;  %2855 = vperm.xlu0 %3573, %v2713_v19   ;;  %2850 = vperm.xlu1 %3574, %v2712_v23   ;;  %3803 = vrcp.f32 %v2655_v6  ;;  %v2657_v11 = vld [vmem:[#allocation3 + $0xe0] sm:$0xff] }
 0x4a7   : > { %v3794_v26 = vpop.eup %3793  ;;  %v3367_v8 = vpop.f32.mrb[47].mxu0  ;;  %v1982_v31 = vadd.f32 %v1950_v41, %v1886_v13  ;;  %v2226_v41 = vmul.f32 0.0, %v5411_v2  ;;  %v2227_v13 = vmul.f32 0.0, %v5409_v15 }
 0x4a8   : > { %v3368_v17 = vadd.f32 %v3367_v8, %v3366_v59  ;;  %v2715_v32 = vmul.f32 %v3794_v26, %v5463_v5  ;;  %v2656_v38 = vld [vmem:[#allocation3 + $0xd8] sm:$0xff]  ;;  %v5569_v35 = vadd.f32 %v3365_v12, %v2222_v60  ;;  %v3796_v0 = vpop.eup %3795 }
 0x4a9   : > { %2015 = vst.msk [vmem:[#allocation3 + $0xf8] sm:$0xff] %vm405_vm0, %v1982_v31  ;;  %3805 = vrcp.f32 %v2656_v38  ;;  %v2716_v40 = vmul.f32 %v3796_v0, %v5463_v5 }
 0x4aa   : > { %2865 = vperm.xlu0 %3573, %v2715_v32   ;;  %2860 = vperm.xlu1 %3574, %v2714_v30   ;;  %v5572_v29 = vadd.f32 %v3368_v17, %v2223_v10  ;;  %3807 = vrcp.f32 %v2657_v11  ;;  %v2659_v56 = vld [vmem:[#allocation3 + $0xf0] sm:$0xff] }
 0x4ab   : > { %v3798_v33 = vpop.eup %3797 }
 0x4ac   : > { %v3369_v48 = vpop.f32.mrb[48].mxu0  ;;  %v2717_v3 = vmul.f32 %v3798_v33, %v5463_v5  ;;  %v2658_v50 = vld [vmem:[#allocation3 + $0xe8] sm:$0xff]  ;;  %v3800_v21 = vpop.eup %3799  ;;  %v2228_v33 = vmul.f32 0.0, %v5415_v7 }
 0x4ad   : > { %v3370_v39 = vpop.f32.mrb[49].mxu0  ;;  %3809 = vrcp.f32 %v2658_v50  ;;  %v2718_v42 = vmul.f32 %v3800_v21, %v5463_v5  ;;  %v2229_v50 = vmul.f32 0.0, %v5413_v16  ;;  %v6088_v7 = vld [vmem:[#allocation88_spill] sm:$0xff] }
 0x4ae   : > { %v3371_v54 = vadd.f32 %v3370_v39, %v3369_v48  ;;  %v3372_v9 = vpop.f32.mrb[50].mxu0  ;;  %2875 = vperm.xlu0 %3573, %v2717_v3   ;;  %2870 = vperm.xlu1 %3574, %v2716_v40   ;;  %3811 = vrcp.f32 %v2659_v56 }
 0x4af   : > { %v3802_v18 = vpop.eup %3801  ;;  %v3373_v46 = vpop.f32.mrb[51].mxu0 }
 0x4b0   : > { %v3374_v63 = vadd.f32 %v3373_v46, %v3372_v9  ;;  %v2719_v24 = vmul.f32 %v3802_v18, %v5463_v5  ;;  %v2660_v49 = vld [vmem:[#allocation3 + $0xf8] sm:$0xff]  ;;  %v5580_v51 = vadd.f32 %v3371_v54, %v2224_v25  ;;  %v3804_v19 = vpop.eup %3803  ;;  %v2230_v9 = vmul.f32 0.0, %v5419_v52 }
 0x4b1   : > { %3813 = vrcp.f32 %v2660_v49  ;;  %v2720_v6 = vmul.f32 %v3804_v19, %v5463_v5  ;;  %v2231_v46 = vmul.f32 0.0, %v6088_v7  ;;  %v6089_v19 = vld [vmem:[#allocation82_spill] sm:$0xff]  ;;  %v2206_v7 = vpop.permute.xlu0 %2205 }
 0x4b2   : > { %2885 = vperm.xlu0 %3573, %v2719_v24   ;;  %2880 = vperm.xlu1 %3574, %v2718_v42   ;;  %v5582_v58 = vadd.f32 %v3374_v63, %v2225_v47 }
 0x4b3   : > { %v3806_v23 = vpop.eup %3805 }
 0x4b4   : > { %v3375_v27 = vpop.f32.mrb[52].mxu0  ;;  %v2721_v20 = vmul.f32 %v3806_v23, %v5463_v5  ;;  %v3808_v28 = vpop.eup %3807  ;;  %v2232_v23 = vmul.f32 0.0, %v6089_v19 }
 0x4b5   : > { %v3376_v55 = vpop.f32.mrb[53].mxu0  ;;  %v2722_v31 = vmul.f32 %v3808_v28, %v5463_v5  ;;  %v6090_v28 = vld [vmem:[#allocation86_spill] sm:$0xff] }
 0x4b6   : > { %v3377_v60 = vadd.f32 %v3376_v55, %v3375_v27  ;;  %v3378_v12 = vpop.f32.mrb[54].mxu0  ;;  %2895 = vperm.xlu0 %3573, %v2721_v20   ;;  %2890 = vperm.xlu1 %3574, %v2720_v6   ;;  %v2233_v55 = vmul.f32 0.0, %v6090_v28 }
 0x4b7   : > { %v3810_v59 = vpop.eup %3809  ;;  %v3379_v26 = vpop.f32.mrb[55].mxu0 }
 0x4b8   : > { %v3380_v10 = vadd.f32 %v3379_v26, %v3378_v12  ;;  %v2723_v8 = vmul.f32 %v3810_v59, %v5463_v5  ;;  %v5590_v17 = vadd.f32 %v3377_v60, %v2226_v41  ;;  %v3812_v32 = vpop.eup %3811 }
 0x4b9   : > { %v2724_v0 = vmul.f32 %v3812_v32, %v5463_v5  ;;  %v6092_v32 = vld [vmem:[#allocation84_spill] sm:$0xff] }
 0x4ba   : > { %2905 = vperm.xlu0 %3573, %v2723_v8   ;;  %2900 = vperm.xlu1 %3574, %v2722_v31   ;;  %v5592_v30 = vadd.f32 %v3380_v10, %v2227_v13  ;;  %v6091_v13 = vld [vmem:[#allocation91_spill] sm:$0xff] }
 0x4bb   : > { %v3814_v2 = vpop.eup %3813  ;;  %v2234_v26 = vmul.f32 0.0, %v6091_v13  ;;  %v2950_v13 = vld [vmem:[%s4324_s8] sm:$0xff] }
 0x4bc   : > { %v3381_v38 = vpop.f32.mrb[56].mxu0  ;;  %v2725_v11 = vmul.f32 %v3814_v2, %v5463_v5  ;;  %v2235_v2 = vmul.f32 0.0, %v6092_v32 }
 0x4bd   : > { %v3382_v15 = vpop.f32.mrb[57].mxu0 }
 0x4be   : > { %v3383_v48 = vadd.f32 %v3382_v15, %v3381_v38  ;;  %v3384_v3 = vpop.f32.mrb[58].mxu0  ;;  %2915 = vperm.xlu0 %3573, %v2725_v11   ;;  %2910 = vperm.xlu1 %3574, %v2724_v0  }
 0x4bf   : > { %v3385_v40 = vpop.f32.mrb[59].mxu0 }
 0x4c0   : > { %v3386_v56 = vadd.f32 %v3385_v40, %v3384_v3  ;;  %v5598_v21 = vadd.f32 %v3383_v48, %v2228_v33  ;;  %v6093_v48 = vld [vmem:[#allocation29_spill] sm:$0xff] }
 0x4c1   : > { %v2236_v3 = vmul.f32 0.0, %v6093_v48 }
 0x4c2   : > { %v5600_v39 = vadd.f32 %v3386_v56, %v2229_v50 }
 0x4c4   : > { %v3387_v25 = vpop.f32.mrb[60].mxu0 }
 0x4c5   : > { %v3388_v54 = vpop.f32.mrb[61].mxu0 }
 0x4c6   : > { %v3389_v5 = vadd.f32 %v3388_v54, %v3387_v25  ;;  %v3390_v18 = vpop.f32.mrb[62].mxu0  ;;  %v6094_v25 = vld [vmem:[#allocation89_spill] sm:$0xff] }
 0x4c7   : > { %v3391_v47 = vpop.f32.mrb[63].mxu0  ;;  %v2237_v54 = vmul.f32 0.0, %v6094_v25 }
 0x4c8   : > { %v3392_v63 = vadd.f32 %v3391_v47, %v3390_v18  ;;  %v5604_v24 = vadd.f32 %v3389_v5, %v2230_v9 }
 0x4ca   : > { %v5606_v42 = vadd.f32 %v3392_v63, %v2231_v46  ;;  %v6095_v63 = vld [vmem:[#allocation30_spill] sm:$0xff] }
 0x4cc   : > { %v3393_v16 = vpop.f32.mrb[64].mxu0 }
 0x4cd   : > { %v3394_v49 = vpop.f32.mrb[65].mxu0 }
 0x4ce   : > { %v3395_v27 = vadd.f32 %v3394_v49, %v3393_v16  ;;  %v3396_v20 = vpop.f32.mrb[66].mxu0  ;;  %v2238_v16 = vmul.f32 0.0, %v6095_v63 }
 0x4cf   : > { %v3397_v6 = vpop.f32.mrb[67].mxu0 }
 0x4d0   : > { %v3398_v52 = vadd.f32 %v3397_v6, %v3396_v20  ;;  %v5610_v41 = vadd.f32 %v3395_v27, %v2232_v23  ;;  %v2239_v27 = vmul.f32 0.0, %v2206_v7 }
 0x4d2   : > { %v5612_v60 = vadd.f32 %v3398_v52, %v2233_v55  ;;  %v2951_v55 = vld [vmem:[%s4324_s8 + $0x8] sm:$0xff] }
 0x4d4   : > { %v3399_v12 = vpop.f32.mrb[68].mxu0 }
 0x4d5   : > { %v3400_v59 = vpop.f32.mrb[69].mxu0 }
 0x4d6   : > { %v3401_v10 = vadd.f32 %v3400_v59, %v3399_v12  ;;  %v3402_v8 = vpop.f32.mrb[70].mxu0 }
 0x4d7   : > { %v3403_v31 = vpop.f32.mrb[71].mxu0 }
 0x4d8   : > { %v3404_v38 = vadd.f32 %v3403_v31, %v3402_v8  ;;  %v5616_v11 = vadd.f32 %v3401_v10, %v2234_v26  ;;  %v2953_v31 = vld [vmem:[%s4324_s8 + $0x18] sm:$0xff] }
 0x4da   : > { %v5618_v0 = vadd.f32 %v3404_v38, %v2235_v2  ;;  %v2952_v2 = vld [vmem:[%s4324_s8 + $0x10] sm:$0xff] }
 0x4dc   : > { %v3405_v15 = vpop.f32.mrb[72].mxu0 }
 0x4dd   : > { %v3406_v33 = vpop.f32.mrb[73].mxu0 }
 0x4de   : > { %v3407_v40 = vadd.f32 %v3406_v33, %v3405_v15  ;;  %v3408_v50 = vpop.f32.mrb[74].mxu0 }
 0x4df   : > { %v3409_v56 = vpop.f32.mrb[75].mxu0 }
 0x4e0   : > { %v3410_v9 = vadd.f32 %v3409_v56, %v3408_v50  ;;  %v5622_v5 = vadd.f32 %v3407_v40, %v2236_v3  ;;  %v2955_v3 = vld [vmem:[%s4324_s8 + $0x28] sm:$0xff] }
 0x4e2   : > { %v5624_v18 = vadd.f32 %v3410_v9, %v2237_v54 }
 0x4e4   : > { %v3411_v47 = vpop.f32.mrb[76].mxu0 }
 0x4e5   : > { %v3412_v46 = vpop.f32.mrb[77].mxu0 }
 0x4e6   : > { %v3413_v49 = vadd.f32 %v3412_v46, %v3411_v47  ;;  %v3414_v19 = vpop.f32.mrb[78].mxu0  ;;  %v2956_v47 = vld [vmem:[%s4324_s8 + $0x30] sm:$0xff] }
 0x4e7   : > { %v3415_v23 = vpop.f32.mrb[79].mxu0 }
 0x4e8   : > { %v3416_v20 = vadd.f32 %v3415_v23, %v3414_v19  ;;  %v5627_v6 = vadd.f32 %v3413_v49, %v2238_v16  ;;  %v2958_v19 = vld [vmem:[%s4324_s8 + $0x40] sm:$0xff] }
 0x4ea   : > { %v5629_v28 = vadd.f32 %v3416_v20, %v2239_v27 }
 0x4fa   : > { %v2766_v52 = vpop.permute.xlu0 %2765 }
 0x4fb   : > { %v2919_v12 = vmul.f32 %v2766_v52, %v5455_v37 }
 0x4fd   : > { %v2983_v59 = vadd.f32 %v2951_v55, %v2919_v12  ;;  %v2960_v12 = vld [vmem:[%s4324_s8 + $0x50] sm:$0xff] }
 0x4ff   : > { %3015 = vst [vmem:[%s5635_s19 + $0x8] sm:$0xff] %v2983_v59 }
 0x501   : > { %v2761_v26 = vpop.permute.xlu1 %2760 }
 0x502   : > { %v2918_v10 = vmul.f32 %v2761_v26, %v5449_v34  ;;  %v2954_v34 = vld [vmem:[%s4324_s8 + $0x20] sm:$0xff] }
 0x504   : > { %v2982_v8 = vadd.f32 %v2950_v13, %v2918_v10 }
 0x505   : > { %v2776_v32 = vpop.permute.xlu0 %2775  ;;  %v2771_v37 = vpop.permute.xlu1 %2770 }
 0x506   : > { %3014 = vst [vmem:[%s5635_s19] sm:$0xff] %v2982_v8  ;;  %v2921_v38 = vmul.f32 %v2776_v32, %v5473_v14  ;;  %v2920_v15 = vmul.f32 %v2771_v37, %v5466_v43  ;;  %v2957_v43 = vld [vmem:[%s4324_s8 + $0x38] sm:$0xff] }
 0x508   : > { %v2985_v33 = vadd.f32 %v2953_v31, %v2921_v38  ;;  %v2984_v48 = vadd.f32 %v2952_v2, %v2920_v15  ;;  %v2962_v31 = vld [vmem:[%s4324_s8 + $0x60] sm:$0xff] }
 0x509   : > { %v2786_v40 = vpop.permute.xlu0 %2785  ;;  %v2781_v50 = vpop.permute.xlu1 %2780 }
 0x50a   : > { %3017 = vst [vmem:[%s5635_s19 + $0x18] sm:$0xff] %v2985_v33  ;;  %3016 = vst [vmem:[%s5635_s19 + $0x10] sm:$0xff] %v2984_v48  ;;  %v2923_v56 = vmul.f32 %v2786_v40, %v5488_v36  ;;  %v2922_v25 = vmul.f32 %v2781_v50, %v5482_v4  ;;  %v2959_v4 = vld [vmem:[%s4324_s8 + $0x48] sm:$0xff]  ;;  %v2964_v33 = vld [vmem:[%s4324_s8 + $0x70] sm:$0xff] }
 0x50c   : > { %v2987_v14 = vadd.f32 %v2955_v3, %v2923_v56  ;;  %v2986_v54 = vadd.f32 %v2954_v34, %v2922_v25  ;;  %v2966_v56 = vld [vmem:[%s4324_s8 + $0x80] sm:$0xff] }
 0x50d   : > { %v2796_v9 = vpop.permute.xlu0 %2795  ;;  %v2791_v7 = vpop.permute.xlu1 %2790 }
 0x50e   : > { %3019 = vst [vmem:[%s5635_s19 + $0x28] sm:$0xff] %v2987_v14  ;;  %3018 = vst [vmem:[%s5635_s19 + $0x20] sm:$0xff] %v2986_v54  ;;  %v2925_v46 = vmul.f32 %v2796_v9, %v5506_v53  ;;  %v2924_v63 = vmul.f32 %v2791_v7, %v5500_v44  ;;  %v2961_v44 = vld [vmem:[%s4324_s8 + $0x58] sm:$0xff] }
 0x510   : > { %v2989_v36 = vadd.f32 %v2957_v43, %v2925_v46  ;;  %v2988_v16 = vadd.f32 %v2956_v47, %v2924_v63  ;;  %v2968_v47 = vld [vmem:[%s4324_s8 + $0x90] sm:$0xff] }
 0x511   : > { %v2806_v49 = vpop.permute.xlu0 %2805  ;;  %v2801_v23 = vpop.permute.xlu1 %2800 }
 0x512   : > { %3021 = vst [vmem:[%s5635_s19 + $0x38] sm:$0xff] %v2989_v36  ;;  %3020 = vst [vmem:[%s5635_s19 + $0x30] sm:$0xff] %v2988_v16  ;;  %v2927_v27 = vmul.f32 %v2806_v49, %v5524_v22  ;;  %v2926_v20 = vmul.f32 %v2801_v23, %v5518_v1  ;;  %v2963_v1 = vld [vmem:[%s4324_s8 + $0x68] sm:$0xff] }
 0x514   : > { %v2991_v53 = vadd.f32 %v2959_v4, %v2927_v27  ;;  %v2990_v55 = vadd.f32 %v2958_v19, %v2926_v20  ;;  %v2970_v4 = vld [vmem:[%s4324_s8 + $0xa0] sm:$0xff] }
 0x515   : > { %v2816_v52 = vpop.permute.xlu0 %2815  ;;  %v2811_v59 = vpop.permute.xlu1 %2810 }
 0x516   : > { %3023 = vst [vmem:[%s5635_s19 + $0x48] sm:$0xff] %v2991_v53  ;;  %3022 = vst [vmem:[%s5635_s19 + $0x40] sm:$0xff] %v2990_v55  ;;  %v2929_v13 = vmul.f32 %v2816_v52, %v5542_v45  ;;  %v2928_v26 = vmul.f32 %v2811_v59, %v5536_v61  ;;  %v2965_v61 = vld [vmem:[%s4324_s8 + $0x78] sm:$0xff]  ;;  %v2972_v53 = vld [vmem:[%s4324_s8 + $0xb0] sm:$0xff] }
 0x518   : > { %v2993_v22 = vadd.f32 %v2961_v44, %v2929_v13  ;;  %v2992_v10 = vadd.f32 %v2960_v12, %v2928_v26  ;;  %v2974_v13 = vld [vmem:[%s4324_s8 + $0xc0] sm:$0xff] }
 0x519   : > { %v2826_v8 = vpop.permute.xlu0 %2825  ;;  %v2821_v32 = vpop.permute.xlu1 %2820 }
 0x51a   : > { %3025 = vst [vmem:[%s5635_s19 + $0x58] sm:$0xff] %v2993_v22  ;;  %3024 = vst [vmem:[%s5635_s19 + $0x50] sm:$0xff] %v2992_v10  ;;  %v2931_v2 = vmul.f32 %v2826_v8, %v5559_v62  ;;  %v2930_v37 = vmul.f32 %v2821_v32, %v5554_v57  ;;  %v2967_v57 = vld [vmem:[%s4324_s8 + $0x88] sm:$0xff] }
 0x51c   : > { %v2995_v45 = vadd.f32 %v2963_v1, %v2931_v2  ;;  %v2994_v38 = vadd.f32 %v2962_v31, %v2930_v37  ;;  %v2976_v31 = vld [vmem:[%s4324_s8 + $0xd0] sm:$0xff] }
 0x51d   : > { %v2836_v15 = vpop.permute.xlu0 %2835  ;;  %v2831_v48 = vpop.permute.xlu1 %2830 }
 0x51e   : > { %3027 = vst [vmem:[%s5635_s19 + $0x68] sm:$0xff] %v2995_v45  ;;  %3026 = vst [vmem:[%s5635_s19 + $0x60] sm:$0xff] %v2994_v38  ;;  %v2933_v3 = vmul.f32 %v2836_v15, %v5572_v29  ;;  %v2932_v40 = vmul.f32 %v2831_v48, %v5569_v35  ;;  %v2969_v35 = vld [vmem:[%s4324_s8 + $0x98] sm:$0xff]  ;;  %v2979_v45 = vld [vmem:[%s4324_s8 + $0xe8] sm:$0xff] }
 0x520   : > { %v2997_v62 = vadd.f32 %v2965_v61, %v2933_v3  ;;  %v2996_v34 = vadd.f32 %v2964_v33, %v2932_v40  ;;  %v2978_v61 = vld [vmem:[%s4324_s8 + $0xe0] sm:$0xff] }
 0x521   : > { %v2846_v50 = vpop.permute.xlu0 %2845  ;;  %v2841_v25 = vpop.permute.xlu1 %2840 }
 0x522   : > { %3029 = vst [vmem:[%s5635_s19 + $0x78] sm:$0xff] %v2997_v62  ;;  %3028 = vst [vmem:[%s5635_s19 + $0x70] sm:$0xff] %v2996_v34  ;;  %v2935_v14 = vmul.f32 %v2846_v50, %v5582_v58  ;;  %v2934_v54 = vmul.f32 %v2841_v25, %v5580_v51  ;;  %v2971_v51 = vld [vmem:[%s4324_s8 + $0xa8] sm:$0xff]  ;;  %v2980_v62 = vld [vmem:[%s4324_s8 + $0xf0] sm:$0xff] }
 0x524   : > { %v2999_v29 = vadd.f32 %v2967_v57, %v2935_v14  ;;  %v2998_v43 = vadd.f32 %v2966_v56, %v2934_v54 }
 0x525   : > { %v2856_v9 = vpop.permute.xlu0 %2855  ;;  %v2851_v7 = vpop.permute.xlu1 %2850 }
 0x526   : > { %3031 = vst [vmem:[%s5635_s19 + $0x88] sm:$0xff] %v2999_v29  ;;  %3030 = vst [vmem:[%s5635_s19 + $0x80] sm:$0xff] %v2998_v43  ;;  %v2937_v46 = vmul.f32 %v2856_v9, %v5592_v30  ;;  %v2936_v63 = vmul.f32 %v2851_v7, %v5590_v17  ;;  %v2973_v17 = vld [vmem:[%s4324_s8 + $0xb8] sm:$0xff] }
 0x528   : > { %v3001_v58 = vadd.f32 %v2969_v35, %v2937_v46  ;;  %v3000_v36 = vadd.f32 %v2968_v47, %v2936_v63 }
 0x529   : > { %v2866_v16 = vpop.permute.xlu0 %2865  ;;  %v2861_v49 = vpop.permute.xlu1 %2860 }
 0x52a   : > { %3033 = vst [vmem:[%s5635_s19 + $0x98] sm:$0xff] %v3001_v58  ;;  %3032 = vst [vmem:[%s5635_s19 + $0x90] sm:$0xff] %v3000_v36  ;;  %v2939_v19 = vmul.f32 %v2866_v16, %v5600_v39  ;;  %v2938_v23 = vmul.f32 %v2861_v49, %v5598_v21  ;;  %v2975_v21 = vld [vmem:[%s4324_s8 + $0xc8] sm:$0xff] }
 0x52c   : > { %v3003_v30 = vadd.f32 %v2971_v51, %v2939_v19  ;;  %v3002_v27 = vadd.f32 %v2970_v4, %v2938_v23 }
 0x52d   : > { %v2876_v20 = vpop.permute.xlu0 %2875  ;;  %v2871_v55 = vpop.permute.xlu1 %2870 }
 0x52e   : > { %3035 = vst [vmem:[%s5635_s19 + $0xa8] sm:$0xff] %v3003_v30  ;;  %3034 = vst [vmem:[%s5635_s19 + $0xa0] sm:$0xff] %v3002_v27  ;;  %v2941_v44 = vmul.f32 %v2876_v20, %v5606_v42  ;;  %v2940_v52 = vmul.f32 %v2871_v55, %v5604_v24  ;;  %v2977_v24 = vld [vmem:[%s4324_s8 + $0xd8] sm:$0xff] }
 0x530   : > { %v3005_v39 = vadd.f32 %v2973_v17, %v2941_v44  ;;  %v3004_v12 = vadd.f32 %v2972_v53, %v2940_v52 }
 0x531   : > { %v2886_v59 = vpop.permute.xlu0 %2885  ;;  %v2881_v26 = vpop.permute.xlu1 %2880 }
 0x532   : > { %3037 = vst [vmem:[%s5635_s19 + $0xb8] sm:$0xff] %v3005_v39  ;;  %3036 = vst [vmem:[%s5635_s19 + $0xb0] sm:$0xff] %v3004_v12  ;;  %v2943_v22 = vmul.f32 %v2886_v59, %v5612_v60  ;;  %v2942_v10 = vmul.f32 %v2881_v26, %v5610_v41 }
 0x534   : > { %v3007_v42 = vadd.f32 %v2975_v21, %v2943_v22  ;;  %v3006_v1 = vadd.f32 %v2974_v13, %v2942_v10 }
 0x535   : > { %v2896_v8 = vpop.permute.xlu0 %2895  ;;  %v2891_v32 = vpop.permute.xlu1 %2890 }
 0x536   : > { %3039 = vst [vmem:[%s5635_s19 + $0xc8] sm:$0xff] %v3007_v42  ;;  %3038 = vst [vmem:[%s5635_s19 + $0xc0] sm:$0xff] %v3006_v1  ;;  %v2945_v2 = vmul.f32 %v2896_v8, %v5618_v0  ;;  %v2944_v60 = vmul.f32 %v2891_v32, %v5616_v11  ;;  %v2981_v11 = vld [vmem:[%s4324_s8 + $0xf8] sm:$0xff] }
 0x538   : > { %v3009_v37 = vadd.f32 %v2977_v24, %v2945_v2  ;;  %v3008_v41 = vadd.f32 %v2976_v31, %v2944_v60 }
 0x539   : > { %v2906_v38 = vpop.permute.xlu0 %2905  ;;  %v2901_v15 = vpop.permute.xlu1 %2900 }
 0x53a   : > { %3041 = vst [vmem:[%s5635_s19 + $0xd8] sm:$0xff] %v3009_v37  ;;  %3040 = vst [vmem:[%s5635_s19 + $0xd0] sm:$0xff] %v3008_v41  ;;  %v2947_v33 = vmul.f32 %v2906_v38, %v5624_v18  ;;  %v2946_v48 = vmul.f32 %v2901_v15, %v5622_v5 }
 0x53c   : > { %v3011_v3 = vadd.f32 %v2979_v45, %v2947_v33  ;;  %v3010_v0 = vadd.f32 %v2978_v61, %v2946_v48 }
 0x53d   : > { %v2916_v40 = vpop.permute.xlu0 %2915  ;;  %v2911_v34 = vpop.permute.xlu1 %2910 }
 0x53e   : > { %3043 = vst [vmem:[%s5635_s19 + $0xe8] sm:$0xff] %v3011_v3  ;;  %3042 = vst [vmem:[%s5635_s19 + $0xe0] sm:$0xff] %v3010_v0  ;;  %v2949_v57 = vmul.f32 %v2916_v40, %v5629_v28  ;;  %v2948_v18 = vmul.f32 %v2911_v34, %v5627_v6 }
 0x540   : > { %v3013_v5 = vadd.f32 %v2981_v11, %v2949_v57  ;;  %v3012_v50 = vadd.f32 %v2980_v62, %v2948_v18 }
 0x542   : > { %3045 = vst [vmem:[%s5635_s19 + $0xf8] sm:$0xff] %v3013_v5  ;;  %3044 = vst [vmem:[%s5635_s19 + $0xf0] sm:$0xff] %v3012_v50 }
 0x543   : > { %3946 = shalt.err (!%p3943_p12)
}
 0x544   : > { %s3947_s9 = scalar_lea.hbm %s5734_s30, 4096  ;;  %s3951_s8 = scalar_lea.hbm %s6096_s10, 8192 }
 0x545   : > { %p3948_p11 = scmp.ne.s32.totalorder %s5734_s30, %s3947_s9  ;;  %p3952_p1 = scmp.lt.u32.totalorder %s5734_s30, %s6096_s10 }
 0x546   : > { %p3953_p4 = scmp.lt.u32.totalorder %s3951_s8, %s3947_s9  ;;  %p3955_p5 = scmp.lt.u32.totalorder %s3947_s9, %s5734_s30 }
 0x547   : > { %p3949_p0 = pnand %p3948_p11, %p6097_p10 }
 0x548   : > { %p3954_p2 = por %p3953_p4, %p3952_p1 }
 0x549   : > { %p3950_p9 = pneg %p3949_p0 }
 0x54a   : > { %p3956_p13 = por %p3955_p5, %p3954_p2 }
 0x54c   : > { %p3957_p7 = pnand %p3956_p13, %p3950_p9 }
 0x54e   : > { %3960 = shalt.err (!%p3957_p7)
}
 0x54f   : > { %s4037_s14 = smov 128   ;;  %s4038_s17 = smov 8  }
 0x550   : > { %3491 = dma.vmem_to_hbm [thread:$0]  (%p6097_p10), %s5736_s15, 4096, %s5734_s30, %s3047_s26, %s4037_s14, %s4037_s14, %s4038_s17  }
 0x551 PF: > { %s6098_s6 = sld [smem:[#allocation20_spill]]  ;;  %s6099_s16 = sld [smem:[#allocation26_spill]] }
 0x552   : > { %s6100_s11 = sld [smem:[#allocation23_spill]] }
 0x557   : > { %s3077_s23 = sand.u32 1, %s6098_s6   ;;  %p6101_p3 = scmp.ne.s32.totalorder %s6099_s16, 0 }
 0x558   : > { %p6102_p6 = scmp.ge.s32.totalorder %s6100_s11, 2  ;;  %s3078_s19 = scalar_lea.sflag [#allocation9], %s3077_s23 }
 0x55a   : > { %p3508_p8 = pnand %p6102_p6, %p6101_p3 }
 0x55c   : > { %3998 = dma.done.wait (!%p3508_p8), %s3078_s19, 4096  }
 0x55d   : > { %4000 = vsyncadd (!%p3508_p8), %s3078_s19, 4294963200  ;;  %s27_s28 = sadd.s32 1, %s6100_s11   ;;  %s6103_s22 = sld [smem:[#allocation21_spill]] }
 0x55e   : > { %p24_p12 = scmp.ge.s32.totalorder %s27_s28, 4   ;;  %s6104_s25 = sld [smem:[#allocation25_spill]] }
 0x55f   : > { %s6105_s26 = sld [smem:[#allocation22_spill]]  ;;  %s6106_s27 = sld [smem:[#allocation24_spill]] }
 0x560   : > { %s6107_s23 = smov %s4007_s24  ;;  %26 = sbr.rel (!%p24_p12) target bundleno = 13 (0xd), region = 125 }
 0x563   : > { %s6108_s24 = smov %s6103_s22 }
 0x567   :  { %3083 = vsyncpa [#allocation8], 1 }
 0x568   :  { %3085 = vsyncpa [#allocation8 + $0x1], 1 }
 0x569   :  { %3086 = vsyncpa [#allocation11], 1 }
 0x56a   :  { %3088 = vsyncpa [#allocation11 + $0x1], 1 }
 0x56b   :  { %3089 = vsyncpa [#allocation14], 1 }
 0x56c   :  { %3090 = vsyncpa [#allocation9], 1 }
 0x56d   :  { %3092 = vsyncpa [#allocation9 + $0x1], 1 }

</bundles_post_ra>
